<compile_context>
chip_gen: v6e
topology: v6e:2x2x1
jax: 0.10.0
libtpu: 0.0.40
codegen_flags: <defaults>
</compile_context>

<pallas_src>
import functools
import math

import jax
import jax.numpy as jnp
from jax.experimental import pallas as pl
from jax.experimental.pallas import tpu as pltpu


LANE = 128  # TPU lane width; feature dims and the node dim are padded to this.

# Weight / bias stacking order (fixed; indexed inside the kernel).
_W_NAMES = ["ae_e_w1", "ae_e_w2", "ae_e_w3", "ae_e_wz",
            "ae_d_w1", "ae_d_w2", "ae_d_w3", "ae_d_wx",
            "g_e_w1", "g_e_w2", "g_e_w3",
            "g_d_w1", "g_d_w2", "g_d_w3"]
_B_NAMES = ["ae_e_b1", "ae_e_b2", "ae_e_b3", "ae_e_bz",
            "ae_d_b1", "ae_d_b2", "ae_d_b3", "ae_d_bx"]
_N_W = len(_W_NAMES)
_N_B = len(_B_NAMES)
_GNN_W_NAMES = ["g_e_w1", "g_e_w2", "g_e_w3", "g_d_w1", "g_d_w2", "g_d_w3"]


def _round_up(v, m=LANE):
    return ((v + m - 1) // m) * m


def _full_spec(shape):
    n = len(shape)
    return pl.BlockSpec(shape, lambda i, _n=n: (0,) * _n)


def _pad_to(arr, shape):
    out = jnp.zeros(shape, jnp.float32)
    return out.at[tuple(slice(0, s) for s in arr.shape)].set(arr.astype(jnp.float32))


# ----------------------------------------------------------------------------
# Single fused kernel.
#   refs order: x, adj, col_mask, row_mask, a, gamma,
#               14 per-layer weights, 8 biases, then 4 outputs
#               (x_hat, adj_hat, z_hat, z_tilde).
# Padding invariants (documented, relied upon):
#   * padded weight rows/cols and padded bias cols are zero -> padded FEATURE
#     columns of every activation stay exactly zero through the network.
#   * padded adj rows/cols are zero -> every `adj @ (.)` has zero padded rows,
#     and garbage in padded rows of upstream activations (bias broadcast) never
#     reaches real rows.
#   * padded NODE columns of the softmax logits get -1e30 via col_mask; padded
#     rows of z_tilde are zeroed via row_mask.
# ----------------------------------------------------------------------------
def _fused_kernel(x_ref, adj_ref, colm_ref, rowm_ref, a_ref, gamma_ref,
                  *refs, use_bf16):
    w_refs = refs[:_N_W]
    b_refs = refs[_N_W:_N_W + _N_B]
    x_hat_ref, adj_hat_ref, z_hat_ref, z_tilde_ref = refs[_N_W + _N_B:]

    f32 = jnp.float32
    compute_dtype = jnp.bfloat16 if use_bf16 else f32

    def mm(lhs, rhs):
        # MXU matmul; bf16 operands (if enabled) with f32 accumulation.
        return jnp.dot(lhs.astype(compute_dtype), rhs.astype(compute_dtype),
                       preferred_element_type=f32)

    def gram_f32(z):
        # z @ z.T kept in f32: these logits feed exp / sigmoid, which amplify error.
        return jax.lax.dot_general(z, z, (((1,), (1,)), ((), ())),
                                   preferred_element_type=f32)

    x = x_ref[...]
    adj = adj_ref[...]

    def linear(h, i, lrelu):
        y = mm(h, w_refs[i][...]) + b_refs[i][...]
        if lrelu:
            y = jnp.where(y > 0, y, 0.2 * y)      # LeakyReLU(0.2)
        return y

    def gnn(h, i, active):
        support = mm(h, w_refs[i][...])
        if active:
            support = jnp.tanh(support)
        return mm(adj, support)

    # ---- AE encoder ----
    h = linear(x, 0, True)
    h = linear(h, 1, True)
    h = linear(h, 2, True)
    z_ae = linear(h, 3, False)

    # ---- IGAE encoder ----
    g = gnn(x, 8, True)
    g = gnn(g, 9, True)
    z_igae = gnn(g, 10, False)

    # Stream the first adj_hat term out now (one fewer live N^2 temporary later).
    adj_hat_ref[...] = jax.nn.sigmoid(gram_f32(z_igae))

    # ---- Fusion: z_i -> z_l -> row-softmax self-attention -> z_tilde ----
    a = a_ref[...]
    z_i = a * z_ae + (1.0 - a) * z_igae
    z_l = mm(adj, z_i)

    s = gram_f32(z_l) + colm_ref[...]             # additive -1e30 on padded node cols
    s = s - jnp.max(s, axis=1, keepdims=True)
    e = jnp.exp(s)
    denom = jnp.sum(e, axis=1, keepdims=True)
    # Exact reciprocal keeps the 1e-4 f32 reference tolerance; approx=True moves it
    # onto the (otherwise idle) EUP slot at ~1e-4 relative error if acceptable.
    sm = e * pl.reciprocal(denom, approx=False)
    z_g = mm(sm, z_l)
    z_tilde = (gamma_ref[...] * z_g + z_l) * rowm_ref[...]   # zero padded rows
    z_tilde_ref[...] = z_tilde

    # ---- AE decoder ----
    d = linear(z_tilde, 4, True)
    d = linear(d, 5, True)
    d = linear(d, 6, True)
    x_hat_ref[...] = linear(d, 7, False)

    # ---- IGAE decoder ----
    g2 = gnn(z_tilde, 11, True)
    g2 = gnn(g2, 12, True)
    z_hat = gnn(g2, 13, True)
    z_hat_ref[...] = z_hat

    # ---- accumulate second adj_hat term ----
    adj_hat_ref[...] = adj_hat_ref[...] + jax.nn.sigmoid(gram_f32(z_hat))


# ----------------------------------------------------------------------------
# One-time packing (per model): per-layer zero-padding to (ru(K), ru(N)),
# optional bf16 pre-cast of weights, fusion params, and the softmax masks.
# ----------------------------------------------------------------------------
def pack_params(p, n_node, use_bf16=False):
    n_pad = _round_up(n_node)
    w_dtype = jnp.bfloat16 if use_bf16 else jnp.float32
    packed = {}
    for name in _W_NAMES:
        w = p[name]
        packed[name] = _pad_to(w, (_round_up(w.shape[0]),
                                   _round_up(w.shape[1]))).astype(w_dtype)
    for name in _B_NAMES:
        b = p[name]
        packed[name] = _pad_to(b, (1, _round_up(b.shape[1])))   # biases stay f32
    nz_pad = _round_up(p["a"].shape[1])
    packed["a"] = _pad_to(p["a"], (n_pad, nz_pad))
    packed["gamma"] = p["gamma"].reshape(1, 1).astype(jnp.float32)
    idx = jnp.arange(n_pad)
    packed["col_mask"] = jnp.where(idx < n_node, 0.0, -1e30).astype(
        jnp.float32).reshape(1, n_pad)
    packed["row_mask"] = (idx < n_node).astype(jnp.float32).reshape(n_pad, 1)
    return packed


# One-time padding (per graph): adj is static per graph; x is tiny.
def pad_graph(x, adj, use_bf16=False):
    n_node, n_input = x.shape
    n_pad, d_in_pad = _round_up(n_node), _round_up(n_input)
    x_pad = jnp.zeros((n_pad, d_in_pad), jnp.float32).at[:n_node, :n_input].set(x)
    a_dtype = jnp.bfloat16 if use_bf16 else jnp.float32
    adj_pad = jnp.zeros((n_pad, n_pad), a_dtype).at[:n_node, :n_node].set(
        adj.astype(a_dtype))
    return x_pad, adj_pad


# ----------------------------------------------------------------------------
# Jittable forward over pre-padded inputs: one pallas_call + output slicing.
# ----------------------------------------------------------------------------
def _forward_padded(x_pad, adj_pad, packed, *, dims, use_bf16):
    n_node, n_input, n_z = dims
    n_pad = x_pad.shape[0]
    d_in_pad = _round_up(n_input)
    nz_pad = _round_up(n_z)

    w_args = [packed[n] for n in _W_NAMES]
    b_args = [packed[n] for n in _B_NAMES]
    args = (x_pad, adj_pad, packed["col_mask"], packed["row_mask"],
            packed["a"], packed["gamma"], *w_args, *b_args)

    out_shapes = (
        jax.ShapeDtypeStruct((n_pad, d_in_pad), jnp.float32),   # x_hat
        jax.ShapeDtypeStruct((n_pad, n_pad), jnp.float32),      # adj_hat
        jax.ShapeDtypeStruct((n_pad, d_in_pad), jnp.float32),   # z_hat
        jax.ShapeDtypeStruct((n_pad, nz_pad), jnp.float32),     # z_tilde
    )

    # ---- working-set-sized VMEM limit + advisory cost estimate ----
    in_bytes = sum(int(a.size) * a.dtype.itemsize for a in args)
    out_bytes = sum(math.prod(s.shape) * 4 for s in out_shapes)
    max_w = max(packed[n].shape[1] for n in _W_NAMES)
    temp_bytes = 4 * (4 * n_pad * n_pad + 10 * n_pad * max_w)
    vmem_limit = int(min(64 * 1024 * 1024,
                         max(16 * 1024 * 1024,
                             2 * (in_bytes + out_bytes + temp_bytes))))

    flops = 0
    for name in _W_NAMES:                        # h @ W for every layer
        k, n = packed[name].shape
        flops += 2 * n_pad * k * n
    for name in _GNN_W_NAMES:                    # adj @ support for every GNN layer
        flops += 2 * n_pad * n_pad * packed[name].shape[1]
    flops += 2 * n_pad * n_pad * nz_pad * 4      # adj@z_i, gram(z_l), sm@z_l, gram(z_igae)
    flops += 2 * n_pad * n_pad * d_in_pad        # gram(z_hat)
    transcendentals = 3 * n_pad * n_pad + 6 * n_pad * max_w
    cost = pl.CostEstimate(flops=int(flops),
                           transcendentals=int(transcendentals),
                           bytes_accessed=int(in_bytes + out_bytes))

    kernel = functools.partial(_fused_kernel, use_bf16=use_bf16)
    x_hat_p, adj_hat_p, z_hat_p, z_tilde_p = pl.pallas_call(
        kernel,
        out_shape=out_shapes,
        grid=(1,),
        in_specs=[_full_spec(a.shape) for a in args],
        out_specs=tuple(_full_spec(s.shape) for s in out_shapes),
        compiler_params=pltpu.CompilerParams(
            dimension_semantics=("arbitrary",),
            vmem_limit_bytes=vmem_limit),
        cost_estimate=cost,
    )(*args)

    return (x_hat_p[:n_node, :n_input],
            adj_hat_p[:n_node, :n_node],
            z_hat_p[:n_node, :n_input],
            z_tilde_p[:n_node, :n_z])


def build_forward(dims, use_bf16=False):
    """Returns a jitted forward(x_pad, adj_pad, packed) with packing hoisted out."""
    return jax.jit(functools.partial(_forward_padded, dims=dims, use_bf16=use_bf16))


# ----------------------------------------------------------------------------
# Deterministic parameter init (synthetic; shapes follow the module's __init__)
# ----------------------------------------------------------------------------
def _xavier(key, shape):
    fan_in, fan_out = shape
    lim = (6.0 / (fan_in + fan_out)) ** 0.5
    return jax.random.uniform(key, shape, jnp.float32, -lim, lim)


def init_params(key, n_node, n_input, n_z,
                ae_e1, ae_e2, ae_e3, ae_d1, ae_d2, ae_d3,
                g_e1, g_e2, g_e3, g_d1, g_d2, g_d3):
    ks = jax.random.split(key, 14)
    p = {
        # AE encoder
        "ae_e_w1": _xavier(ks[0], (n_input, ae_e1)), "ae_e_b1": jnp.zeros((1, ae_e1), jnp.float32),
        "ae_e_w2": _xavier(ks[1], (ae_e1, ae_e2)),   "ae_e_b2": jnp.zeros((1, ae_e2), jnp.float32),
        "ae_e_w3": _xavier(ks[2], (ae_e2, ae_e3)),   "ae_e_b3": jnp.zeros((1, ae_e3), jnp.float32),
        "ae_e_wz": _xavier(ks[3], (ae_e3, n_z)),     "ae_e_bz": jnp.zeros((1, n_z), jnp.float32),
        # AE decoder
        "ae_d_w1": _xavier(ks[4], (n_z, ae_d1)),     "ae_d_b1": jnp.zeros((1, ae_d1), jnp.float32),
        "ae_d_w2": _xavier(ks[5], (ae_d1, ae_d2)),   "ae_d_b2": jnp.zeros((1, ae_d2), jnp.float32),
        "ae_d_w3": _xavier(ks[6], (ae_d2, ae_d3)),   "ae_d_b3": jnp.zeros((1, ae_d3), jnp.float32),
        "ae_d_wx": _xavier(ks[7], (ae_d3, n_input)), "ae_d_bx": jnp.zeros((1, n_input), jnp.float32),
        # IGAE encoder (no bias)
        "g_e_w1": _xavier(ks[8], (n_input, g_e1)),
        "g_e_w2": _xavier(ks[9], (g_e1, g_e2)),
        "g_e_w3": _xavier(ks[10], (g_e2, g_e3)),
        # IGAE decoder (no bias)
        "g_d_w1": _xavier(ks[11], (g_d1, g_d2)),
        "g_d_w2": _xavier(ks[12], (g_d2, g_d3)),
        "g_d_w3": _xavier(ks[13], (g_d3, n_input)),
        # fusion parameters: a init 0.5 (so b = 1-a = 0.5), gamma init 0
        "a": jnp.full((n_node, n_z), 0.5, jnp.float32),
        "gamma": jnp.zeros((1, 1), jnp.float32),
    }
    return p


# ----------------------------------------------------------------------------
# Pure-JAX reference (correctness sanity check only)
# ----------------------------------------------------------------------------
def ref_forward(x, adj, p):
    lrelu = lambda v: jnp.where(v > 0, v, 0.2 * v)
    h = lrelu(x @ p["ae_e_w1"] + p["ae_e_b1"])
    h = lrelu(h @ p["ae_e_w2"] + p["ae_e_b2"])
    h = lrelu(h @ p["ae_e_w3"] + p["ae_e_b3"])
    z_ae = h @ p["ae_e_wz"] + p["ae_e_bz"]

    g = adj @ jnp.tanh(x @ p["g_e_w1"])
    g = adj @ jnp.tanh(g @ p["g_e_w2"])
    z_igae = adj @ (g @ p["g_e_w3"])
    z_igae_adj = jax.nn.sigmoid(z_igae @ z_igae.T)

    a = p["a"]
    z_i = a * z_ae + (1.0 - a) * z_igae
    z_l = adj @ z_i
    s = jax.nn.softmax(z_l @ z_l.T, axis=1)
    z_g = s @ z_l
    z_tilde = p["gamma"] * z_g + z_l

    d = lrelu(z_tilde @ p["ae_d_w1"] + p["ae_d_b1"])
    d = lrelu(d @ p["ae_d_w2"] + p["ae_d_b2"])
    d = lrelu(d @ p["ae_d_w3"] + p["ae_d_b3"])
    x_hat = d @ p["ae_d_wx"] + p["ae_d_bx"]

    g = adj @ jnp.tanh(z_tilde @ p["g_d_w1"])
    g = adj @ jnp.tanh(g @ p["g_d_w2"])
    z_hat = adj @ jnp.tanh(g @ p["g_d_w3"])
    z_hat_adj = jax.nn.sigmoid(z_hat @ z_hat.T)

    return x_hat, z_igae_adj + z_hat_adj, z_hat, z_tilde


# ----------------------------------------------------------------------------
if __name__ == "__main__":
    # Small, module-consistent shapes (graph with 32 nodes, 16 input features).
    n_node, n_input, n_z = 32, 16, 8
    ae_e1, ae_e2, ae_e3 = 32, 16, 8
    ae_d1, ae_d2, ae_d3 = 8, 16, 32
    g_e1, g_e2, g_e3 = 32, 16, n_z        # g_e3 must equal n_z for the fusion
    g_d1, g_d2, g_d3 = n_z, 16, 32        # g_d1 must equal n_z (decoder input)

    key = jax.random.PRNGKey(0)
    k_x, k_a, k_p = jax.random.split(key, 3)

    x = jax.random.normal(k_x, (n_node, n_input), jnp.float32)
    a_raw = jax.random.uniform(k_a, (n_node, n_node), jnp.float32)
    adj = a_raw + jnp.eye(n_node, dtype=jnp.float32)
    adj = adj / jnp.sum(adj, axis=1, keepdims=True)   # row-normalized dense adjacency

    params = init_params(k_p, n_node, n_input, n_z,
                         ae_e1, ae_e2, ae_e3, ae_d1, ae_d2, ae_d3,
                         g_e1, g_e2, g_e3, g_d1, g_d2, g_d3)
    # The module inits gamma to 0 (which would zero the attention branch in the
    # outputs); use a nonzero gamma so the check exercises that path.
    params["gamma"] = jnp.full((1, 1), 0.3, jnp.float32)

    dims = (n_node, n_input, n_z)

    # ---- f32 path: pack / pad once (hoisted), jit the pallas_call-only forward ----
    packed = pack_params(params, n_node, use_bf16=False)
    x_pad, adj_pad = pad_graph(x, adj, use_bf16=False)
    fwd = build_forward(dims, use_bf16=False)

    outs = fwd(x_pad, adj_pad, packed)
    outs = jax.tree_util.tree_map(jax.block_until_ready, outs)

    refs = ref_forward(x, adj, params)
    for o, r in zip(outs, refs):
        assert o.shape == r.shape and o.dtype == r.dtype
        assert jnp.allclose(o, r, atol=1e-4, rtol=1e-4)

    # ---- optional bf16-MXU path (f32 accumulation, f32 softmax/sigmoid logits) ----
    packed_bf16 = pack_params(params, n_node, use_bf16=True)
    x_pad_b, adj_pad_b = pad_graph(x, adj, use_bf16=True)
    fwd_bf16 = build_forward(dims, use_bf16=True)
    outs_b = fwd_bf16(x_pad_b, adj_pad_b, packed_bf16)
    outs_b = jax.tree_util.tree_map(jax.block_until_ready, outs_b)
    for o, r in zip(outs_b, refs):
        assert o.shape == r.shape
        assert bool(jnp.isfinite(o).all())

    print("KERNEL_OK")
</pallas_src>

<mosaic_0001>
module attributes {stable_mosaic.version = 11 : i64} {
  func.func @_fused_kernel(%arg0: i32, %arg1: memref<128x128xf32, #tpu.memory_space<vmem>>, %arg2: memref<128x128xf32, #tpu.memory_space<vmem>>, %arg3: memref<1x128xf32, #tpu.memory_space<vmem>>, %arg4: memref<128x1xf32, #tpu.memory_space<vmem>>, %arg5: memref<128x128xf32, #tpu.memory_space<vmem>>, %arg6: memref<1x1xf32, #tpu.memory_space<vmem>>, %arg7: memref<128x128xf32, #tpu.memory_space<vmem>>, %arg8: memref<128x128xf32, #tpu.memory_space<vmem>>, %arg9: memref<128x128xf32, #tpu.memory_space<vmem>>, %arg10: memref<128x128xf32, #tpu.memory_space<vmem>>, %arg11: memref<128x128xf32, #tpu.memory_space<vmem>>, %arg12: memref<128x128xf32, #tpu.memory_space<vmem>>, %arg13: memref<128x128xf32, #tpu.memory_space<vmem>>, %arg14: memref<128x128xf32, #tpu.memory_space<vmem>>, %arg15: memref<128x128xf32, #tpu.memory_space<vmem>>, %arg16: memref<128x128xf32, #tpu.memory_space<vmem>>, %arg17: memref<128x128xf32, #tpu.memory_space<vmem>>, %arg18: memref<128x128xf32, #tpu.memory_space<vmem>>, %arg19: memref<128x128xf32, #tpu.memory_space<vmem>>, %arg20: memref<128x128xf32, #tpu.memory_space<vmem>>, %arg21: memref<1x128xf32, #tpu.memory_space<vmem>>, %arg22: memref<1x128xf32, #tpu.memory_space<vmem>>, %arg23: memref<1x128xf32, #tpu.memory_space<vmem>>, %arg24: memref<1x128xf32, #tpu.memory_space<vmem>>, %arg25: memref<1x128xf32, #tpu.memory_space<vmem>>, %arg26: memref<1x128xf32, #tpu.memory_space<vmem>>, %arg27: memref<1x128xf32, #tpu.memory_space<vmem>>, %arg28: memref<1x128xf32, #tpu.memory_space<vmem>>, %arg29: memref<128x128xf32, #tpu.memory_space<vmem>>, %arg30: memref<128x128xf32, #tpu.memory_space<vmem>>, %arg31: memref<128x128xf32, #tpu.memory_space<vmem>>, %arg32: memref<128x128xf32, #tpu.memory_space<vmem>>) attributes {dimension_semantics = [#tpu.dimension_semantics<arbitrary>], iteration_bounds = array<i64: 1>, scalar_prefetch = 0 : i64, scratch_operands = 0 : i64, tpu.core_type = #tpu.core_type<tc>, window_params = [{pipeline_mode = #tpu.pipeline_mode<synchronous>, transform_indices = @transform_0, window_bounds = array<i64: 128, 128>}, {pipeline_mode = #tpu.pipeline_mode<synchronous>, transform_indices = @transform_1, window_bounds = array<i64: 128, 128>}, {pipeline_mode = #tpu.pipeline_mode<synchronous>, transform_indices = @transform_2, window_bounds = array<i64: 1, 128>}, {pipeline_mode = #tpu.pipeline_mode<synchronous>, transform_indices = @transform_3, window_bounds = array<i64: 128, 1>}, {pipeline_mode = #tpu.pipeline_mode<synchronous>, transform_indices = @transform_4, window_bounds = array<i64: 128, 128>}, {pipeline_mode = #tpu.pipeline_mode<synchronous>, transform_indices = @transform_5, window_bounds = array<i64: 1, 1>}, {pipeline_mode = #tpu.pipeline_mode<synchronous>, transform_indices = @transform_6, window_bounds = array<i64: 128, 128>}, {pipeline_mode = #tpu.pipeline_mode<synchronous>, transform_indices = @transform_7, window_bounds = array<i64: 128, 128>}, {pipeline_mode = #tpu.pipeline_mode<synchronous>, transform_indices = @transform_8, window_bounds = array<i64: 128, 128>}, {pipeline_mode = #tpu.pipeline_mode<synchronous>, transform_indices = @transform_9, window_bounds = array<i64: 128, 128>}, {pipeline_mode = #tpu.pipeline_mode<synchronous>, transform_indices = @transform_10, window_bounds = array<i64: 128, 128>}, {pipeline_mode = #tpu.pipeline_mode<synchronous>, transform_indices = @transform_11, window_bounds = array<i64: 128, 128>}, {pipeline_mode = #tpu.pipeline_mode<synchronous>, transform_indices = @transform_12, window_bounds = array<i64: 128, 128>}, {pipeline_mode = #tpu.pipeline_mode<synchronous>, transform_indices = @transform_13, window_bounds = array<i64: 128, 128>}, {pipeline_mode = #tpu.pipeline_mode<synchronous>, transform_indices = @transform_14, window_bounds = array<i64: 128, 128>}, {pipeline_mode = #tpu.pipeline_mode<synchronous>, transform_indices = @transform_15, window_bounds = array<i64: 128, 128>}, {pipeline_mode = #tpu.pipeline_mode<synchronous>, transform_indices = @transform_16, window_bounds = array<i64: 128, 128>}, {pipeline_mode = #tpu.pipeline_mode<synchronous>, transform_indices = @transform_17, window_bounds = array<i64: 128, 128>}, {pipeline_mode = #tpu.pipeline_mode<synchronous>, transform_indices = @transform_18, window_bounds = array<i64: 128, 128>}, {pipeline_mode = #tpu.pipeline_mode<synchronous>, transform_indices = @transform_19, window_bounds = array<i64: 128, 128>}, {pipeline_mode = #tpu.pipeline_mode<synchronous>, transform_indices = @transform_20, window_bounds = array<i64: 1, 128>}, {pipeline_mode = #tpu.pipeline_mode<synchronous>, transform_indices = @transform_21, window_bounds = array<i64: 1, 128>}, {pipeline_mode = #tpu.pipeline_mode<synchronous>, transform_indices = @transform_22, window_bounds = array<i64: 1, 128>}, {pipeline_mode = #tpu.pipeline_mode<synchronous>, transform_indices = @transform_23, window_bounds = array<i64: 1, 128>}, {pipeline_mode = #tpu.pipeline_mode<synchronous>, transform_indices = @transform_24, window_bounds = array<i64: 1, 128>}, {pipeline_mode = #tpu.pipeline_mode<synchronous>, transform_indices = @transform_25, window_bounds = array<i64: 1, 128>}, {pipeline_mode = #tpu.pipeline_mode<synchronous>, transform_indices = @transform_26, window_bounds = array<i64: 1, 128>}, {pipeline_mode = #tpu.pipeline_mode<synchronous>, transform_indices = @transform_27, window_bounds = array<i64: 1, 128>}, {pipeline_mode = #tpu.pipeline_mode<synchronous>, transform_indices = @transform_28, window_bounds = array<i64: 128, 128>}, {pipeline_mode = #tpu.pipeline_mode<synchronous>, transform_indices = @transform_29, window_bounds = array<i64: 128, 128>}, {pipeline_mode = #tpu.pipeline_mode<synchronous>, transform_indices = @transform_30, window_bounds = array<i64: 128, 128>}, {pipeline_mode = #tpu.pipeline_mode<synchronous>, transform_indices = @transform_31, window_bounds = array<i64: 128, 128>}]} {
    %c0 = arith.constant 0 : index
    %c0_0 = arith.constant 0 : index
    %0 = vector.load %arg1[%c0, %c0_0] : memref<128x128xf32, #tpu.memory_space<vmem>>, vector<128x128xf32>
    %c0_1 = arith.constant 0 : index
    %c0_2 = arith.constant 0 : index
    %1 = vector.load %arg2[%c0_1, %c0_2] : memref<128x128xf32, #tpu.memory_space<vmem>>, vector<128x128xf32>
    %c0_3 = arith.constant 0 : index
    %c0_4 = arith.constant 0 : index
    %2 = vector.load %arg7[%c0_3, %c0_4] : memref<128x128xf32, #tpu.memory_space<vmem>>, vector<128x128xf32>
    %cst = arith.constant dense<0.000000e+00> : vector<128x128xf32>
    %3 = tpu.matmul %0, %2, %cst {dimension_numbers = #tpu.dot_dimension_numbers<[1], [0], [0], [1], [0, 0, 1, 1], [], []>} : vector<128x128xf32>, vector<128x128xf32>, vector<128x128xf32> -> vector<128x128xf32>
    %c0_5 = arith.constant 0 : index
    %c0_6 = arith.constant 0 : index
    %4 = vector.load %arg21[%c0_5, %c0_6] : memref<1x128xf32, #tpu.memory_space<vmem>>, vector<1x128xf32>
    %5 = vector.broadcast %4 : vector<1x128xf32> to vector<128x128xf32>
    %6 = arith.addf %3, %5 : vector<128x128xf32>
    %cst_7 = arith.constant 0.000000e+00 : f32
    %7 = vector.broadcast %cst_7 : f32 to vector<128x128xf32>
    %8 = arith.cmpf ogt, %6, %7 : vector<128x128xf32>
    %cst_8 = arith.constant 2.000000e-01 : f32
    %9 = vector.broadcast %cst_8 : f32 to vector<128x128xf32>
    %10 = arith.mulf %9, %6 : vector<128x128xf32>
    %11 = arith.select %8, %6, %10 : vector<128x128xi1>, vector<128x128xf32>
    %c0_9 = arith.constant 0 : index
    %c0_10 = arith.constant 0 : index
    %12 = vector.load %arg8[%c0_9, %c0_10] : memref<128x128xf32, #tpu.memory_space<vmem>>, vector<128x128xf32>
    %cst_11 = arith.constant dense<0.000000e+00> : vector<128x128xf32>
    %13 = tpu.matmul %11, %12, %cst_11 {dimension_numbers = #tpu.dot_dimension_numbers<[1], [0], [0], [1], [0, 0, 1, 1], [], []>} : vector<128x128xf32>, vector<128x128xf32>, vector<128x128xf32> -> vector<128x128xf32>
    %c0_12 = arith.constant 0 : index
    %c0_13 = arith.constant 0 : index
    %14 = vector.load %arg22[%c0_12, %c0_13] : memref<1x128xf32, #tpu.memory_space<vmem>>, vector<1x128xf32>
    %15 = vector.broadcast %14 : vector<1x128xf32> to vector<128x128xf32>
    %16 = arith.addf %13, %15 : vector<128x128xf32>
    %cst_14 = arith.constant 0.000000e+00 : f32
    %17 = vector.broadcast %cst_14 : f32 to vector<128x128xf32>
    %18 = arith.cmpf ogt, %16, %17 : vector<128x128xf32>
    %cst_15 = arith.constant 2.000000e-01 : f32
    %19 = vector.broadcast %cst_15 : f32 to vector<128x128xf32>
    %20 = arith.mulf %19, %16 : vector<128x128xf32>
    %21 = arith.select %18, %16, %20 : vector<128x128xi1>, vector<128x128xf32>
    %c0_16 = arith.constant 0 : index
    %c0_17 = arith.constant 0 : index
    %22 = vector.load %arg9[%c0_16, %c0_17] : memref<128x128xf32, #tpu.memory_space<vmem>>, vector<128x128xf32>
    %cst_18 = arith.constant dense<0.000000e+00> : vector<128x128xf32>
    %23 = tpu.matmul %21, %22, %cst_18 {dimension_numbers = #tpu.dot_dimension_numbers<[1], [0], [0], [1], [0, 0, 1, 1], [], []>} : vector<128x128xf32>, vector<128x128xf32>, vector<128x128xf32> -> vector<128x128xf32>
    %c0_19 = arith.constant 0 : index
    %c0_20 = arith.constant 0 : index
    %24 = vector.load %arg23[%c0_19, %c0_20] : memref<1x128xf32, #tpu.memory_space<vmem>>, vector<1x128xf32>
    %25 = vector.broadcast %24 : vector<1x128xf32> to vector<128x128xf32>
    %26 = arith.addf %23, %25 : vector<128x128xf32>
    %cst_21 = arith.constant 0.000000e+00 : f32
    %27 = vector.broadcast %cst_21 : f32 to vector<128x128xf32>
    %28 = arith.cmpf ogt, %26, %27 : vector<128x128xf32>
    %cst_22 = arith.constant 2.000000e-01 : f32
    %29 = vector.broadcast %cst_22 : f32 to vector<128x128xf32>
    %30 = arith.mulf %29, %26 : vector<128x128xf32>
    %31 = arith.select %28, %26, %30 : vector<128x128xi1>, vector<128x128xf32>
    %c0_23 = arith.constant 0 : index
    %c0_24 = arith.constant 0 : index
    %32 = vector.load %arg10[%c0_23, %c0_24] : memref<128x128xf32, #tpu.memory_space<vmem>>, vector<128x128xf32>
    %cst_25 = arith.constant dense<0.000000e+00> : vector<128x128xf32>
    %33 = tpu.matmul %31, %32, %cst_25 {dimension_numbers = #tpu.dot_dimension_numbers<[1], [0], [0], [1], [0, 0, 1, 1], [], []>} : vector<128x128xf32>, vector<128x128xf32>, vector<128x128xf32> -> vector<128x128xf32>
    %c0_26 = arith.constant 0 : index
    %c0_27 = arith.constant 0 : index
    %34 = vector.load %arg24[%c0_26, %c0_27] : memref<1x128xf32, #tpu.memory_space<vmem>>, vector<1x128xf32>
    %35 = vector.broadcast %34 : vector<1x128xf32> to vector<128x128xf32>
    %36 = arith.addf %33, %35 : vector<128x128xf32>
    %c0_28 = arith.constant 0 : index
    %c0_29 = arith.constant 0 : index
    %37 = vector.load %arg15[%c0_28, %c0_29] : memref<128x128xf32, #tpu.memory_space<vmem>>, vector<128x128xf32>
    %cst_30 = arith.constant dense<0.000000e+00> : vector<128x128xf32>
    %38 = tpu.matmul %0, %37, %cst_30 {dimension_numbers = #tpu.dot_dimension_numbers<[1], [0], [0], [1], [0, 0, 1, 1], [], []>} : vector<128x128xf32>, vector<128x128xf32>, vector<128x128xf32> -> vector<128x128xf32>
    %39 = math.tanh %38 : vector<128x128xf32>
    %cst_31 = arith.constant dense<0.000000e+00> : vector<128x128xf32>
    %40 = tpu.matmul %1, %39, %cst_31 {dimension_numbers = #tpu.dot_dimension_numbers<[1], [0], [0], [1], [0, 0, 1, 1], [], []>} : vector<128x128xf32>, vector<128x128xf32>, vector<128x128xf32> -> vector<128x128xf32>
    %c0_32 = arith.constant 0 : index
    %c0_33 = arith.constant 0 : index
    %41 = vector.load %arg16[%c0_32, %c0_33] : memref<128x128xf32, #tpu.memory_space<vmem>>, vector<128x128xf32>
    %cst_34 = arith.constant dense<0.000000e+00> : vector<128x128xf32>
    %42 = tpu.matmul %40, %41, %cst_34 {dimension_numbers = #tpu.dot_dimension_numbers<[1], [0], [0], [1], [0, 0, 1, 1], [], []>} : vector<128x128xf32>, vector<128x128xf32>, vector<128x128xf32> -> vector<128x128xf32>
    %43 = math.tanh %42 : vector<128x128xf32>
    %cst_35 = arith.constant dense<0.000000e+00> : vector<128x128xf32>
    %44 = tpu.matmul %1, %43, %cst_35 {dimension_numbers = #tpu.dot_dimension_numbers<[1], [0], [0], [1], [0, 0, 1, 1], [], []>} : vector<128x128xf32>, vector<128x128xf32>, vector<128x128xf32> -> vector<128x128xf32>
    %c0_36 = arith.constant 0 : index
    %c0_37 = arith.constant 0 : index
    %45 = vector.load %arg17[%c0_36, %c0_37] : memref<128x128xf32, #tpu.memory_space<vmem>>, vector<128x128xf32>
    %cst_38 = arith.constant dense<0.000000e+00> : vector<128x128xf32>
    %46 = tpu.matmul %44, %45, %cst_38 {dimension_numbers = #tpu.dot_dimension_numbers<[1], [0], [0], [1], [0, 0, 1, 1], [], []>} : vector<128x128xf32>, vector<128x128xf32>, vector<128x128xf32> -> vector<128x128xf32>
    %cst_39 = arith.constant dense<0.000000e+00> : vector<128x128xf32>
    %47 = tpu.matmul %1, %46, %cst_39 {dimension_numbers = #tpu.dot_dimension_numbers<[1], [0], [0], [1], [0, 0, 1, 1], [], []>} : vector<128x128xf32>, vector<128x128xf32>, vector<128x128xf32> -> vector<128x128xf32>
    %cst_40 = arith.constant dense<0.000000e+00> : vector<128x128xf32>
    %48 = tpu.matmul %47, %47, %cst_40 {dimension_numbers = #tpu.dot_dimension_numbers<[1], [1], [0], [0], [0, 0, 1, 0], [], []>} : vector<128x128xf32>, vector<128x128xf32>, vector<128x128xf32> -> vector<128x128xf32>
    %49 = arith.negf %48 : vector<128x128xf32>
    %50 = math.exp %49 : vector<128x128xf32>
    %cst_41 = arith.constant 1.000000e+00 : f32
    %51 = vector.broadcast %cst_41 : f32 to vector<128x128xf32>
    %52 = arith.addf %51, %50 : vector<128x128xf32>
    %53 = arith.divf %51, %52 : vector<128x128xf32>
    %c0_42 = arith.constant 0 : index
    %c0_43 = arith.constant 0 : index
    %54 = vector.load %arg30[%c0_42, %c0_43] : memref<128x128xf32, #tpu.memory_space<vmem>>, vector<128x128xf32>
    tpu.vector_store %arg30[%c0_42, %c0_43], %53 {strides = array<i32>} : memref<128x128xf32, #tpu.memory_space<vmem>>, vector<128x128xf32>,
    %c0_44 = arith.constant 0 : index
    %c0_45 = arith.constant 0 : index
    %55 = vector.load %arg5[%c0_44, %c0_45] : memref<128x128xf32, #tpu.memory_space<vmem>>, vector<128x128xf32>
    %56 = arith.mulf %55, %36 : vector<128x128xf32>
    %cst_46 = arith.constant 1.000000e+00 : f32
    %57 = vector.broadcast %cst_46 : f32 to vector<128x128xf32>
    %58 = arith.subf %57, %55 : vector<128x128xf32>
    %59 = arith.mulf %58, %47 : vector<128x128xf32>
    %60 = arith.addf %56, %59 : vector<128x128xf32>
    %cst_47 = arith.constant dense<0.000000e+00> : vector<128x128xf32>
    %61 = tpu.matmul %1, %60, %cst_47 {dimension_numbers = #tpu.dot_dimension_numbers<[1], [0], [0], [1], [0, 0, 1, 1], [], []>} : vector<128x128xf32>, vector<128x128xf32>, vector<128x128xf32> -> vector<128x128xf32>
    %cst_48 = arith.constant dense<0.000000e+00> : vector<128x128xf32>
    %62 = tpu.matmul %61, %61, %cst_48 {dimension_numbers = #tpu.dot_dimension_numbers<[1], [1], [0], [0], [0, 0, 1, 0], [], []>} : vector<128x128xf32>, vector<128x128xf32>, vector<128x128xf32> -> vector<128x128xf32>
    %c0_49 = arith.constant 0 : index
    %c0_50 = arith.constant 0 : index
    %63 = vector.load %arg3[%c0_49, %c0_50] : memref<1x128xf32, #tpu.memory_space<vmem>>, vector<1x128xf32>
    %64 = vector.broadcast %63 : vector<1x128xf32> to vector<128x128xf32>
    %65 = arith.addf %62, %64 : vector<128x128xf32>
    %cst_51 = arith.constant dense<0xFF800000> : vector<128xf32>
    %66 = vector.multi_reduction <maximumf>, %65, %cst_51 [1] : vector<128x128xf32> to vector<128xf32>
    %67 = vector.shape_cast %66 : vector<128xf32> to vector<128x1xf32>
    %68 = vector.broadcast %67 : vector<128x1xf32> to vector<128x128xf32>
    %69 = arith.subf %65, %68 : vector<128x128xf32>
    %70 = math.exp %69 : vector<128x128xf32>
    %cst_52 = arith.constant dense<0.000000e+00> : vector<128xf32>
    %71 = vector.multi_reduction <add>, %70, %cst_52 [1] : vector<128x128xf32> to vector<128xf32>
    %72 = vector.shape_cast %71 : vector<128xf32> to vector<128x1xf32>
    %73 = tpu.reciprocal %72 : vector<128x1xf32> -> vector<128x1xf32>
    %74 = vector.broadcast %73 : vector<128x1xf32> to vector<128x128xf32>
    %75 = arith.mulf %70, %74 : vector<128x128xf32>
    %cst_53 = arith.constant dense<0.000000e+00> : vector<128x128xf32>
    %76 = tpu.matmul %75, %61, %cst_53 {dimension_numbers = #tpu.dot_dimension_numbers<[1], [0], [0], [1], [0, 0, 1, 1], [], []>} : vector<128x128xf32>, vector<128x128xf32>, vector<128x128xf32> -> vector<128x128xf32>
    %c0_54 = arith.constant 0 : index
    %c0_55 = arith.constant 0 : index
    %77 = vector.load %arg6[%c0_54, %c0_55] : memref<1x1xf32, #tpu.memory_space<vmem>>, vector<1x1xf32>
    %78 = vector.broadcast %77 : vector<1x1xf32> to vector<128x128xf32>
    %79 = arith.mulf %78, %76 : vector<128x128xf32>
    %80 = arith.addf %79, %61 : vector<128x128xf32>
    %c0_56 = arith.constant 0 : index
    %c0_57 = arith.constant 0 : index
    %81 = vector.load %arg4[%c0_56, %c0_57] : memref<128x1xf32, #tpu.memory_space<vmem>>, vector<128x1xf32>
    %82 = vector.broadcast %81 : vector<128x1xf32> to vector<128x128xf32>
    %83 = arith.mulf %80, %82 : vector<128x128xf32>
    %c0_58 = arith.constant 0 : index
    %c0_59 = arith.constant 0 : index
    %84 = vector.load %arg32[%c0_58, %c0_59] : memref<128x128xf32, #tpu.memory_space<vmem>>, vector<128x128xf32>
    tpu.vector_store %arg32[%c0_58, %c0_59], %83 {strides = array<i32>} : memref<128x128xf32, #tpu.memory_space<vmem>>, vector<128x128xf32>,
    %c0_60 = arith.constant 0 : index
    %c0_61 = arith.constant 0 : index
    %85 = vector.load %arg11[%c0_60, %c0_61] : memref<128x128xf32, #tpu.memory_space<vmem>>, vector<128x128xf32>
    %cst_62 = arith.constant dense<0.000000e+00> : vector<128x128xf32>
    %86 = tpu.matmul %83, %85, %cst_62 {dimension_numbers = #tpu.dot_dimension_numbers<[1], [0], [0], [1], [0, 0, 1, 1], [], []>} : vector<128x128xf32>, vector<128x128xf32>, vector<128x128xf32> -> vector<128x128xf32>
    %c0_63 = arith.constant 0 : index
    %c0_64 = arith.constant 0 : index
    %87 = vector.load %arg25[%c0_63, %c0_64] : memref<1x128xf32, #tpu.memory_space<vmem>>, vector<1x128xf32>
    %88 = vector.broadcast %87 : vector<1x128xf32> to vector<128x128xf32>
    %89 = arith.addf %86, %88 : vector<128x128xf32>
    %cst_65 = arith.constant 0.000000e+00 : f32
    %90 = vector.broadcast %cst_65 : f32 to vector<128x128xf32>
    %91 = arith.cmpf ogt, %89, %90 : vector<128x128xf32>
    %cst_66 = arith.constant 2.000000e-01 : f32
    %92 = vector.broadcast %cst_66 : f32 to vector<128x128xf32>
    %93 = arith.mulf %92, %89 : vector<128x128xf32>
    %94 = arith.select %91, %89, %93 : vector<128x128xi1>, vector<128x128xf32>
    %c0_67 = arith.constant 0 : index
    %c0_68 = arith.constant 0 : index
    %95 = vector.load %arg12[%c0_67, %c0_68] : memref<128x128xf32, #tpu.memory_space<vmem>>, vector<128x128xf32>
    %cst_69 = arith.constant dense<0.000000e+00> : vector<128x128xf32>
    %96 = tpu.matmul %94, %95, %cst_69 {dimension_numbers = #tpu.dot_dimension_numbers<[1], [0], [0], [1], [0, 0, 1, 1], [], []>} : vector<128x128xf32>, vector<128x128xf32>, vector<128x128xf32> -> vector<128x128xf32>
    %c0_70 = arith.constant 0 : index
    %c0_71 = arith.constant 0 : index
    %97 = vector.load %arg26[%c0_70, %c0_71] : memref<1x128xf32, #tpu.memory_space<vmem>>, vector<1x128xf32>
    %98 = vector.broadcast %97 : vector<1x128xf32> to vector<128x128xf32>
    %99 = arith.addf %96, %98 : vector<128x128xf32>
    %cst_72 = arith.constant 0.000000e+00 : f32
    %100 = vector.broadcast %cst_72 : f32 to vector<128x128xf32>
    %101 = arith.cmpf ogt, %99, %100 : vector<128x128xf32>
    %cst_73 = arith.constant 2.000000e-01 : f32
    %102 = vector.broadcast %cst_73 : f32 to vector<128x128xf32>
    %103 = arith.mulf %102, %99 : vector<128x128xf32>
    %104 = arith.select %101, %99, %103 : vector<128x128xi1>, vector<128x128xf32>
    %c0_74 = arith.constant 0 : index
    %c0_75 = arith.constant 0 : index
    %105 = vector.load %arg13[%c0_74, %c0_75] : memref<128x128xf32, #tpu.memory_space<vmem>>, vector<128x128xf32>
    %cst_76 = arith.constant dense<0.000000e+00> : vector<128x128xf32>
    %106 = tpu.matmul %104, %105, %cst_76 {dimension_numbers = #tpu.dot_dimension_numbers<[1], [0], [0], [1], [0, 0, 1, 1], [], []>} : vector<128x128xf32>, vector<128x128xf32>, vector<128x128xf32> -> vector<128x128xf32>
    %c0_77 = arith.constant 0 : index
    %c0_78 = arith.constant 0 : index
    %107 = vector.load %arg27[%c0_77, %c0_78] : memref<1x128xf32, #tpu.memory_space<vmem>>, vector<1x128xf32>
    %108 = vector.broadcast %107 : vector<1x128xf32> to vector<128x128xf32>
    %109 = arith.addf %106, %108 : vector<128x128xf32>
    %cst_79 = arith.constant 0.000000e+00 : f32
    %110 = vector.broadcast %cst_79 : f32 to vector<128x128xf32>
    %111 = arith.cmpf ogt, %109, %110 : vector<128x128xf32>
    %cst_80 = arith.constant 2.000000e-01 : f32
    %112 = vector.broadcast %cst_80 : f32 to vector<128x128xf32>
    %113 = arith.mulf %112, %109 : vector<128x128xf32>
    %114 = arith.select %111, %109, %113 : vector<128x128xi1>, vector<128x128xf32>
    %c0_81 = arith.constant 0 : index
    %c0_82 = arith.constant 0 : index
    %115 = vector.load %arg14[%c0_81, %c0_82] : memref<128x128xf32, #tpu.memory_space<vmem>>, vector<128x128xf32>
    %cst_83 = arith.constant dense<0.000000e+00> : vector<128x128xf32>
    %116 = tpu.matmul %114, %115, %cst_83 {dimension_numbers = #tpu.dot_dimension_numbers<[1], [0], [0], [1], [0, 0, 1, 1], [], []>} : vector<128x128xf32>, vector<128x128xf32>, vector<128x128xf32> -> vector<128x128xf32>
    %c0_84 = arith.constant 0 : index
    %c0_85 = arith.constant 0 : index
    %117 = vector.load %arg28[%c0_84, %c0_85] : memref<1x128xf32, #tpu.memory_space<vmem>>, vector<1x128xf32>
    %118 = vector.broadcast %117 : vector<1x128xf32> to vector<128x128xf32>
    %119 = arith.addf %116, %118 : vector<128x128xf32>
    %c0_86 = arith.constant 0 : index
    %c0_87 = arith.constant 0 : index
    %120 = vector.load %arg29[%c0_86, %c0_87] : memref<128x128xf32, #tpu.memory_space<vmem>>, vector<128x128xf32>
    tpu.vector_store %arg29[%c0_86, %c0_87], %119 {strides = array<i32>} : memref<128x128xf32, #tpu.memory_space<vmem>>, vector<128x128xf32>,
    %c0_88 = arith.constant 0 : index
    %c0_89 = arith.constant 0 : index
    %121 = vector.load %arg18[%c0_88, %c0_89] : memref<128x128xf32, #tpu.memory_space<vmem>>, vector<128x128xf32>
    %cst_90 = arith.constant dense<0.000000e+00> : vector<128x128xf32>
    %122 = tpu.matmul %83, %121, %cst_90 {dimension_numbers = #tpu.dot_dimension_numbers<[1], [0], [0], [1], [0, 0, 1, 1], [], []>} : vector<128x128xf32>, vector<128x128xf32>, vector<128x128xf32> -> vector<128x128xf32>
    %123 = math.tanh %122 : vector<128x128xf32>
    %cst_91 = arith.constant dense<0.000000e+00> : vector<128x128xf32>
    %124 = tpu.matmul %1, %123, %cst_91 {dimension_numbers = #tpu.dot_dimension_numbers<[1], [0], [0], [1], [0, 0, 1, 1], [], []>} : vector<128x128xf32>, vector<128x128xf32>, vector<128x128xf32> -> vector<128x128xf32>
    %c0_92 = arith.constant 0 : index
    %c0_93 = arith.constant 0 : index
    %125 = vector.load %arg19[%c0_92, %c0_93] : memref<128x128xf32, #tpu.memory_space<vmem>>, vector<128x128xf32>
    %cst_94 = arith.constant dense<0.000000e+00> : vector<128x128xf32>
    %126 = tpu.matmul %124, %125, %cst_94 {dimension_numbers = #tpu.dot_dimension_numbers<[1], [0], [0], [1], [0, 0, 1, 1], [], []>} : vector<128x128xf32>, vector<128x128xf32>, vector<128x128xf32> -> vector<128x128xf32>
    %127 = math.tanh %126 : vector<128x128xf32>
    %cst_95 = arith.constant dense<0.000000e+00> : vector<128x128xf32>
    %128 = tpu.matmul %1, %127, %cst_95 {dimension_numbers = #tpu.dot_dimension_numbers<[1], [0], [0], [1], [0, 0, 1, 1], [], []>} : vector<128x128xf32>, vector<128x128xf32>, vector<128x128xf32> -> vector<128x128xf32>
    %c0_96 = arith.constant 0 : index
    %c0_97 = arith.constant 0 : index
    %129 = vector.load %arg20[%c0_96, %c0_97] : memref<128x128xf32, #tpu.memory_space<vmem>>, vector<128x128xf32>
    %cst_98 = arith.constant dense<0.000000e+00> : vector<128x128xf32>
    %130 = tpu.matmul %128, %129, %cst_98 {dimension_numbers = #tpu.dot_dimension_numbers<[1], [0], [0], [1], [0, 0, 1, 1], [], []>} : vector<128x128xf32>, vector<128x128xf32>, vector<128x128xf32> -> vector<128x128xf32>
    %131 = math.tanh %130 : vector<128x128xf32>
    %cst_99 = arith.constant dense<0.000000e+00> : vector<128x128xf32>
    %132 = tpu.matmul %1, %131, %cst_99 {dimension_numbers = #tpu.dot_dimension_numbers<[1], [0], [0], [1], [0, 0, 1, 1], [], []>} : vector<128x128xf32>, vector<128x128xf32>, vector<128x128xf32> -> vector<128x128xf32>
    %c0_100 = arith.constant 0 : index
    %c0_101 = arith.constant 0 : index
    %133 = vector.load %arg31[%c0_100, %c0_101] : memref<128x128xf32, #tpu.memory_space<vmem>>, vector<128x128xf32>
    tpu.vector_store %arg31[%c0_100, %c0_101], %132 {strides = array<i32>} : memref<128x128xf32, #tpu.memory_space<vmem>>, vector<128x128xf32>,
    %c0_102 = arith.constant 0 : index
    %c0_103 = arith.constant 0 : index
    %134 = vector.load %arg30[%c0_102, %c0_103] : memref<128x128xf32, #tpu.memory_space<vmem>>, vector<128x128xf32>
    %cst_104 = arith.constant dense<0.000000e+00> : vector<128x128xf32>
    %135 = tpu.matmul %132, %132, %cst_104 {dimension_numbers = #tpu.dot_dimension_numbers<[1], [1], [0], [0], [0, 0, 1, 0], [], []>} : vector<128x128xf32>, vector<128x128xf32>, vector<128x128xf32> -> vector<128x128xf32>
    %136 = arith.negf %135 : vector<128x128xf32>
    %137 = math.exp %136 : vector<128x128xf32>
    %cst_105 = arith.constant 1.000000e+00 : f32
    %138 = vector.broadcast %cst_105 : f32 to vector<128x128xf32>
    %139 = arith.addf %138, %137 : vector<128x128xf32>
    %140 = arith.divf %138, %139 : vector<128x128xf32>
    %141 = arith.addf %134, %140 : vector<128x128xf32>
    %c0_106 = arith.constant 0 : index
    %c0_107 = arith.constant 0 : index
    %142 = vector.load %arg30[%c0_106, %c0_107] : memref<128x128xf32, #tpu.memory_space<vmem>>, vector<128x128xf32>
    tpu.vector_store %arg30[%c0_106, %c0_107], %141 {strides = array<i32>} : memref<128x128xf32, #tpu.memory_space<vmem>>, vector<128x128xf32>,
    return
  }
  func.func @transform_0(%arg0: i32) -> (i32, i32) {
    %c0_i32 = arith.constant 0 : i32
    %c0_i32_0 = arith.constant 0 : i32
    %c0_i32_1 = arith.constant 0 : i32
    return %c0_i32, %c0_i32_0 : i32, i32
  }
  func.func @transform_1(%arg0: i32) -> (i32, i32) {
    %c0_i32 = arith.constant 0 : i32
    %c0_i32_0 = arith.constant 0 : i32
    %c0_i32_1 = arith.constant 0 : i32
    return %c0_i32, %c0_i32_0 : i32, i32
  }
  func.func @transform_2(%arg0: i32) -> (i32, i32) {
    %c0_i32 = arith.constant 0 : i32
    %c0_i32_0 = arith.constant 0 : i32
    %c0_i32_1 = arith.constant 0 : i32
    return %c0_i32, %c0_i32_0 : i32, i32
  }
  func.func @transform_3(%arg0: i32) -> (i32, i32) {
    %c0_i32 = arith.constant 0 : i32
    %c0_i32_0 = arith.constant 0 : i32
    %c0_i32_1 = arith.constant 0 : i32
    return %c0_i32, %c0_i32_0 : i32, i32
  }
  func.func @transform_4(%arg0: i32) -> (i32, i32) {
    %c0_i32 = arith.constant 0 : i32
    %c0_i32_0 = arith.constant 0 : i32
    %c0_i32_1 = arith.constant 0 : i32
    return %c0_i32, %c0_i32_0 : i32, i32
  }
  func.func @transform_5(%arg0: i32) -> (i32, i32) {
    %c0_i32 = arith.constant 0 : i32
    %c0_i32_0 = arith.constant 0 : i32
    %c0_i32_1 = arith.constant 0 : i32
    return %c0_i32, %c0_i32_0 : i32, i32
  }
  func.func @transform_6(%arg0: i32) -> (i32, i32) {
    %c0_i32 = arith.constant 0 : i32
    %c0_i32_0 = arith.constant 0 : i32
    %c0_i32_1 = arith.constant 0 : i32
    return %c0_i32, %c0_i32_0 : i32, i32
  }
  func.func @transform_7(%arg0: i32) -> (i32, i32) {
    %c0_i32 = arith.constant 0 : i32
    %c0_i32_0 = arith.constant 0 : i32
    %c0_i32_1 = arith.constant 0 : i32
    return %c0_i32, %c0_i32_0 : i32, i32
  }
  func.func @transform_8(%arg0: i32) -> (i32, i32) {
    %c0_i32 = arith.constant 0 : i32
    %c0_i32_0 = arith.constant 0 : i32
    %c0_i32_1 = arith.constant 0 : i32
    return %c0_i32, %c0_i32_0 : i32, i32
  }
  func.func @transform_9(%arg0: i32) -> (i32, i32) {
    %c0_i32 = arith.constant 0 : i32
    %c0_i32_0 = arith.constant 0 : i32
    %c0_i32_1 = arith.constant 0 : i32
    return %c0_i32, %c0_i32_0 : i32, i32
  }
  func.func @transform_10(%arg0: i32) -> (i32, i32) {
    %c0_i32 = arith.constant 0 : i32
    %c0_i32_0 = arith.constant 0 : i32
    %c0_i32_1 = arith.constant 0 : i32
    return %c0_i32, %c0_i32_0 : i32, i32
  }
  func.func @transform_11(%arg0: i32) -> (i32, i32) {
    %c0_i32 = arith.constant 0 : i32
    %c0_i32_0 = arith.constant 0 : i32
    %c0_i32_1 = arith.constant 0 : i32
    return %c0_i32, %c0_i32_0 : i32, i32
  }
  func.func @transform_12(%arg0: i32) -> (i32, i32) {
    %c0_i32 = arith.constant 0 : i32
    %c0_i32_0 = arith.constant 0 : i32
    %c0_i32_1 = arith.constant 0 : i32
    return %c0_i32, %c0_i32_0 : i32, i32
  }
  func.func @transform_13(%arg0: i32) -> (i32, i32) {
    %c0_i32 = arith.constant 0 : i32
    %c0_i32_0 = arith.constant 0 : i32
    %c0_i32_1 = arith.constant 0 : i32
    return %c0_i32, %c0_i32_0 : i32, i32
  }
  func.func @transform_14(%arg0: i32) -> (i32, i32) {
    %c0_i32 = arith.constant 0 : i32
    %c0_i32_0 = arith.constant 0 : i32
    %c0_i32_1 = arith.constant 0 : i32
    return %c0_i32, %c0_i32_0 : i32, i32
  }
  func.func @transform_15(%arg0: i32) -> (i32, i32) {
    %c0_i32 = arith.constant 0 : i32
    %c0_i32_0 = arith.constant 0 : i32
    %c0_i32_1 = arith.constant 0 : i32
    return %c0_i32, %c0_i32_0 : i32, i32
  }
  func.func @transform_16(%arg0: i32) -> (i32, i32) {
    %c0_i32 = arith.constant 0 : i32
    %c0_i32_0 = arith.constant 0 : i32
    %c0_i32_1 = arith.constant 0 : i32
    return %c0_i32, %c0_i32_0 : i32, i32
  }
  func.func @transform_17(%arg0: i32) -> (i32, i32) {
    %c0_i32 = arith.constant 0 : i32
    %c0_i32_0 = arith.constant 0 : i32
    %c0_i32_1 = arith.constant 0 : i32
    return %c0_i32, %c0_i32_0 : i32, i32
  }
  func.func @transform_18(%arg0: i32) -> (i32, i32) {
    %c0_i32 = arith.constant 0 : i32
    %c0_i32_0 = arith.constant 0 : i32
    %c0_i32_1 = arith.constant 0 : i32
    return %c0_i32, %c0_i32_0 : i32, i32
  }
  func.func @transform_19(%arg0: i32) -> (i32, i32) {
    %c0_i32 = arith.constant 0 : i32
    %c0_i32_0 = arith.constant 0 : i32
    %c0_i32_1 = arith.constant 0 : i32
    return %c0_i32, %c0_i32_0 : i32, i32
  }
  func.func @transform_20(%arg0: i32) -> (i32, i32) {
    %c0_i32 = arith.constant 0 : i32
    %c0_i32_0 = arith.constant 0 : i32
    %c0_i32_1 = arith.constant 0 : i32
    return %c0_i32, %c0_i32_0 : i32, i32
  }
  func.func @transform_21(%arg0: i32) -> (i32, i32) {
    %c0_i32 = arith.constant 0 : i32
    %c0_i32_0 = arith.constant 0 : i32
    %c0_i32_1 = arith.constant 0 : i32
    return %c0_i32, %c0_i32_0 : i32, i32
  }
  func.func @transform_22(%arg0: i32) -> (i32, i32) {
    %c0_i32 = arith.constant 0 : i32
    %c0_i32_0 = arith.constant 0 : i32
    %c0_i32_1 = arith.constant 0 : i32
    return %c0_i32, %c0_i32_0 : i32, i32
  }
  func.func @transform_23(%arg0: i32) -> (i32, i32) {
    %c0_i32 = arith.constant 0 : i32
    %c0_i32_0 = arith.constant 0 : i32
    %c0_i32_1 = arith.constant 0 : i32
    return %c0_i32, %c0_i32_0 : i32, i32
  }
  func.func @transform_24(%arg0: i32) -> (i32, i32) {
    %c0_i32 = arith.constant 0 : i32
    %c0_i32_0 = arith.constant 0 : i32
    %c0_i32_1 = arith.constant 0 : i32
    return %c0_i32, %c0_i32_0 : i32, i32
  }
  func.func @transform_25(%arg0: i32) -> (i32, i32) {
    %c0_i32 = arith.constant 0 : i32
    %c0_i32_0 = arith.constant 0 : i32
    %c0_i32_1 = arith.constant 0 : i32
    return %c0_i32, %c0_i32_0 : i32, i32
  }
  func.func @transform_26(%arg0: i32) -> (i32, i32) {
    %c0_i32 = arith.constant 0 : i32
    %c0_i32_0 = arith.constant 0 : i32
    %c0_i32_1 = arith.constant 0 : i32
    return %c0_i32, %c0_i32_0 : i32, i32
  }
  func.func @transform_27(%arg0: i32) -> (i32, i32) {
    %c0_i32 = arith.constant 0 : i32
    %c0_i32_0 = arith.constant 0 : i32
    %c0_i32_1 = arith.constant 0 : i32
    return %c0_i32, %c0_i32_0 : i32, i32
  }
  func.func @transform_28(%arg0: i32) -> (i32, i32) {
    %c0_i32 = arith.constant 0 : i32
    %c0_i32_0 = arith.constant 0 : i32
    %c0_i32_1 = arith.constant 0 : i32
    return %c0_i32, %c0_i32_0 : i32, i32
  }
  func.func @transform_29(%arg0: i32) -> (i32, i32) {
    %c0_i32 = arith.constant 0 : i32
    %c0_i32_0 = arith.constant 0 : i32
    %c0_i32_1 = arith.constant 0 : i32
    return %c0_i32, %c0_i32_0 : i32, i32
  }
  func.func @transform_30(%arg0: i32) -> (i32, i32) {
    %c0_i32 = arith.constant 0 : i32
    %c0_i32_0 = arith.constant 0 : i32
    %c0_i32_1 = arith.constant 0 : i32
    return %c0_i32, %c0_i32_0 : i32, i32
  }
  func.func @transform_31(%arg0: i32) -> (i32, i32) {
    %c0_i32 = arith.constant 0 : i32
    %c0_i32_0 = arith.constant 0 : i32
    %c0_i32_1 = arith.constant 0 : i32
    return %c0_i32, %c0_i32_0 : i32, i32
  }
}

</mosaic_0001>

<bundles_post_ra>
// kernel: _forward_padded.1
= control target key start
LH: loop header
LB: loop body
LE: loop exit
PB: predicated region body
PF: predicated region fallthrough
CT: control target
= control target key end

     0   :  { %s8402_s6 = smov 1   ;;  %s8403_s10 = smov 2   ;;  %s9638_s0 = inlined_call_operand.smem [shape: u32[32], index: -1, kind: input, shape index: {}] }
   0x1   :  { %s8460_s5 = sld [smem:[%s9638_s0]]   ;;  %s8404_s14 = smov 3  }
   0x2   :  { %s8465_s9 = sld [smem:[%s9638_s0 + %s8402_s6]]   ;;  %s8405_s18 = smov 4  }
   0x3   :  { %s8470_s13 = sld [smem:[%s9638_s0 + %s8403_s10]]   ;;  %s8406_s22 = smov 5  }
   0x4   :  { %s8475_s17 = sld [smem:[%s9638_s0 + %s8404_s14]]   ;;  %s8407_s26 = smov 6  }
   0x5   :  { %s8480_s21 = sld [smem:[%s9638_s0 + %s8405_s18]]   ;;  %s8408_s30 = smov 7  }
   0x6   :  { %s5367_s25 = sld [smem:[%s9638_s0 + %s8406_s22]]   ;;  %s8409_s4 = smov 8  }
   0x7   :  { %9641 = sst [smem:[#allocation37_spill]] %s8460_s5  ;;  %s8410_s10 = smov 9  }
   0x8   :  { %s8488_s29 = sld [smem:[%s9638_s0 + %s8407_s26]]   ;;  %s8411_s15 = smov 10  }
   0x9   :  { %9642 = sst [smem:[#allocation38_spill]] %s8470_s13  ;;  %s8412_s20 = smov 11  }
   0xa   :  { %9643 = sst [smem:[#allocation39_spill]] %s8475_s17  ;;  %s8413_s26 = smov 12  }
   0xb   :  { %s8493_s3 = sld [smem:[%s9638_s0 + %s8408_s30]]   ;;  %s8414_s1 = smov 13  }
   0xc   :  { %s8498_s8 = sld [smem:[%s9638_s0 + %s8409_s4]]   ;;  %v69_v0 = vstv %s5367_s25  ;;  %s8415_s7 = smov 14  }
   0xd   :  { %s8503_s14 = sld [smem:[%s9638_s0 + %s8410_s10]]   ;;  %70 = vst [vmem:[#allocation2] sm:$0x1] %v69_v0  ;;  %s8416_s25 = smov 15  }
   0xe   :  { %s8508_s19 = sld [smem:[%s9638_s0 + %s8411_s15]]   ;;  %s8418_s27 = smov 17  }
   0xf   :  { %s8513_s24 = sld [smem:[%s9638_s0 + %s8412_s20]]   ;;  %s8417_s20 = smov 16  }
  0x10   :  { %s8518_s30 = sld [smem:[%s9638_s0 + %s8413_s26]]   ;;  %s8419_s4 = smov 18  }
  0x11   :  { %s8523_s6 = sld [smem:[%s9638_s0 + %s8414_s1]]  }
  0x12   :  { %s8528_s12 = sld [smem:[%s9638_s0 + %s8415_s7]]  }
  0x13   :  { %s8533_s18 = sld [smem:[%s9638_s0 + %s8416_s25]]   ;;  %s8420_s25 = smov 19  }
  0x14   :  { %s8538_s26 = sld [smem:[%s9638_s0 + %s8417_s20]]   ;;  %s8421_s20 = smov 20  }
  0x15   :  { %s8543_s2 = sld [smem:[%s9638_s0 + %s8418_s27]]   ;;  %s8422_s27 = smov 21  }
  0x16   :  { %s8548_s11 = sld [smem:[%s9638_s0 + %s8419_s4]]   ;;  %s8423_s4 = smov 22  }
  0x17   :  { %s8553_s17 = sld [smem:[%s9638_s0 + %s8420_s25]]   ;;  %s8424_s25 = smov 23  }
  0x18   :  { %s8558_s13 = sld [smem:[%s9638_s0 + %s8421_s20]]   ;;  %s8425_s20 = smov 24  }
  0x19   :  { %s8563_s5 = sld [smem:[%s9638_s0 + %s8422_s27]]   ;;  %s8426_s27 = smov 25  }
  0x1c   :  { %9644 = sst [smem:[#allocation40_spill]] %s8548_s11 }
  0x1d   :  { %9645 = sst [smem:[#allocation41_spill]] %s8553_s17 }
  0x1e   :  { %9646 = sst [smem:[#allocation42_spill]] %s8558_s13 }
  0x1f   :  { %9647 = sst [smem:[#allocation43_spill]] %s8563_s5 }
  0x20   :  { %s8568_s11 = sld [smem:[%s9638_s0 + %s8423_s4]]   ;;  %s8427_s4 = smov 26  }
  0x21   :  { %s8573_s17 = sld [smem:[%s9638_s0 + %s8424_s25]]   ;;  %s8428_s25 = smov 27  }
  0x22   :  { %s8578_s13 = sld [smem:[%s9638_s0 + %s8425_s20]]   ;;  %s8429_s20 = smov 28  }
  0x23   :  { %s8583_s5 = sld [smem:[%s9638_s0 + %s8426_s27]]   ;;  %s8430_s27 = smov 29  }
  0x26   :  { %9648 = sst [smem:[#allocation44_spill]] %s8568_s11 }
  0x27   :  { %9649 = sst [smem:[#allocation45_spill]] %s8573_s17 }
  0x28   :  { %9650 = sst [smem:[#allocation46_spill]] %s8578_s13 }
  0x29   :  { %9651 = sst [smem:[#allocation47_spill]] %s8583_s5 }
  0x2a   :  { %s8588_s11 = sld [smem:[%s9638_s0 + %s8427_s4]]   ;;  %s8431_s4 = smov 30  }
  0x2b   :  { %s8593_s17 = sld [smem:[%s9638_s0 + %s8428_s25]]   ;;  %s8432_s25 = smov 31  }
  0x2c   :  { %s8598_s13 = sld [smem:[%s9638_s0 + %s8429_s20]]  }
  0x2d   :  { %s8603_s5 = sld [smem:[%s9638_s0 + %s8430_s27]]  }
  0x30   :  { %9652 = sst [smem:[#allocation48_spill]] %s8588_s11 }
  0x31   :  { %9653 = sst [smem:[#allocation49_spill]] %s8593_s17 }
  0x32   :  { %s8608_s11 = sld [smem:[%s9638_s0 + %s8431_s4]]  }
  0x33   :  { %s8613_s17 = sld [smem:[%s9638_s0 + %s8432_s25]]  }
  0x34   :  { %71 = vsyncpa [#allocation4], 0 }
  0x35   :  { %72 = vsyncpa [#allocation6], 0 }
  0x36   :  { %73 = vsyncpa [#allocation9], 0 }
  0x37   :  { %74 = vsyncpa [#allocation12], 0 }
  0x38   :  { %75 = vsyncpa [#allocation15], 0 }
  0x39   :  { %76 = vsyncpa [#allocation18], 0 }
  0x3a   :  { %77 = vsyncpa [#allocation21], 0 }
  0x3b   :  { %78 = vsyncpa [#allocation24], 0 }
  0x3c   :  { %79 = vsyncpa [#allocation27], 0  ;;  %s8433_s20 = smov [#allocation5]   ;;  %s8434_s23 = smov [#allocation8]  }
  0x3d   :  { %s103_s22 = sshll.u32 %s8433_s20, 4  ;;  %s129_s27 = sshll.u32 %s8434_s23, 4  ;;  %s104_s22 = int_to_ptr.vmem [resolvable:$true] %s103_s22  ;;  %s130_s27 = int_to_ptr.vmem [resolvable:$true] %s129_s27 }
  0x3e   :  { %s8072_s28 = scalar_lea.vmem %s104_s22, 2048  ;;  %p8077_p1 = scmp.lt.s32.totalorder %s104_s22, %s104_s22 }
  0x3f   :  { %p8073_p0 = scmp.ne.s32.totalorder %s104_s22, %s8072_s28  ;;  %p8078_p2 = scmp.lt.s32.totalorder %s8072_s28, %s8072_s28 }
  0x41   :  { %p8079_p3 = por %p8078_p2, %p8077_p1 }
  0x43   :  { %p8080_p4 = pnand %p8079_p3, %p8073_p0 }
  0x45   :  { %8083 = shalt.err (!%p8080_p4)
}
  0x46   :  { %s8435_s0 = smov 128   ;;  %s8436_s1 = smov 8  }
  0x47   :  { %109 = dma.hbm_to_vmem [thread:$0]  %s8480_s21, 2048, %s104_s22, [#allocation6], %s8435_s0, %s8435_s0, %s8436_s1  }
  0x48   :  { %s8092_s4 = scalar_lea.vmem %s130_s27, 2048  ;;  %p8097_p6 = scmp.lt.s32.totalorder %s130_s27, %s130_s27 }
  0x49   :  { %p8093_p5 = scmp.ne.s32.totalorder %s130_s27, %s8092_s4  ;;  %p8098_p7 = scmp.lt.s32.totalorder %s8092_s4, %s8092_s4 }
  0x4b   :  { %p8099_p8 = por %p8098_p7, %p8097_p6 }
  0x4d   :  { %p8100_p9 = pnand %p8099_p8, %p8093_p5 }
  0x4f   :  { %8103 = shalt.err (!%p8100_p9)
}
  0x50   :  { %135 = dma.hbm_to_vmem [thread:$0]  %s8493_s3, 2048, %s130_s27, [#allocation9], %s8435_s0, %s8435_s0, %s8436_s1  }
  0x51   :  { %s8437_s7 = smov [#allocation11]   ;;  %s8438_s25 = smov [#allocation14]  }
  0x52   :  { %s153_s10 = sshll.u32 %s8437_s7, 4  ;;  %s177_s15 = sshll.u32 %s8438_s25, 4  ;;  %s154_s10 = int_to_ptr.vmem [resolvable:$true] %s153_s10  ;;  %s178_s15 = int_to_ptr.vmem [resolvable:$true] %s177_s15 }
  0x53   :  { %s8112_s16 = scalar_lea.vmem %s154_s10, 2048  ;;  %p8117_p11 = scmp.lt.s32.totalorder %s154_s10, %s154_s10 }
  0x54   :  { %p8113_p10 = scmp.ne.s32.totalorder %s154_s10, %s8112_s16  ;;  %p8118_p12 = scmp.lt.s32.totalorder %s8112_s16, %s8112_s16 }
  0x56   :  { %p8119_p13 = por %p8118_p12, %p8117_p11 }
  0x58   :  { %p8120_p0 = pnand %p8119_p13, %p8113_p10 }
  0x5a   :  { %8123 = shalt.err (!%p8120_p0)
}
  0x5b   :  { %159 = dma.hbm_to_vmem [thread:$0]  %s8503_s14, 2048, %s154_s10, [#allocation12], %s8435_s0, %s8435_s0, %s8436_s1  }
  0x5c   :  { %s8132_s21 = scalar_lea.vmem %s178_s15, 2048  ;;  %p8137_p2 = scmp.lt.s32.totalorder %s178_s15, %s178_s15 }
  0x5d   :  { %p8133_p1 = scmp.ne.s32.totalorder %s178_s15, %s8132_s21  ;;  %p8138_p3 = scmp.lt.s32.totalorder %s8132_s21, %s8132_s21 }
  0x5f   :  { %p8139_p4 = por %p8138_p3, %p8137_p2 }
  0x61   :  { %p8140_p5 = pnand %p8139_p4, %p8133_p1 }
  0x63   :  { %8143 = shalt.err (!%p8140_p5)
}
  0x64   :  { %183 = dma.hbm_to_vmem [thread:$0]  %s8513_s24, 2048, %s178_s15, [#allocation15], %s8435_s0, %s8435_s0, %s8436_s1  }
  0x65   :  { %s8439_s3 = smov [#allocation17]   ;;  %s8440_s22 = smov [#allocation20]  }
  0x66   :  { %s201_s20 = sshll.u32 %s8439_s3, 4  ;;  %s225_s23 = sshll.u32 %s8440_s22, 4  ;;  %s202_s20 = int_to_ptr.vmem [resolvable:$true] %s201_s20  ;;  %s226_s23 = int_to_ptr.vmem [resolvable:$true] %s225_s23 }
  0x67   :  { %s8152_s27 = scalar_lea.vmem %s202_s20, 2048  ;;  %p8157_p7 = scmp.lt.s32.totalorder %s202_s20, %s202_s20 }
  0x68   :  { %p8153_p6 = scmp.ne.s32.totalorder %s202_s20, %s8152_s27  ;;  %p8158_p8 = scmp.lt.s32.totalorder %s8152_s27, %s8152_s27 }
  0x6a   :  { %p8159_p9 = por %p8158_p8, %p8157_p7 }
  0x6c   :  { %p8160_p10 = pnand %p8159_p9, %p8153_p6 }
  0x6e   :  { %8163 = shalt.err (!%p8160_p10)
}
  0x6f   :  { %207 = dma.hbm_to_vmem [thread:$0]  %s8523_s6, 2048, %s202_s20, [#allocation18], %s8435_s0, %s8435_s0, %s8436_s1  }
  0x70   :  { %s8172_s14 = scalar_lea.vmem %s226_s23, 2048  ;;  %p8177_p12 = scmp.lt.s32.totalorder %s226_s23, %s226_s23 }
  0x71   :  { %p8173_p11 = scmp.ne.s32.totalorder %s226_s23, %s8172_s14  ;;  %p8178_p13 = scmp.lt.s32.totalorder %s8172_s14, %s8172_s14 }
  0x73   :  { %p8179_p0 = por %p8178_p13, %p8177_p12 }
  0x75   :  { %p8180_p1 = pnand %p8179_p0, %p8173_p11 }
  0x77   :  { %8183 = shalt.err (!%p8180_p1)
}
  0x78   :  { %231 = dma.hbm_to_vmem [thread:$0]  %s8533_s18, 2048, %s226_s23, [#allocation21], %s8435_s0, %s8435_s0, %s8436_s1  }
  0x79   :  { %s8441_s24 = smov [#allocation23]   ;;  %s8442_s4 = smov [#allocation3]  }
  0x7a   :  { %s249_s28 = sshll.u32 %s8441_s24, 4  ;;  %s87_s7 = sshll.u32 %s8442_s4, 4  ;;  %s250_s28 = int_to_ptr.vmem [resolvable:$true] %s249_s28  ;;  %s88_s7 = int_to_ptr.vmem [resolvable:$true] %s87_s7 }
  0x7b   :  { %s8192_s10 = scalar_lea.vmem %s250_s28, 2048  ;;  %p8197_p3 = scmp.lt.s32.totalorder %s250_s28, %s250_s28 }
  0x7c   :  { %p8193_p2 = scmp.ne.s32.totalorder %s250_s28, %s8192_s10  ;;  %p8198_p4 = scmp.lt.s32.totalorder %s8192_s10, %s8192_s10 }
  0x7e   :  { %p8199_p5 = por %p8198_p4, %p8197_p3 }
  0x80   :  { %p8200_p6 = pnand %p8199_p5, %p8193_p2 }
  0x82   :  { %8203 = shalt.err (!%p8200_p6)
}
  0x83   :  { %255 = dma.hbm_to_vmem [thread:$0]  %s8543_s2, 2048, %s250_s28, [#allocation24], %s8435_s0, %s8435_s0, %s8436_s1  }
  0x84   :  { %s8212_s6 = scalar_lea.vmem %s88_s7, 2048  ;;  %p8217_p8 = scmp.lt.s32.totalorder %s88_s7, %s88_s7 }
  0x85   :  { %p8213_p7 = scmp.ne.s32.totalorder %s88_s7, %s8212_s6  ;;  %p8218_p9 = scmp.lt.s32.totalorder %s8212_s6, %s8212_s6 }
  0x87   :  { %p8219_p10 = por %p8218_p9, %p8217_p8 }
  0x89   :  { %p8220_p11 = pnand %p8219_p10, %p8213_p7 }
  0x8b   :  { %8223 = shalt.err (!%p8220_p11)
}
  0x8c   :  { %93 = dma.hbm_to_vmem [thread:$0]  %s8465_s9, 2048, %s88_s7, [#allocation4], %s8435_s0, %s8435_s0, %s8436_s1  }
  0x8d   :  { %s8443_s18 = smov [#allocation7]   ;;  %s8444_s15 = smov [#allocation10]  }
  0x8e   :  { %s117_s25 = sshll.u32 %s8443_s18, 4  ;;  %s141_s16 = sshll.u32 %s8444_s15, 4  ;;  %s118_s25 = int_to_ptr.vmem [resolvable:$true] %s117_s25  ;;  %s142_s16 = int_to_ptr.vmem [resolvable:$true] %s141_s16 }
  0x8f   :  { %s8232_s21 = scalar_lea.vmem %s118_s25, 2048  ;;  %p8237_p13 = scmp.lt.s32.totalorder %s118_s25, %s118_s25 }
  0x90   :  { %p8233_p12 = scmp.ne.s32.totalorder %s118_s25, %s8232_s21  ;;  %p8238_p0 = scmp.lt.s32.totalorder %s8232_s21, %s8232_s21 }
  0x92   :  { %p8239_p1 = por %p8238_p0, %p8237_p13 }
  0x94   :  { %p8240_p2 = pnand %p8239_p1, %p8233_p12 }
  0x96   :  { %8243 = shalt.err (!%p8240_p2)
}
  0x97   :  { %123 = dma.hbm_to_vmem [thread:$0]  %s8488_s29, 2048, %s118_s25, [#allocation6], %s8435_s0, %s8435_s0, %s8436_s1  }
  0x98   :  { %s8252_s2 = scalar_lea.vmem %s142_s16, 2048  ;;  %p8257_p4 = scmp.lt.s32.totalorder %s142_s16, %s142_s16 }
  0x99   :  { %p8253_p3 = scmp.ne.s32.totalorder %s142_s16, %s8252_s2  ;;  %p8258_p5 = scmp.lt.s32.totalorder %s8252_s2, %s8252_s2 }
  0x9b   :  { %p8259_p6 = por %p8258_p5, %p8257_p4 }
  0x9d   :  { %p8260_p7 = pnand %p8259_p6, %p8253_p3 }
  0x9f   :  { %8263 = shalt.err (!%p8260_p7)
}
  0xa0   :  { %147 = dma.hbm_to_vmem [thread:$0]  %s8498_s8, 2048, %s142_s16, [#allocation9], %s8435_s0, %s8435_s0, %s8436_s1  }
  0xa1   :  { %s8445_s9 = smov [#allocation13]   ;;  %s8446_s20 = smov [#allocation16]  }
  0xa2   :  { %s165_s3 = sshll.u32 %s8445_s9, 4  ;;  %s189_s22 = sshll.u32 %s8446_s20, 4  ;;  %s166_s3 = int_to_ptr.vmem [resolvable:$true] %s165_s3  ;;  %s190_s22 = int_to_ptr.vmem [resolvable:$true] %s189_s22 }
  0xa3   :  { %s8272_s23 = scalar_lea.vmem %s166_s3, 2048  ;;  %p8277_p9 = scmp.lt.s32.totalorder %s166_s3, %s166_s3 }
  0xa4   :  { %p8273_p8 = scmp.ne.s32.totalorder %s166_s3, %s8272_s23  ;;  %p8278_p10 = scmp.lt.s32.totalorder %s8272_s23, %s8272_s23 }
  0xa6   :  { %p8279_p11 = por %p8278_p10, %p8277_p9 }
  0xa8   :  { %p8280_p12 = pnand %p8279_p11, %p8273_p8 }
  0xaa   :  { %8283 = shalt.err (!%p8280_p12)
}
  0xab   :  { %171 = dma.hbm_to_vmem [thread:$0]  %s8508_s19, 2048, %s166_s3, [#allocation12], %s8435_s0, %s8435_s0, %s8436_s1  }
  0xac   :  { %s8292_s29 = scalar_lea.vmem %s190_s22, 2048  ;;  %p8297_p0 = scmp.lt.s32.totalorder %s190_s22, %s190_s22 }
  0xad   :  { %p8293_p13 = scmp.ne.s32.totalorder %s190_s22, %s8292_s29  ;;  %p8298_p1 = scmp.lt.s32.totalorder %s8292_s29, %s8292_s29 }
  0xaf   :  { %p8299_p2 = por %p8298_p1, %p8297_p0 }
  0xb1   :  { %p8300_p3 = pnand %p8299_p2, %p8293_p13 }
  0xb3   :  { %8303 = shalt.err (!%p8300_p3)
}
  0xb4   :  { %195 = dma.hbm_to_vmem [thread:$0]  %s8518_s30, 2048, %s190_s22, [#allocation15], %s8435_s0, %s8435_s0, %s8436_s1  }
  0xb5   :  { %s8447_s8 = smov [#allocation19]   ;;  %s8448_s14 = smov [#allocation22]  }
  0xb6   :  { %s213_s27 = sshll.u32 %s8447_s8, 4  ;;  %s237_s24 = sshll.u32 %s8448_s14, 4  ;;  %s214_s27 = int_to_ptr.vmem [resolvable:$true] %s213_s27  ;;  %s238_s24 = int_to_ptr.vmem [resolvable:$true] %s237_s24 }
  0xb7   :  { %s8312_s28 = scalar_lea.vmem %s214_s27, 2048  ;;  %p8317_p5 = scmp.lt.s32.totalorder %s214_s27, %s214_s27 }
  0xb8   :  { %p8313_p4 = scmp.ne.s32.totalorder %s214_s27, %s8312_s28  ;;  %p8318_p6 = scmp.lt.s32.totalorder %s8312_s28, %s8312_s28 }
  0xba   :  { %p8319_p7 = por %p8318_p6, %p8317_p5 }
  0xbc   :  { %p8320_p8 = pnand %p8319_p7, %p8313_p4 }
  0xbe   :  { %8323 = shalt.err (!%p8320_p8)
}
  0xbf   :  { %219 = dma.hbm_to_vmem [thread:$0]  %s8528_s12, 2048, %s214_s27, [#allocation18], %s8435_s0, %s8435_s0, %s8436_s1  }
  0xc0   :  { %s8332_s19 = scalar_lea.vmem %s238_s24, 2048  ;;  %p8337_p10 = scmp.lt.s32.totalorder %s238_s24, %s238_s24 }
  0xc1   :  { %p8333_p9 = scmp.ne.s32.totalorder %s238_s24, %s8332_s19  ;;  %p8338_p11 = scmp.lt.s32.totalorder %s8332_s19, %s8332_s19 }
  0xc3   :  { %p8339_p12 = por %p8338_p11, %p8337_p10 }
  0xc5   :  { %p8340_p13 = pnand %p8339_p12, %p8333_p9 }
  0xc7   :  { %8343 = shalt.err (!%p8340_p13)
}
  0xc8   :  { %243 = dma.hbm_to_vmem [thread:$0]  %s8538_s26, 2048, %s238_s24, [#allocation21], %s8435_s0, %s8435_s0, %s8436_s1  }
  0xc9   :  { %s8449_s30 = smov [#allocation25]   ;;  %s8450_s7 = smov [#allocation26]  }
  0xca   :  { %s261_s4 = sshll.u32 %s8449_s30, 4  ;;  %s273_s10 = sshll.u32 %s8450_s7, 4  ;;  %s262_s4 = int_to_ptr.vmem [resolvable:$true] %s261_s4  ;;  %s274_s10 = int_to_ptr.vmem [resolvable:$true] %s273_s10 }
  0xcb   :  { %s8352_s6 = scalar_lea.vmem %s262_s4, 2048  ;;  %p8357_p1 = scmp.lt.s32.totalorder %s262_s4, %s262_s4 }
  0xcc   :  { %p8353_p0 = scmp.ne.s32.totalorder %s262_s4, %s8352_s6  ;;  %p8358_p2 = scmp.lt.s32.totalorder %s8352_s6, %s8352_s6 }
  0xce   :  { %p8359_p3 = por %p8358_p2, %p8357_p1 }
  0xd0   :  { %p8360_p4 = pnand %p8359_p3, %p8353_p0 }
  0xd2   :  { %8363 = shalt.err (!%p8360_p4)
}
  0xd3   :  { %s9654_s12 = sld [smem:[#allocation40_spill]]  ;;  %s8372_s18 = scalar_lea.vmem %s274_s10, 2048 }
  0xd4   :  { %p8373_p5 = scmp.ne.s32.totalorder %s274_s10, %s8372_s18  ;;  %p8377_p6 = scmp.lt.s32.totalorder %s274_s10, %s274_s10 }
  0xd5   :  { %p8378_p7 = scmp.lt.s32.totalorder %s8372_s18, %s8372_s18 }
  0xd7   :  { %p8379_p8 = por %p8378_p7, %p8377_p6 }
  0xd9   :  { %267 = dma.hbm_to_vmem [thread:$0]  %s9654_s12, 2048, %s262_s4, [#allocation24], %s8435_s0, %s8435_s0, %s8436_s1  }
  0xda   :  { %p8380_p9 = pnand %p8379_p8, %p8373_p5 }
  0xdc   :  { %8383 = shalt.err (!%p8380_p9)
}
  0xdd   :  { %s9655_s26 = sld [smem:[#allocation41_spill]] }
  0xe3   :  { %279 = dma.hbm_to_vmem [thread:$0]  %s9655_s26, 2048, %s274_s10, [#allocation27], %s8435_s0, %s8435_s0, %s8436_s1  }
  0xe4   :  { %8384 = dma.done.wait [#allocation4], 2048  }
  0xe5   :  { %8385 = vsyncadd [#allocation4], 4294965248 }
  0xe6   :  { %8386 = dma.done.wait [#allocation6], 4096  }
  0xe7   :  { %8387 = vsyncadd [#allocation6], 4294963200 }
  0xe8   :  { %8388 = dma.done.wait [#allocation9], 4096  }
  0xe9   :  { %8389 = vsyncadd [#allocation9], 4294963200 }
  0xea   :  { %8390 = dma.done.wait [#allocation12], 4096  }
  0xeb   :  { %8391 = vsyncadd [#allocation12], 4294963200 }
  0xec   :  { %8392 = dma.done.wait [#allocation15], 4096  }
  0xed   :  { %8393 = vsyncadd [#allocation15], 4294963200 }
  0xee   :  { %8394 = dma.done.wait [#allocation18], 4096  }
  0xef   :  { %8395 = vsyncadd [#allocation18], 4294963200 }
  0xf0   :  { %8396 = dma.done.wait [#allocation21], 4096  }
  0xf1   :  { %8397 = vsyncadd [#allocation21], 4294963200 }
  0xf2   :  { %8398 = dma.done.wait [#allocation24], 4096  }
  0xf3   :  { %8399 = vsyncadd [#allocation24], 4294963200 }
  0xf4   :  { %8400 = dma.done.wait [#allocation27], 2048  }
  0xf5   :  { %8401 = vsyncadd [#allocation27], 4294965248  ;;  %s9656_s25 = sld [smem:[#allocation37_spill]]  ;;  %v391_v1 = vld [vmem:[#allocation7 + $0x78] sm:$0xff]  ;;  %v390_v2 = vld [vmem:[#allocation7 + $0x70] sm:$0xff] }
  0xf6   :  { %6236 = vmatprep.subr.mxu1 %v391_v1  ;;  %v389_v3 = vld [vmem:[#allocation7 + $0x68] sm:$0xff]  ;;  %v388_v4 = vld [vmem:[#allocation7 + $0x60] sm:$0xff]  ;;  %v387_v6 = vld [vmem:[#allocation7 + $0x58] sm:$0xff]  ;;  %s9657_s0 = sld [smem:[#allocation42_spill]] }
  0xf7   :  { %6237 = vmatpush3.msra.mxu1 %v391_v1  ;;  %v386_v7 = vld [vmem:[#allocation7 + $0x50] sm:$0xff]  ;;  %v385_v8 = vld [vmem:[#allocation7 + $0x48] sm:$0xff]  ;;  %v384_v9 = vld [vmem:[#allocation7 + $0x40] sm:$0xff]  ;;  %s9658_s1 = sld [smem:[#allocation43_spill]] }
  0xf8   :  { %6238 = vmatprep.subr.mxu1 %v390_v2  ;;  %v383_v10 = vld [vmem:[#allocation7 + $0x38] sm:$0xff]  ;;  %v382_v11 = vld [vmem:[#allocation7 + $0x30] sm:$0xff]  ;;  %v381_v12 = vld [vmem:[#allocation7 + $0x28] sm:$0xff]  ;;  %s9659_s15 = sld [smem:[#allocation44_spill]] }
  0xf9   :  { %6239 = vmatpush3.msra.mxu1 %v390_v2  ;;  %v380_v13 = vld [vmem:[#allocation7 + $0x20] sm:$0xff]  ;;  %v379_v14 = vld [vmem:[#allocation7 + $0x18] sm:$0xff]  ;;  %v378_v15 = vld [vmem:[#allocation7 + $0x10] sm:$0xff]  ;;  %s9660_s16 = sld [smem:[#allocation45_spill]] }
  0xfa   :  { %6240 = vmatprep.subr.mxu1 %v389_v3  ;;  %v377_v16 = vld [vmem:[#allocation7 + $0x8] sm:$0xff]  ;;  %v376_v17 = vld [vmem:[#allocation7] sm:$0xff]  ;;  %v607_v19 = vld [vmem:[#allocation8 + $0x78] sm:$0xff]  ;;  %s9661_s21 = sld [smem:[#allocation38_spill]] }
  0xfb   :  { %v8680_v5 = vld [vmem:[%s9656_s25] sm:$0xff]  ;;  %6241 = vmatpush3.msra.mxu1 %v389_v3  ;;  %v8684_v18 = vld [vmem:[%s9656_s25 + $0x8] sm:$0xff]  ;;  %v8687_v20 = vld [vmem:[%s9656_s25 + $0x10] sm:$0xff]  ;;  %s9662_s2 = sld [smem:[#allocation39_spill]] }
  0xfc   :  { %6268 = vmatprep.mubr.f32.mxu1 %v8680_v5  ;;  %6242 = vmatprep.subr.mxu1 %v388_v4  ;;  %v606_v21 = vld [vmem:[#allocation8 + $0x70] sm:$0xff]  ;;  %v605_v23 = vld [vmem:[#allocation8 + $0x68] sm:$0xff]  ;;  %v8695_v24 = vld [vmem:[%s9656_s25 + $0x20] sm:$0xff]  ;;  %s9664_s9 = sld [smem:[#allocation47_spill]] }
  0xfd   :  { %6243 = vmatpush3.msra.mxu1 %v388_v4  ;;  %v8692_v22 = vld [vmem:[%s9656_s25 + $0x18] sm:$0xff]  ;;  %v604_v25 = vld [vmem:[#allocation8 + $0x60] sm:$0xff]  ;;  %v8703_v28 = vld [vmem:[%s9656_s25 + $0x30] sm:$0xff]  ;;  %s9665_s3 = sld [smem:[#allocation48_spill]] }
  0xfe   :  { %6244 = vmatprep.subr.mxu1 %v387_v6  ;;  %v8700_v26 = vld [vmem:[%s9656_s25 + $0x28] sm:$0xff]  ;;  %v603_v27 = vld [vmem:[#allocation8 + $0x58] sm:$0xff]  ;;  %v602_v29 = vld [vmem:[#allocation8 + $0x50] sm:$0xff]  ;;  %s9666_s20 = sld [smem:[#allocation49_spill]] }
  0xff   :  { %6245 = vmatpush3.msra.mxu1 %v387_v6  ;;  %v8708_v30 = vld [vmem:[%s9656_s25 + $0x38] sm:$0xff]  ;;  %v601_v31 = vld [vmem:[#allocation8 + $0x48] sm:$0xff]  ;;  %v8711_v32 = vld [vmem:[%s9656_s25 + $0x40] sm:$0xff] }
 0x100   :  { %6246 = vmatprep.subr.mxu1 %v386_v7  ;;  %v600_v33 = vld [vmem:[#allocation8 + $0x40] sm:$0xff]  ;;  %v599_v35 = vld [vmem:[#allocation8 + $0x38] sm:$0xff]  ;;  %v8719_v36 = vld [vmem:[%s9656_s25 + $0x50] sm:$0xff] }
 0x101   :  { %6247 = vmatpush3.msra.mxu1 %v386_v7  ;;  %v8716_v34 = vld [vmem:[%s9656_s25 + $0x48] sm:$0xff]  ;;  %v598_v37 = vld [vmem:[#allocation8 + $0x30] sm:$0xff]  ;;  %v8727_v40 = vld [vmem:[%s9656_s25 + $0x60] sm:$0xff] }
 0x102   :  { %6248 = vmatprep.subr.mxu1 %v385_v8  ;;  %v8724_v38 = vld [vmem:[%s9656_s25 + $0x58] sm:$0xff]  ;;  %v597_v39 = vld [vmem:[#allocation8 + $0x28] sm:$0xff]  ;;  %v596_v41 = vld [vmem:[#allocation8 + $0x20] sm:$0xff] }
 0x103   :  { %6249 = vmatpush3.msra.mxu1 %v385_v8  ;;  %v8732_v42 = vld [vmem:[%s9656_s25 + $0x68] sm:$0xff]  ;;  %v8735_v43 = vld [vmem:[%s9656_s25 + $0x70] sm:$0xff]  ;;  %v8740_v44 = vld [vmem:[%s9656_s25 + $0x78] sm:$0xff] }
 0x104   :  { %6250 = vmatprep.subr.mxu1 %v384_v9  ;;  %v595_v45 = vld [vmem:[#allocation8 + $0x18] sm:$0xff]  ;;  %v594_v46 = vld [vmem:[#allocation8 + $0x10] sm:$0xff]  ;;  %v593_v47 = vld [vmem:[#allocation8 + $0x8] sm:$0xff] }
 0x105   :  { %6251 = vmatpush3.msra.mxu1 %v384_v9  ;;  %v592_v48 = vld [vmem:[#allocation8] sm:$0xff]  ;;  %v823_v49 = vld [vmem:[#allocation10 + $0x78] sm:$0xff]  ;;  %v822_v50 = vld [vmem:[#allocation10 + $0x70] sm:$0xff] }
 0x106   :  { %6252 = vmatprep.subr.mxu1 %v383_v10  ;;  %6348 = vmatprep.subr.mxu0 %v823_v49  ;;  %v821_v51 = vld [vmem:[#allocation10 + $0x68] sm:$0xff]  ;;  %v820_v52 = vld [vmem:[#allocation10 + $0x60] sm:$0xff]  ;;  %v819_v53 = vld [vmem:[#allocation10 + $0x58] sm:$0xff] }
 0x107   :  { %6253 = vmatpush3.msra.mxu1 %v383_v10  ;;  %6349 = vmatpush3.msra.mxu0 %v823_v49  ;;  %v818_v54 = vld [vmem:[#allocation10 + $0x50] sm:$0xff]  ;;  %v817_v55 = vld [vmem:[#allocation10 + $0x48] sm:$0xff]  ;;  %v816_v56 = vld [vmem:[#allocation10 + $0x40] sm:$0xff] }
 0x108   :  { %6254 = vmatprep.subr.mxu1 %v382_v11  ;;  %6350 = vmatprep.subr.mxu0 %v822_v50  ;;  %v815_v57 = vld [vmem:[#allocation10 + $0x38] sm:$0xff]  ;;  %v814_v58 = vld [vmem:[#allocation10 + $0x30] sm:$0xff]  ;;  %v813_v59 = vld [vmem:[#allocation10 + $0x28] sm:$0xff] }
 0x109   :  { %6255 = vmatpush3.msra.mxu1 %v382_v11  ;;  %6351 = vmatpush3.msra.mxu0 %v822_v50  ;;  %v812_v60 = vld [vmem:[#allocation10 + $0x20] sm:$0xff]  ;;  %v8744_v61 = vld [vmem:[%s9657_s0] ss:$0 sm:$0xff] }
 0x10a   :  { %6256 = vmatprep.subr.mxu1 %v381_v12  ;;  %6352 = vmatprep.subr.mxu0 %v821_v51 }
 0x10b   :  { %6257 = vmatpush3.msra.mxu1 %v381_v12  ;;  %6353 = vmatpush3.msra.mxu0 %v821_v51 }
 0x10c   :  { %6258 = vmatprep.subr.mxu1 %v380_v13  ;;  %6354 = vmatprep.subr.mxu0 %v820_v52 }
 0x10d   :  { %6259 = vmatpush3.msra.mxu1 %v380_v13  ;;  %6355 = vmatpush3.msra.mxu0 %v820_v52 }
 0x10e   :  { %6260 = vmatprep.subr.mxu1 %v379_v14  ;;  %6356 = vmatprep.subr.mxu0 %v819_v53 }
 0x10f   :  { %6261 = vmatpush3.msra.mxu1 %v379_v14  ;;  %6357 = vmatpush3.msra.mxu0 %v819_v53 }
 0x110   :  { %6262 = vmatprep.subr.mxu1 %v378_v15  ;;  %6358 = vmatprep.subr.mxu0 %v818_v54 }
 0x111   :  { %6263 = vmatpush3.msra.mxu1 %v378_v15  ;;  %6359 = vmatpush3.msra.mxu0 %v818_v54 }
 0x112   :  { %6264 = vmatprep.subr.mxu1 %v377_v16  ;;  %6360 = vmatprep.subr.mxu0 %v817_v55 }
 0x113   :  { %6265 = vmatpush3.msra.mxu1 %v377_v16  ;;  %6361 = vmatpush3.msra.mxu0 %v817_v55 }
 0x114   :  { %6266 = vmatprep.subr.mxu1 %v376_v17  ;;  %6362 = vmatprep.subr.mxu0 %v816_v56 }
 0x115   :  { %6267 = vmatpush3.msra.mxu1 %v376_v17  ;;  %6363 = vmatpush3.msra.mxu0 %v816_v56 }
 0x116   :  { %6269 = vmatmul.mubr.f32.vlgmr.msra.gmra.mxu1 %v8684_v18  ;;  %6292 = vmatprep.subr.mxu1 %v607_v19 }
 0x117   :  { %6271 = vmatprep.mubr.f32.mxu1 %v8687_v20  ;;  %6293 = vmatpush3.msra.mxu1 %v607_v19 }
 0x118   :  { %6294 = vmatprep.subr.mxu1 %v606_v21  ;;  %6364 = vmatprep.subr.mxu0 %v815_v57 }
 0x119   :  { %6295 = vmatpush3.msra.mxu1 %v606_v21  ;;  %6365 = vmatpush3.msra.mxu0 %v815_v57 }
 0x11a   :  { %6272 = vmatmul.mubr.f32.gmra.mxu1 %v8692_v22  ;;  %6296 = vmatprep.subr.mxu1 %v605_v23 }
 0x11b   :  { %6274 = vmatprep.mubr.f32.mxu1 %v8695_v24  ;;  %6297 = vmatpush3.msra.mxu1 %v605_v23 }
 0x11c   :  { %6298 = vmatprep.subr.mxu1 %v604_v25  ;;  %6366 = vmatprep.subr.mxu0 %v814_v58 }
 0x11d   :  { %6299 = vmatpush3.msra.mxu1 %v604_v25  ;;  %6367 = vmatpush3.msra.mxu0 %v814_v58 }
 0x11e   :  { %6275 = vmatmul.mubr.f32.gmra.mxu1 %v8700_v26  ;;  %6300 = vmatprep.subr.mxu1 %v603_v27 }
 0x11f   :  { %6277 = vmatprep.mubr.f32.mxu1 %v8703_v28  ;;  %6301 = vmatpush3.msra.mxu1 %v603_v27 }
 0x120   :  { %6302 = vmatprep.subr.mxu1 %v602_v29  ;;  %6368 = vmatprep.subr.mxu0 %v813_v59 }
 0x121   :  { %6303 = vmatpush3.msra.mxu1 %v602_v29  ;;  %6369 = vmatpush3.msra.mxu0 %v813_v59 }
 0x122   :  { %6278 = vmatmul.mubr.f32.gmra.mxu1 %v8708_v30  ;;  %6304 = vmatprep.subr.mxu1 %v601_v31 }
 0x123   :  { %6280 = vmatprep.mubr.f32.mxu1 %v8711_v32  ;;  %6305 = vmatpush3.msra.mxu1 %v601_v31 }
 0x124   :  { %6306 = vmatprep.subr.mxu1 %v600_v33  ;;  %6370 = vmatprep.subr.mxu0 %v812_v60 }
 0x125   :  { %6307 = vmatpush3.msra.mxu1 %v600_v33  ;;  %6371 = vmatpush3.msra.mxu0 %v812_v60 }
 0x126   :  { %6281 = vmatmul.mubr.f32.gmra.mxu1 %v8716_v34  ;;  %6308 = vmatprep.subr.mxu1 %v599_v35 }
 0x127   :  { %6283 = vmatprep.mubr.f32.mxu1 %v8719_v36  ;;  %6309 = vmatpush3.msra.mxu1 %v599_v35 }
 0x128   :  { %6310 = vmatprep.subr.mxu1 %v598_v37 }
 0x129   :  { %6311 = vmatpush3.msra.mxu1 %v598_v37 }
 0x12a   :  { %6284 = vmatmul.mubr.f32.gmra.mxu1 %v8724_v38  ;;  %6312 = vmatprep.subr.mxu1 %v597_v39 }
 0x12b   :  { %6286 = vmatprep.mubr.f32.mxu1 %v8727_v40  ;;  %6313 = vmatpush3.msra.mxu1 %v597_v39 }
 0x12c   :  { %6314 = vmatprep.subr.mxu1 %v596_v41 }
 0x12d   :  { %6315 = vmatpush3.msra.mxu1 %v596_v41 }
 0x12e   :  { %6287 = vmatmul.mubr.f32.gmra.mxu1 %v8732_v42  ;;  %6316 = vmatprep.subr.mxu1 %v595_v45 }
 0x12f   :  { %6289 = vmatprep.mubr.f32.mxu1 %v8735_v43  ;;  %6317 = vmatpush3.msra.mxu1 %v595_v45 }
 0x130   :  { %6318 = vmatprep.subr.mxu1 %v594_v46 }
 0x131   :  { %6319 = vmatpush3.msra.mxu1 %v594_v46 }
 0x132   :  { %6290 = vmatmul.mubr.f32.gmra.mxu1 %v8740_v44  ;;  %6320 = vmatprep.subr.mxu1 %v593_v47 }
 0x133   :  { %6321 = vmatpush3.msra.mxu1 %v593_v47 }
 0x134   :  { %6322 = vmatprep.subr.mxu1 %v592_v48 }
 0x135   :  { %6323 = vmatpush3.msra.mxu1 %v592_v48 }
 0x1d6   :  { %v6270_v62 = vpop.f32.mrf.mxu1 }
 0x1d7   :  { %v471_v63 = vadd.f32 %v6270_v62, %v8744_v61 }
 0x1d8   :  { %v465_v0 = vpop.f32.mrf.mxu1 }
 0x1d9   :  { %v466_v1 = vadd.f32 %v8744_v61, %v465_v0  ;;  %v561_v2 = vmul.f32 0.2, %v471_v63  ;;  %vm545_vm0 = vcmp.gt.f32.partialorder %v471_v63, 0.0 }
 0x1da   :  { %v6273_v3 = vpop.f32.mrf.mxu1 }
 0x1db   :  { %v481_v4 = vadd.f32 %v6273_v3, %v8744_v61  ;;  %vm544_vm1 = vcmp.gt.f32.partialorder %v466_v1, 0.0  ;;  %v560_v6 = vmul.f32 0.2, %v466_v1  ;;  %v577_v10 = vsel %vm545_vm0, %v471_v63, %v561_v2 }
 0x1dc   :  { %v475_v7 = vpop.f32.mrf.mxu1 }
 0x1dd   :  { %v476_v8 = vadd.f32 %v8744_v61, %v475_v7  ;;  %v576_v9 = vsel %vm544_vm1, %v466_v1, %v560_v6  ;;  %v563_v11 = vmul.f32 0.2, %v481_v4  ;;  %vm547_vm3 = vcmp.gt.f32.partialorder %v481_v4, 0.0 }
 0x1de   :  { %v6276_v12 = vpop.f32.mrf.mxu1  ;;  %6324 = vmatprep.mubr.f32.mxu1 %v576_v9 }
 0x1df   :  { %v491_v13 = vadd.f32 %v6276_v12, %v8744_v61  ;;  %6325 = vmatmul.mubr.f32.vlgmr.msra.gmra.mxu1 %v577_v10  ;;  %vm546_vm2 = vcmp.gt.f32.partialorder %v476_v8, 0.0  ;;  %v562_v14 = vmul.f32 0.2, %v476_v8  ;;  %v579_v23 = vsel %vm547_vm3, %v481_v4, %v563_v11 }
 0x1e0   :  { %v485_v15 = vpop.f32.mrf.mxu1 }
 0x1e1   :  { %v486_v16 = vadd.f32 %v8744_v61, %v485_v15  ;;  %v578_v17 = vsel %vm546_vm2, %v476_v8, %v562_v14  ;;  %v565_v19 = vmul.f32 0.2, %v491_v13  ;;  %vm549_vm5 = vcmp.gt.f32.partialorder %v491_v13, 0.0 }
 0x1e2   :  { %v6279_v21 = vpop.f32.mrf.mxu1  ;;  %6327 = vmatprep.mubr.f32.mxu1 %v578_v17  ;;  %v810_v17 = vld [vmem:[#allocation10 + $0x10] sm:$0xff] }
 0x1e3   :  { %v501_v25 = vadd.f32 %v6279_v21, %v8744_v61  ;;  %6328 = vmatmul.mubr.f32.gmra.mxu1 %v579_v23  ;;  %vm548_vm4 = vcmp.gt.f32.partialorder %v486_v16, 0.0  ;;  %v564_v27 = vmul.f32 0.2, %v486_v16  ;;  %v581_v39 = vsel %vm549_vm5, %v491_v13, %v565_v19  ;;  %v809_v19 = vld [vmem:[#allocation10 + $0x8] sm:$0xff]  ;;  %v1207_v21 = vld [vmem:[#allocation19 + $0x78] sm:$0xff] }
 0x1e4   :  { %v495_v29 = vpop.f32.mrf.mxu1  ;;  %v1039_v23 = vld [vmem:[#allocation11 + $0x78] sm:$0xff] }
 0x1e5   :  { %v496_v31 = vadd.f32 %v8744_v61, %v495_v29  ;;  %v580_v33 = vsel %vm548_vm4, %v486_v16, %v564_v27  ;;  %v567_v35 = vmul.f32 0.2, %v501_v25  ;;  %vm551_vm7 = vcmp.gt.f32.partialorder %v501_v25, 0.0  ;;  %v811_v16 = vld [vmem:[#allocation10 + $0x18] sm:$0xff]  ;;  %6404 = vmatprep.subr.mxu1 %v1039_v23  ;;  %v1037_v27 = vld [vmem:[#allocation11 + $0x68] sm:$0xff]  ;;  %v1036_v29 = vld [vmem:[#allocation11 + $0x60] sm:$0xff] }
 0x1e6   :  { %v6282_v37 = vpop.f32.mrf.mxu1  ;;  %6330 = vmatprep.mubr.f32.mxu1 %v580_v33  ;;  %6372 = vmatprep.subr.mxu0 %v811_v16  ;;  %v1034_v33 = vld [vmem:[#allocation11 + $0x50] sm:$0xff] }
 0x1e7   :  { %v511_v41 = vadd.f32 %v6282_v37, %v8744_v61  ;;  %6331 = vmatmul.mubr.f32.gmra.mxu1 %v581_v39  ;;  %vm550_vm6 = vcmp.gt.f32.partialorder %v496_v31, 0.0  ;;  %v566_v45 = vmul.f32 0.2, %v496_v31  ;;  %v583_v51 = vsel %vm551_vm7, %v501_v25, %v567_v35  ;;  %6373 = vmatpush3.msra.mxu0 %v811_v16  ;;  %v1038_v25 = vld [vmem:[#allocation11 + $0x70] sm:$0xff]  ;;  %v1033_v35 = vld [vmem:[#allocation11 + $0x48] sm:$0xff]  ;;  %v1032_v37 = vld [vmem:[#allocation11 + $0x40] sm:$0xff] }
 0x1e8   :  { %v505_v46 = vpop.f32.mrf.mxu1  ;;  %6374 = vmatprep.subr.mxu0 %v810_v17  ;;  %6405 = vmatpush3.msra.mxu1 %v1039_v23  ;;  %v1031_v39 = vld [vmem:[#allocation11 + $0x38] sm:$0xff] }
 0x1e9   :  { %v506_v47 = vadd.f32 %v8744_v61, %v505_v46  ;;  %v582_v48 = vsel %vm550_vm6, %v496_v31, %v566_v45  ;;  %v569_v49 = vmul.f32 0.2, %v511_v41  ;;  %vm553_vm9 = vcmp.gt.f32.partialorder %v511_v41, 0.0  ;;  %6375 = vmatpush3.msra.mxu0 %v810_v17  ;;  %6406 = vmatprep.subr.mxu1 %v1038_v25  ;;  %v1035_v31 = vld [vmem:[#allocation11 + $0x58] sm:$0xff]  ;;  %v1029_v45 = vld [vmem:[#allocation11 + $0x28] sm:$0xff]  ;;  %v1028_v46 = vld [vmem:[#allocation11 + $0x20] sm:$0xff] }
 0x1ea   :  { %v6285_v50 = vpop.f32.mrf.mxu1  ;;  %6333 = vmatprep.mubr.f32.mxu1 %v582_v48  ;;  %6376 = vmatprep.subr.mxu0 %v809_v19 }
 0x1eb   :  { %v521_v52 = vadd.f32 %v6285_v50, %v8744_v61  ;;  %6334 = vmatmul.mubr.f32.gmra.mxu1 %v583_v51  ;;  %vm552_vm8 = vcmp.gt.f32.partialorder %v506_v47, 0.0  ;;  %v568_v53 = vmul.f32 0.2, %v506_v47  ;;  %v585_v59 = vsel %vm553_vm9, %v511_v41, %v569_v49  ;;  %6377 = vmatpush3.msra.mxu0 %v809_v19  ;;  %v1030_v41 = vld [vmem:[#allocation11 + $0x30] sm:$0xff] }
 0x1ec   :  { %v515_v54 = vpop.f32.mrf.mxu1  ;;  %6407 = vmatpush3.msra.mxu1 %v1038_v25 }
 0x1ed   :  { %v516_v55 = vadd.f32 %v8744_v61, %v515_v54  ;;  %v584_v56 = vsel %vm552_vm8, %v506_v47, %v568_v53  ;;  %v571_v57 = vmul.f32 0.2, %v521_v52  ;;  %vm555_vm11 = vcmp.gt.f32.partialorder %v521_v52, 0.0  ;;  %6408 = vmatprep.subr.mxu1 %v1037_v27  ;;  %v8763_v47 = vld [vmem:[%s9658_s1] ss:$0 sm:$0xff] }
 0x1ee   :  { %v6288_v58 = vpop.f32.mrf.mxu1  ;;  %6336 = vmatprep.mubr.f32.mxu1 %v584_v56  ;;  %6409 = vmatpush3.msra.mxu1 %v1037_v27 }
 0x1ef   :  { %v531_v60 = vadd.f32 %v6288_v58, %v8744_v61  ;;  %6337 = vmatmul.mubr.f32.gmra.mxu1 %v585_v59  ;;  %vm554_vm10 = vcmp.gt.f32.partialorder %v516_v55, 0.0  ;;  %v570_v62 = vmul.f32 0.2, %v516_v55  ;;  %v587_v4 = vsel %vm555_vm11, %v521_v52, %v571_v57  ;;  %6410 = vmatprep.subr.mxu1 %v1036_v29 }
 0x1f0   :  { %v525_v63 = vpop.f32.mrf.mxu1  ;;  %6411 = vmatpush3.msra.mxu1 %v1036_v29  ;;  %v1201_v29 = vld [vmem:[#allocation19 + $0x48] sm:$0xff] }
 0x1f1   :  { %v526_v0 = vadd.f32 %v8744_v61, %v525_v63  ;;  %v586_v1 = vsel %vm554_vm10, %v516_v55, %v570_v62  ;;  %v573_v2 = vmul.f32 0.2, %v531_v60  ;;  %vm557_vm13 = vcmp.gt.f32.partialorder %v531_v60, 0.0  ;;  %6412 = vmatprep.subr.mxu1 %v1035_v31  ;;  %v1206_v63 = vld [vmem:[#allocation19 + $0x70] sm:$0xff] }
 0x1f2   :  { %v6291_v3 = vpop.f32.mrf.mxu1  ;;  %6339 = vmatprep.mubr.f32.mxu1 %v586_v1  ;;  %6413 = vmatpush3.msra.mxu1 %v1035_v31 }
 0x1f3   :  { %v541_v6 = vadd.f32 %v6291_v3, %v8744_v61  ;;  %6340 = vmatmul.mubr.f32.gmra.mxu1 %v587_v4  ;;  %vm556_vm12 = vcmp.gt.f32.partialorder %v526_v0, 0.0  ;;  %v572_v7 = vmul.f32 0.2, %v526_v0  ;;  %v589_v12 = vsel %vm557_vm13, %v531_v60, %v573_v2  ;;  %6414 = vmatprep.subr.mxu1 %v1034_v33  ;;  %v1205_v3 = vld [vmem:[#allocation19 + $0x68] sm:$0xff] }
 0x1f4   :  { %v535_v8 = vpop.f32.mrf.mxu1  ;;  %6415 = vmatpush3.msra.mxu1 %v1034_v33 }
 0x1f5   :  { %v536_v9 = vadd.f32 %v8744_v61, %v535_v8  ;;  %v588_v10 = vsel %vm556_vm12, %v526_v0, %v572_v7  ;;  %v575_v11 = vmul.f32 0.2, %v541_v6  ;;  %vm559_vm15 = vcmp.gt.f32.partialorder %v541_v6, 0.0  ;;  %v808_v61 = vld [vmem:[#allocation10] sm:$0xff]  ;;  %6416 = vmatprep.subr.mxu1 %v1033_v35 }
 0x1f6   :  { %6342 = vmatprep.mubr.f32.mxu1 %v588_v10  ;;  %6378 = vmatprep.subr.mxu0 %v808_v61  ;;  %v1204_v10 = vld [vmem:[#allocation19 + $0x60] sm:$0xff] }
 0x1f7   :  { %6343 = vmatmul.mubr.f32.gmra.mxu1 %v589_v12  ;;  %vm558_vm14 = vcmp.gt.f32.partialorder %v536_v9, 0.0  ;;  %v574_v13 = vmul.f32 0.2, %v536_v9  ;;  %v591_v15 = vsel %vm559_vm15, %v541_v6, %v575_v11  ;;  %6379 = vmatpush3.msra.mxu0 %v808_v61 }
 0x1f8   :  { %6460 = vmatprep.subr.mxu0 %v1207_v21  ;;  %6417 = vmatpush3.msra.mxu1 %v1033_v35 }
 0x1f9   :  { %v590_v14 = vsel %vm558_vm14, %v536_v9, %v574_v13  ;;  %6418 = vmatprep.subr.mxu1 %v1032_v37 }
 0x1fa   :  { %6345 = vmatprep.mubr.f32.mxu1 %v590_v14  ;;  %6419 = vmatpush3.msra.mxu1 %v1032_v37  ;;  %v1203_v14 = vld [vmem:[#allocation19 + $0x58] sm:$0xff] }
 0x1fb   :  { %6346 = vmatmul.mubr.f32.gmra.mxu1 %v591_v15  ;;  %6420 = vmatprep.subr.mxu1 %v1031_v39 }
 0x1fc   :  { %6421 = vmatpush3.msra.mxu1 %v1031_v39 }
 0x1fd   :  { %6422 = vmatprep.subr.mxu1 %v1030_v41 }
 0x1fe   :  { %6423 = vmatpush3.msra.mxu1 %v1030_v41  ;;  %v1200_v41 = vld [vmem:[#allocation19 + $0x40] sm:$0xff] }
 0x1ff   :  { %6424 = vmatprep.subr.mxu1 %v1029_v45 }
 0x200   :  { %6425 = vmatpush3.msra.mxu1 %v1029_v45 }
 0x201   :  { %6426 = vmatprep.subr.mxu1 %v1028_v46 }
 0x202   :  { %6427 = vmatpush3.msra.mxu1 %v1028_v46 }
 0x29f   :  { %v6326_v48 = vpop.f32.mrf.mxu1 }
 0x2a0   :  { %v687_v49 = vadd.f32 %v6326_v48, %v8763_v47 }
 0x2a1   :  { %v681_v50 = vpop.f32.mrf.mxu1 }
 0x2a2   :  { %v682_v51 = vadd.f32 %v8763_v47, %v681_v50  ;;  %v777_v52 = vmul.f32 0.2, %v687_v49  ;;  %vm761_vm1 = vcmp.gt.f32.partialorder %v687_v49, 0.0 }
 0x2a3   :  { %v6329_v53 = vpop.f32.mrf.mxu1 }
 0x2a4   :  { %v697_v54 = vadd.f32 %v6329_v53, %v8763_v47  ;;  %vm760_vm0 = vcmp.gt.f32.partialorder %v682_v51, 0.0  ;;  %v776_v55 = vmul.f32 0.2, %v682_v51  ;;  %v793_v62 = vsel %vm761_vm1, %v687_v49, %v777_v52  ;;  %v1199_v49 = vld [vmem:[#allocation19 + $0x38] sm:$0xff] }
 0x2a5   :  { %v691_v56 = vpop.f32.mrf.mxu1 }
 0x2a6   :  { %v692_v57 = vadd.f32 %v8763_v47, %v691_v56  ;;  %v792_v58 = vsel %vm760_vm0, %v682_v51, %v776_v55  ;;  %v779_v59 = vmul.f32 0.2, %v697_v54  ;;  %vm763_vm3 = vcmp.gt.f32.partialorder %v697_v54, 0.0  ;;  %v1198_v55 = vld [vmem:[#allocation19 + $0x30] sm:$0xff] }
 0x2a7   :  { %v6332_v60 = vpop.f32.mrf.mxu1  ;;  %6380 = vmatprep.mubr.f32.mxu0 %v792_v58 }
 0x2a8   :  { %v707_v0 = vadd.f32 %v6332_v60, %v8763_v47  ;;  %6381 = vmatmul.mubr.f32.vlgmr.msra.gmra.mxu0 %v793_v62  ;;  %vm762_vm2 = vcmp.gt.f32.partialorder %v692_v57, 0.0  ;;  %v778_v1 = vmul.f32 0.2, %v692_v57  ;;  %v795_v9 = vsel %vm763_vm3, %v697_v54, %v779_v59  ;;  %v1197_v59 = vld [vmem:[#allocation19 + $0x28] sm:$0xff] }
 0x2a9   :  { %v701_v2 = vpop.f32.mrf.mxu1  ;;  %6461 = vmatpush3.msra.mxu0 %v1207_v21  ;;  %v1202_v21 = vld [vmem:[#allocation19 + $0x50] sm:$0xff] }
 0x2aa   :  { %v702_v4 = vadd.f32 %v8763_v47, %v701_v2  ;;  %6462 = vmatprep.subr.mxu0 %v1206_v63  ;;  %v794_v6 = vsel %vm762_vm2, %v692_v57, %v778_v1  ;;  %v781_v7 = vmul.f32 0.2, %v707_v0  ;;  %vm765_vm5 = vcmp.gt.f32.partialorder %v707_v0, 0.0  ;;  %v1196_v2 = vld [vmem:[#allocation19 + $0x20] sm:$0xff] }
 0x2ab   :  { %v6335_v8 = vpop.f32.mrf.mxu1  ;;  %6383 = vmatprep.mubr.f32.mxu0 %v794_v6  ;;  %6463 = vmatpush3.msra.mxu0 %v1206_v63 }
 0x2ac   :  { %v717_v11 = vadd.f32 %v6335_v8, %v8763_v47  ;;  %6384 = vmatmul.mubr.f32.gmra.mxu0 %v795_v9  ;;  %6464 = vmatprep.subr.mxu0 %v1205_v3  ;;  %vm764_vm4 = vcmp.gt.f32.partialorder %v702_v4, 0.0  ;;  %v780_v12 = vmul.f32 0.2, %v702_v4  ;;  %v797_v61 = vsel %vm765_vm5, %v707_v0, %v781_v7  ;;  %v1195_v7 = vld [vmem:[#allocation19 + $0x18] sm:$0xff] }
 0x2ad   :  { %v711_v13 = vpop.f32.mrf.mxu1  ;;  %6465 = vmatpush3.msra.mxu0 %v1205_v3 }
 0x2ae   :  { %v712_v15 = vadd.f32 %v8763_v47, %v711_v13  ;;  %6466 = vmatprep.subr.mxu0 %v1204_v10  ;;  %v796_v16 = vsel %vm764_vm4, %v702_v4, %v780_v12  ;;  %v783_v17 = vmul.f32 0.2, %v717_v11  ;;  %vm767_vm7 = vcmp.gt.f32.partialorder %v717_v11, 0.0  ;;  %v1194_v12 = vld [vmem:[#allocation19 + $0x10] sm:$0xff] }
 0x2af   :  { %v6338_v19 = vpop.f32.mrf.mxu1  ;;  %6386 = vmatprep.mubr.f32.mxu0 %v796_v16  ;;  %6467 = vmatpush3.msra.mxu0 %v1204_v10 }
 0x2b0   :  { %v727_v23 = vadd.f32 %v6338_v19, %v8763_v47  ;;  %6387 = vmatmul.mubr.f32.gmra.mxu0 %v797_v61  ;;  %6468 = vmatprep.subr.mxu0 %v1203_v14  ;;  %vm766_vm6 = vcmp.gt.f32.partialorder %v712_v15, 0.0  ;;  %v782_v25 = vmul.f32 0.2, %v712_v15  ;;  %v799_v39 = vsel %vm767_vm7, %v717_v11, %v783_v17 }
 0x2b1   :  { %v721_v27 = vpop.f32.mrf.mxu1  ;;  %6469 = vmatpush3.msra.mxu0 %v1203_v14  ;;  %v1193_v14 = vld [vmem:[#allocation19 + $0x8] sm:$0xff] }
 0x2b2   :  { %v722_v31 = vadd.f32 %v8763_v47, %v721_v27  ;;  %6470 = vmatprep.subr.mxu0 %v1202_v21  ;;  %v798_v33 = vsel %vm766_vm6, %v712_v15, %v782_v25  ;;  %v785_v35 = vmul.f32 0.2, %v727_v23  ;;  %vm769_vm9 = vcmp.gt.f32.partialorder %v727_v23, 0.0 }
 0x2b3   :  { %v6341_v37 = vpop.f32.mrf.mxu1  ;;  %6389 = vmatprep.mubr.f32.mxu0 %v798_v33  ;;  %6471 = vmatpush3.msra.mxu0 %v1202_v21 }
 0x2b4   :  { %v737_v45 = vadd.f32 %v6341_v37, %v8763_v47  ;;  %6390 = vmatmul.mubr.f32.gmra.mxu0 %v799_v39  ;;  %6472 = vmatprep.subr.mxu0 %v1201_v29  ;;  %vm768_vm8 = vcmp.gt.f32.partialorder %v722_v31, 0.0  ;;  %v784_v46 = vmul.f32 0.2, %v722_v31  ;;  %v801_v54 = vsel %vm769_vm9, %v727_v23, %v785_v35 }
 0x2b5   :  { %v731_v48 = vpop.f32.mrf.mxu1  ;;  %6473 = vmatpush3.msra.mxu0 %v1201_v29 }
 0x2b6   :  { %v732_v50 = vadd.f32 %v8763_v47, %v731_v48  ;;  %6474 = vmatprep.subr.mxu0 %v1200_v41  ;;  %v800_v51 = vsel %vm768_vm8, %v722_v31, %v784_v46  ;;  %v787_v52 = vmul.f32 0.2, %v737_v45  ;;  %vm771_vm11 = vcmp.gt.f32.partialorder %v737_v45, 0.0 }
 0x2b7   :  { %v6344_v53 = vpop.f32.mrf.mxu1  ;;  %6392 = vmatprep.mubr.f32.mxu0 %v800_v51  ;;  %6475 = vmatpush3.msra.mxu0 %v1200_v41 }
 0x2b8   :  { %v747_v56 = vadd.f32 %v6344_v53, %v8763_v47  ;;  %6393 = vmatmul.mubr.f32.gmra.mxu0 %v801_v54  ;;  %6476 = vmatprep.subr.mxu0 %v1199_v49  ;;  %vm770_vm10 = vcmp.gt.f32.partialorder %v732_v50, 0.0  ;;  %v786_v57 = vmul.f32 0.2, %v732_v50  ;;  %v803_v1 = vsel %vm771_vm11, %v737_v45, %v787_v52 }
 0x2b9   :  { %v741_v58 = vpop.f32.mrf.mxu1  ;;  %6477 = vmatpush3.msra.mxu0 %v1199_v49 }
 0x2ba   :  { %v742_v60 = vadd.f32 %v8763_v47, %v741_v58  ;;  %6478 = vmatprep.subr.mxu0 %v1198_v55  ;;  %v802_v62 = vsel %vm770_vm10, %v732_v50, %v786_v57  ;;  %v789_v63 = vmul.f32 0.2, %v747_v56  ;;  %vm773_vm13 = vcmp.gt.f32.partialorder %v747_v56, 0.0 }
 0x2bb   :  { %v6347_v0 = vpop.f32.mrf.mxu1  ;;  %6395 = vmatprep.mubr.f32.mxu0 %v802_v62  ;;  %6479 = vmatpush3.msra.mxu0 %v1198_v55 }
 0x2bc   :  { %v757_v3 = vadd.f32 %v6347_v0, %v8763_v47  ;;  %6396 = vmatmul.mubr.f32.gmra.mxu0 %v803_v1  ;;  %6480 = vmatprep.subr.mxu0 %v1197_v59  ;;  %vm772_vm12 = vcmp.gt.f32.partialorder %v742_v60, 0.0  ;;  %v788_v4 = vmul.f32 0.2, %v742_v60  ;;  %v805_v11 = vsel %vm773_vm13, %v747_v56, %v789_v63 }
 0x2bd   :  { %v751_v6 = vpop.f32.mrf.mxu1  ;;  %6481 = vmatpush3.msra.mxu0 %v1197_v59 }
 0x2be   :  { %v752_v8 = vadd.f32 %v8763_v47, %v751_v6  ;;  %6482 = vmatprep.subr.mxu0 %v1196_v2  ;;  %v804_v9 = vsel %vm772_vm12, %v742_v60, %v788_v4  ;;  %v791_v10 = vmul.f32 0.2, %v757_v3  ;;  %vm775_vm15 = vcmp.gt.f32.partialorder %v757_v3, 0.0  ;;  %v1192_v47 = vld [vmem:[#allocation19] sm:$0xff] }
 0x2bf   :  { %6398 = vmatprep.mubr.f32.mxu0 %v804_v9  ;;  %6483 = vmatpush3.msra.mxu0 %v1196_v2 }
 0x2c0   :  { %6399 = vmatmul.mubr.f32.gmra.mxu0 %v805_v11  ;;  %6484 = vmatprep.subr.mxu0 %v1195_v7  ;;  %vm774_vm14 = vcmp.gt.f32.partialorder %v752_v8, 0.0  ;;  %v790_v13 = vmul.f32 0.2, %v752_v8  ;;  %v807_v16 = vsel %vm775_vm15, %v757_v3, %v791_v10 }
 0x2c1   :  { %6485 = vmatpush3.msra.mxu0 %v1195_v7 }
 0x2c2   :  { %6486 = vmatprep.subr.mxu0 %v1194_v12  ;;  %v806_v15 = vsel %vm774_vm14, %v752_v8, %v790_v13 }
 0x2c3   :  { %6401 = vmatprep.mubr.f32.mxu0 %v806_v15  ;;  %6487 = vmatpush3.msra.mxu0 %v1194_v12 }
 0x2c4   :  { %6402 = vmatmul.mubr.f32.gmra.mxu0 %v807_v16  ;;  %6488 = vmatprep.subr.mxu0 %v1193_v14 }
 0x2c5   :  { %6489 = vmatpush3.msra.mxu0 %v1193_v14  ;;  %6492 = vmatprep.mubr.f32.mxu0 %v8680_v5  ;;  %v1027_v5 = vld [vmem:[#allocation11 + $0x18] sm:$0xff] }
 0x2c6   :  { %6490 = vmatprep.subr.mxu0 %v1192_v47  ;;  %6428 = vmatprep.subr.mxu1 %v1027_v5 }
 0x2c7   :  { %6491 = vmatpush3.msra.mxu0 %v1192_v47  ;;  %6429 = vmatpush3.msra.mxu1 %v1027_v5 }
 0x2c8   :  { %6493 = vmatmul.mubr.f32.vlgmr.msra.gmra.mxu0 %v8684_v18  ;;  %v1026_v18 = vld [vmem:[#allocation11 + $0x10] sm:$0xff] }
 0x2c9   :  { %6495 = vmatprep.mubr.f32.mxu0 %v8687_v20  ;;  %6430 = vmatprep.subr.mxu1 %v1026_v18  ;;  %v1025_v20 = vld [vmem:[#allocation11 + $0x8] sm:$0xff] }
 0x2ca   :  { %6431 = vmatpush3.msra.mxu1 %v1026_v18 }
 0x2cb   :  { %6432 = vmatprep.subr.mxu1 %v1025_v20 }
 0x2cc   :  { %6496 = vmatmul.mubr.f32.gmra.mxu0 %v8692_v22  ;;  %6433 = vmatpush3.msra.mxu1 %v1025_v20  ;;  %v1024_v22 = vld [vmem:[#allocation11] sm:$0xff] }
 0x2cd   :  { %6498 = vmatprep.mubr.f32.mxu0 %v8695_v24  ;;  %6434 = vmatprep.subr.mxu1 %v1024_v22  ;;  %v8798_v24 = vld [vmem:[%s9659_s15] ss:$0 sm:$0xff] }
 0x2ce   :  { %6435 = vmatpush3.msra.mxu1 %v1024_v22 }
 0x2d0   :  { %6499 = vmatmul.mubr.f32.gmra.mxu0 %v8700_v26 }
 0x2d1   :  { %6501 = vmatprep.mubr.f32.mxu0 %v8703_v28 }
 0x2d4   :  { %6502 = vmatmul.mubr.f32.gmra.mxu0 %v8708_v30 }
 0x2d5   :  { %6504 = vmatprep.mubr.f32.mxu0 %v8711_v32 }
 0x2d8   :  { %6505 = vmatmul.mubr.f32.gmra.mxu0 %v8716_v34 }
 0x2d9   :  { %6507 = vmatprep.mubr.f32.mxu0 %v8719_v36 }
 0x2dc   :  { %6508 = vmatmul.mubr.f32.gmra.mxu0 %v8724_v38 }
 0x2dd   :  { %6510 = vmatprep.mubr.f32.mxu0 %v8727_v40 }
 0x2e0   :  { %6511 = vmatmul.mubr.f32.gmra.mxu0 %v8732_v42 }
 0x2e1   :  { %6513 = vmatprep.mubr.f32.mxu0 %v8735_v43 }
 0x2e4   :  { %6514 = vmatmul.mubr.f32.gmra.mxu0 %v8740_v44 }
 0x368   :  { %v6382_v26 = vpop.f32.mrf.mxu0 }
 0x369   :  { %v903_v28 = vadd.f32 %v6382_v26, %v8798_v24 }
 0x36a   :  { %v897_v30 = vpop.f32.mrf.mxu0 }
 0x36b   :  { %v898_v32 = vadd.f32 %v8798_v24, %v897_v30  ;;  %v993_v34 = vmul.f32 0.2, %v903_v28  ;;  %vm977_vm0 = vcmp.gt.f32.partialorder %v903_v28, 0.0  ;;  %v8816_v30 = vld [vmem:[#allocation3] sm:$0xff] }
 0x36c   :  { %v6385_v36 = vpop.f32.mrf.mxu0 }
 0x36d   :  { %v913_v38 = vadd.f32 %v6385_v36, %v8798_v24  ;;  %vm976_vm1 = vcmp.gt.f32.partialorder %v898_v32, 0.0  ;;  %v992_v40 = vmul.f32 0.2, %v898_v32  ;;  %v1009_v17 = vsel %vm977_vm0, %v903_v28, %v993_v34 }
 0x36e   :  { %v907_v42 = vpop.f32.mrf.mxu0 }
 0x36f   :  { %v908_v43 = vadd.f32 %v8798_v24, %v907_v42  ;;  %v1008_v44 = vsel %vm976_vm1, %v898_v32, %v992_v40  ;;  %v995_v19 = vmul.f32 0.2, %v913_v38  ;;  %vm979_vm3 = vcmp.gt.f32.partialorder %v913_v38, 0.0 }
 0x370   :  { %v6388_v61 = vpop.f32.mrf.mxu0  ;;  %6436 = vmatprep.mubr.f32.mxu1 %v1008_v44 }
 0x371   :  { %v923_v21 = vadd.f32 %v6388_v61, %v8798_v24  ;;  %6437 = vmatmul.mubr.f32.vlgmr.msra.gmra.mxu1 %v1009_v17  ;;  %vm978_vm2 = vcmp.gt.f32.partialorder %v908_v43, 0.0  ;;  %v994_v23 = vmul.f32 0.2, %v908_v43  ;;  %v1011_v35 = vsel %vm979_vm3, %v913_v38, %v995_v19 }
 0x372   :  { %v917_v25 = vpop.f32.mrf.mxu0 }
 0x373   :  { %v918_v27 = vadd.f32 %v8798_v24, %v917_v25  ;;  %v1010_v29 = vsel %vm978_vm2, %v908_v43, %v994_v23  ;;  %v997_v31 = vmul.f32 0.2, %v923_v21  ;;  %vm981_vm5 = vcmp.gt.f32.partialorder %v923_v21, 0.0 }
 0x374   :  { %v6391_v33 = vpop.f32.mrf.mxu0  ;;  %6439 = vmatprep.mubr.f32.mxu1 %v1010_v29 }
 0x375   :  { %v933_v37 = vadd.f32 %v6391_v33, %v8798_v24  ;;  %6440 = vmatmul.mubr.f32.gmra.mxu1 %v1011_v35  ;;  %vm980_vm4 = vcmp.gt.f32.partialorder %v918_v27, 0.0  ;;  %v996_v39 = vmul.f32 0.2, %v918_v27  ;;  %v1013_v50 = vsel %vm981_vm5, %v923_v21, %v997_v31 }
 0x376   :  { %v927_v41 = vpop.f32.mrf.mxu0 }
 0x377   :  { %v928_v45 = vadd.f32 %v8798_v24, %v927_v41  ;;  %v1012_v46 = vsel %vm980_vm4, %v918_v27, %v996_v39  ;;  %v999_v48 = vmul.f32 0.2, %v933_v37  ;;  %vm983_vm7 = vcmp.gt.f32.partialorder %v933_v37, 0.0 }
 0x378   :  { %v6394_v49 = vpop.f32.mrf.mxu0  ;;  %6442 = vmatprep.mubr.f32.mxu1 %v1012_v46 }
 0x379   :  { %v943_v51 = vadd.f32 %v6394_v49, %v8798_v24  ;;  %6443 = vmatmul.mubr.f32.gmra.mxu1 %v1013_v50  ;;  %vm982_vm6 = vcmp.gt.f32.partialorder %v928_v45, 0.0  ;;  %v998_v52 = vmul.f32 0.2, %v928_v45  ;;  %v1015_v58 = vsel %vm983_vm7, %v933_v37, %v999_v48 }
 0x37a   :  { %v937_v53 = vpop.f32.mrf.mxu0 }
 0x37b   :  { %v938_v54 = vadd.f32 %v8798_v24, %v937_v53  ;;  %v1014_v55 = vsel %vm982_vm6, %v928_v45, %v998_v52  ;;  %v1001_v56 = vmul.f32 0.2, %v943_v51  ;;  %vm985_vm9 = vcmp.gt.f32.partialorder %v943_v51, 0.0 }
 0x37c   :  { %v6397_v57 = vpop.f32.mrf.mxu0  ;;  %6445 = vmatprep.mubr.f32.mxu1 %v1014_v55  ;;  %v8821_v55 = vld [vmem:[#allocation3 + $0x10] sm:$0xff] }
 0x37d   :  { %v953_v59 = vadd.f32 %v6397_v57, %v8798_v24  ;;  %6446 = vmatmul.mubr.f32.gmra.mxu1 %v1015_v58  ;;  %vm984_vm8 = vcmp.gt.f32.partialorder %v938_v54, 0.0  ;;  %v1000_v60 = vmul.f32 0.2, %v938_v54  ;;  %v1017_v3 = vsel %vm985_vm9, %v943_v51, %v1001_v56  ;;  %v1529_v56 = vld [vmem:[#allocation20 + $0x78] sm:$0xff]  ;;  %v1528_v57 = vld [vmem:[#allocation20 + $0x70] sm:$0xff] }
 0x37e   :  { %v947_v62 = vpop.f32.mrf.mxu0  ;;  %6572 = vmatprep.subr.mxu0 %v1529_v56  ;;  %v8825_v58 = vld [vmem:[#allocation3 + $0x18] sm:$0xff] }
 0x37f   :  { %v948_v63 = vadd.f32 %v8798_v24, %v947_v62  ;;  %v1016_v0 = vsel %vm984_vm8, %v938_v54, %v1000_v60  ;;  %v1003_v1 = vmul.f32 0.2, %v953_v59  ;;  %vm987_vm11 = vcmp.gt.f32.partialorder %v953_v59, 0.0  ;;  %v8819_v54 = vld [vmem:[#allocation3 + $0x8] sm:$0xff]  ;;  %6573 = vmatpush3.msra.mxu0 %v1529_v56  ;;  %v8827_v60 = vld [vmem:[#allocation3 + $0x20] sm:$0xff]  ;;  %v1851_v56 = vld [vmem:[#allocation22 + $0x78] sm:$0xff] }
 0x380   :  { %v6400_v2 = vpop.f32.mrf.mxu0  ;;  %6448 = vmatprep.mubr.f32.mxu1 %v1016_v0  ;;  %6574 = vmatprep.subr.mxu0 %v1528_v57  ;;  %v1526_v62 = vld [vmem:[#allocation20 + $0x60] sm:$0xff]  ;;  %v1525_v0 = vld [vmem:[#allocation20 + $0x58] sm:$0xff] }
 0x381   :  { %v963_v4 = vadd.f32 %v6400_v2, %v8798_v24  ;;  %6449 = vmatmul.mubr.f32.gmra.mxu1 %v1017_v3  ;;  %vm986_vm10 = vcmp.gt.f32.partialorder %v948_v63, 0.0  ;;  %v1002_v6 = vmul.f32 0.2, %v948_v63  ;;  %v1019_v12 = vsel %vm987_vm11, %v953_v59, %v1003_v1  ;;  %v1527_v59 = vld [vmem:[#allocation20 + $0x68] sm:$0xff]  ;;  %6575 = vmatpush3.msra.mxu0 %v1528_v57  ;;  %v8833_v1 = vld [vmem:[#allocation3 + $0x30] sm:$0xff]  ;;  %v8837_v3 = vld [vmem:[#allocation3 + $0x38] sm:$0xff] }
 0x382   :  { %v957_v7 = vpop.f32.mrf.mxu0  ;;  %6576 = vmatprep.subr.mxu0 %v1527_v59  ;;  %v1524_v2 = vld [vmem:[#allocation20 + $0x50] sm:$0xff] }
 0x383   :  { %v958_v8 = vadd.f32 %v8798_v24, %v957_v7  ;;  %v1018_v9 = vsel %vm986_vm10, %v948_v63, %v1002_v6  ;;  %v1005_v10 = vmul.f32 0.2, %v963_v4  ;;  %vm989_vm13 = vcmp.gt.f32.partialorder %v963_v4, 0.0  ;;  %v8831_v63 = vld [vmem:[#allocation3 + $0x28] sm:$0xff]  ;;  %6577 = vmatpush3.msra.mxu0 %v1527_v59  ;;  %v8839_v6 = vld [vmem:[#allocation3 + $0x40] sm:$0xff]  ;;  %v1850_v57 = vld [vmem:[#allocation22 + $0x70] sm:$0xff] }
 0x384   :  { %v6403_v11 = vpop.f32.mrf.mxu0  ;;  %6451 = vmatprep.mubr.f32.mxu1 %v1018_v9  ;;  %6578 = vmatprep.subr.mxu0 %v1526_v62  ;;  %v1522_v7 = vld [vmem:[#allocation20 + $0x40] sm:$0xff]  ;;  %v1521_v9 = vld [vmem:[#allocation20 + $0x38] sm:$0xff]  ;;  %v1849_v59 = vld [vmem:[#allocation22 + $0x68] sm:$0xff] }
 0x385   :  { %v973_v13 = vadd.f32 %v6403_v11, %v8798_v24  ;;  %6452 = vmatmul.mubr.f32.gmra.mxu1 %v1019_v12  ;;  %vm988_vm12 = vcmp.gt.f32.partialorder %v958_v8, 0.0  ;;  %v1004_v14 = vmul.f32 0.2, %v958_v8  ;;  %v1021_v20 = vsel %vm989_vm13, %v963_v4, %v1005_v10  ;;  %6579 = vmatpush3.msra.mxu0 %v1526_v62  ;;  %v1523_v4 = vld [vmem:[#allocation20 + $0x48] sm:$0xff]  ;;  %v8845_v10 = vld [vmem:[#allocation3 + $0x50] sm:$0xff]  ;;  %v8849_v12 = vld [vmem:[#allocation3 + $0x58] sm:$0xff] }
 0x386   :  { %v967_v15 = vpop.f32.mrf.mxu0  ;;  %6580 = vmatprep.subr.mxu0 %v1525_v0  ;;  %v1520_v11 = vld [vmem:[#allocation20 + $0x30] sm:$0xff]  ;;  %v1848_v62 = vld [vmem:[#allocation22 + $0x60] sm:$0xff] }
 0x387   :  { %v968_v16 = vadd.f32 %v8798_v24, %v967_v15  ;;  %v1020_v47 = vsel %vm988_vm12, %v958_v8, %v1004_v14  ;;  %v1007_v5 = vmul.f32 0.2, %v973_v13  ;;  %vm991_vm15 = vcmp.gt.f32.partialorder %v973_v13, 0.0  ;;  %6581 = vmatpush3.msra.mxu0 %v1525_v0  ;;  %v8843_v8 = vld [vmem:[#allocation3 + $0x48] sm:$0xff]  ;;  %v8851_v14 = vld [vmem:[#allocation3 + $0x60] sm:$0xff]  ;;  %v1847_v0 = vld [vmem:[#allocation22 + $0x58] sm:$0xff] }
 0x388   :  { %6454 = vmatprep.mubr.f32.mxu1 %v1020_v47  ;;  %v6494_v18 = vpop.f32.mrf.mxu0  ;;  %6582 = vmatprep.subr.mxu0 %v1524_v2  ;;  %v1518_v15 = vld [vmem:[#allocation20 + $0x20] sm:$0xff]  ;;  %v1517_v47 = vld [vmem:[#allocation20 + $0x18] sm:$0xff] }
 0x389   :  { %6455 = vmatmul.mubr.f32.gmra.mxu1 %v1021_v20  ;;  %vm990_vm14 = vcmp.gt.f32.partialorder %v968_v16, 0.0  ;;  %v1006_v22 = vmul.f32 0.2, %v968_v16  ;;  %v1023_v34 = vsel %vm991_vm15, %v973_v13, %v1007_v5  ;;  %6583 = vmatpush3.msra.mxu0 %v1524_v2  ;;  %v1519_v13 = vld [vmem:[#allocation20 + $0x28] sm:$0xff]  ;;  %v8857_v5 = vld [vmem:[#allocation3 + $0x70] sm:$0xff]  ;;  %v8861_v20 = vld [vmem:[#allocation3 + $0x78] sm:$0xff] }
 0x38a   :  { %v1274_v26 = vpop.f32.mrf.mxu0  ;;  %6584 = vmatprep.subr.mxu0 %v1523_v4  ;;  %v1846_v2 = vld [vmem:[#allocation22 + $0x50] sm:$0xff] }
 0x38b   :  { %v1022_v28 = vsel %vm990_vm14, %v968_v16, %v1006_v22  ;;  %6585 = vmatpush3.msra.mxu0 %v1523_v4  ;;  %v8855_v16 = vld [vmem:[#allocation3 + $0x68] sm:$0xff] }
 0x38c   :  { %6457 = vmatprep.mubr.f32.mxu1 %v1022_v28  ;;  %v6497_v32 = vpop.f32.mrf.mxu0  ;;  %6586 = vmatprep.subr.mxu0 %v1522_v7  ;;  %v1515_v22 = vld [vmem:[#allocation20 + $0x8] sm:$0xff] }
 0x38d   :  { %6458 = vmatmul.mubr.f32.gmra.mxu1 %v1023_v34  ;;  %6587 = vmatpush3.msra.mxu0 %v1522_v7  ;;  %v1845_v4 = vld [vmem:[#allocation22 + $0x48] sm:$0xff]  ;;  %v1844_v7 = vld [vmem:[#allocation22 + $0x40] sm:$0xff] }
 0x38e   :  { %v1284_v36 = vpop.f32.mrf.mxu0  ;;  %6548 = vmatprep.mubr.f32.mxu1 %v8816_v30  ;;  %6588 = vmatprep.subr.mxu0 %v1521_v9 }
 0x38f   :  { %6589 = vmatpush3.msra.mxu0 %v1521_v9  ;;  %v1843_v9 = vld [vmem:[#allocation22 + $0x38] sm:$0xff] }
 0x390   :  { %v6500_v24 = vpop.f32.mrf.mxu0  ;;  %6590 = vmatprep.subr.mxu0 %v1520_v11 }
 0x391   :  { %6591 = vmatpush3.msra.mxu0 %v1520_v11  ;;  %v1842_v11 = vld [vmem:[#allocation22 + $0x30] sm:$0xff] }
 0x392   :  { %v1294_v38 = vpop.f32.mrf.mxu0  ;;  %6592 = vmatprep.subr.mxu0 %v1519_v13 }
 0x393   :  { %6593 = vmatpush3.msra.mxu0 %v1519_v13  ;;  %v1841_v13 = vld [vmem:[#allocation22 + $0x28] sm:$0xff] }
 0x394   :  { %v6503_v40 = vpop.f32.mrf.mxu0  ;;  %6594 = vmatprep.subr.mxu0 %v1518_v15 }
 0x395   :  { %6595 = vmatpush3.msra.mxu0 %v1518_v15  ;;  %v1840_v15 = vld [vmem:[#allocation22 + $0x20] sm:$0xff] }
 0x396   :  { %v1304_v42 = vpop.f32.mrf.mxu0  ;;  %6596 = vmatprep.subr.mxu0 %v1517_v47 }
 0x397   :  { %6597 = vmatpush3.msra.mxu0 %v1517_v47  ;;  %v1839_v47 = vld [vmem:[#allocation22 + $0x18] sm:$0xff] }
 0x398   :  { %v6506_v43 = vpop.f32.mrf.mxu0 }
 0x39a   :  { %v1314_v44 = vpop.f32.mrf.mxu0 }
 0x39c   :  { %v6509_v17 = vpop.f32.mrf.mxu0 }
 0x39e   :  { %v1324_v19 = vpop.f32.mrf.mxu0 }
 0x3a0   :  { %v6512_v61 = vpop.f32.mrf.mxu0 }
 0x3a2   :  { %v1334_v21 = vpop.f32.mrf.mxu0 }
 0x3a4   :  { %v6515_v23 = vpop.f32.mrf.mxu0 }
 0x3a5   :  { %7688 = vtanh.f32 %v6515_v23 }
 0x3a6   :  { %v1344_v25 = vpop.f32.mrf.mxu0 }
 0x3a7   :  { %7690 = vtanh.f32 %v1344_v25 }
 0x3a8   :  { %7692 = vtanh.f32 %v6512_v61 }
 0x3a9   :  { %7694 = vtanh.f32 %v1334_v21 }
 0x3aa   :  { %7696 = vtanh.f32 %v6509_v17 }
 0x3ab   :  { %7698 = vtanh.f32 %v1324_v19 }
 0x3ac   :  { %7700 = vtanh.f32 %v6506_v43 }
 0x3ad   :  { %7702 = vtanh.f32 %v1314_v44 }
 0x3ae   :  { %7704 = vtanh.f32 %v6503_v40 }
 0x3af   :  { %7706 = vtanh.f32 %v1304_v42 }
 0x3b0   :  { %7708 = vtanh.f32 %v6500_v24 }
 0x3b1   :  { %7710 = vtanh.f32 %v1294_v38 }
 0x3b2   :  { %v7689_v27 = vpop.eup %7688  ;;  %7712 = vtanh.f32 %v6497_v32 }
 0x3b3   :  { %6516 = vmatprep.subr.mxu1 %v7689_v27  ;;  %7714 = vtanh.f32 %v1284_v36 }
 0x3b4   :  { %v7691_v29 = vpop.eup %7690  ;;  %6517 = vmatpush3.msra.mxu1 %v7689_v27  ;;  %7716 = vtanh.f32 %v6494_v18  ;;  %v1516_v18 = vld [vmem:[#allocation20 + $0x10] sm:$0xff] }
 0x3b5   :  { %6518 = vmatprep.subr.mxu1 %v7691_v29  ;;  %v7693_v31 = vpop.eup %7692  ;;  %7718 = vtanh.f32 %v1274_v26  ;;  %6598 = vmatprep.subr.mxu0 %v1516_v18  ;;  %v1514_v26 = vld [vmem:[#allocation20] sm:$0xff] }
 0x3b6   :  { %6519 = vmatpush3.msra.mxu1 %v7691_v29  ;;  %v7695_v33 = vpop.eup %7694  ;;  %6599 = vmatpush3.msra.mxu0 %v1516_v18  ;;  %v1838_v18 = vld [vmem:[#allocation22 + $0x10] sm:$0xff] }
 0x3b7   :  { %6520 = vmatprep.subr.mxu1 %v7693_v31  ;;  %v7697_v35 = vpop.eup %7696  ;;  %6600 = vmatprep.subr.mxu0 %v1515_v22 }
 0x3b8   :  { %6521 = vmatpush3.msra.mxu1 %v7693_v31  ;;  %v7699_v37 = vpop.eup %7698  ;;  %6601 = vmatpush3.msra.mxu0 %v1515_v22 }
 0x3b9   :  { %6522 = vmatprep.subr.mxu1 %v7695_v33  ;;  %v7701_v39 = vpop.eup %7700  ;;  %6602 = vmatprep.subr.mxu0 %v1514_v26 }
 0x3ba   :  { %6523 = vmatpush3.msra.mxu1 %v7695_v33  ;;  %v7703_v41 = vpop.eup %7702  ;;  %6603 = vmatpush3.msra.mxu0 %v1514_v26 }
 0x3bb   :  { %6524 = vmatprep.subr.mxu1 %v7697_v35  ;;  %v7705_v45 = vpop.eup %7704  ;;  %6684 = vmatprep.subr.mxu0 %v1851_v56 }
 0x3bc   :  { %6525 = vmatpush3.msra.mxu1 %v7697_v35  ;;  %v7707_v46 = vpop.eup %7706 }
 0x3bd   :  { %6526 = vmatprep.subr.mxu1 %v7699_v37  ;;  %v7709_v48 = vpop.eup %7708 }
 0x3be   :  { %6527 = vmatpush3.msra.mxu1 %v7699_v37  ;;  %v7711_v49 = vpop.eup %7710 }
 0x3bf   :  { %6528 = vmatprep.subr.mxu1 %v7701_v39  ;;  %v7713_v50 = vpop.eup %7712 }
 0x3c0   :  { %6529 = vmatpush3.msra.mxu1 %v7701_v39  ;;  %v7715_v51 = vpop.eup %7714 }
 0x3c1   :  { %6530 = vmatprep.subr.mxu1 %v7703_v41  ;;  %v7717_v52 = vpop.eup %7716 }
 0x3c2   :  { %6531 = vmatpush3.msra.mxu1 %v7703_v41  ;;  %v7719_v53 = vpop.eup %7718 }
 0x3c3   :  { %6532 = vmatprep.subr.mxu1 %v7705_v45 }
 0x3c4   :  { %6533 = vmatpush3.msra.mxu1 %v7705_v45 }
 0x3c5   :  { %6534 = vmatprep.subr.mxu1 %v7707_v46 }
 0x3c6   :  { %6535 = vmatpush3.msra.mxu1 %v7707_v46 }
 0x3c7   :  { %6536 = vmatprep.subr.mxu1 %v7709_v48 }
 0x3c8   :  { %6537 = vmatpush3.msra.mxu1 %v7709_v48 }
 0x3c9   :  { %6538 = vmatprep.subr.mxu1 %v7711_v49 }
 0x3ca   :  { %6539 = vmatpush3.msra.mxu1 %v7711_v49 }
 0x3cb   :  { %6540 = vmatprep.subr.mxu1 %v7713_v50 }
 0x3cc   :  { %6541 = vmatpush3.msra.mxu1 %v7713_v50 }
 0x3cd   :  { %6542 = vmatprep.subr.mxu1 %v7715_v51 }
 0x3ce   :  { %6543 = vmatpush3.msra.mxu1 %v7715_v51 }
 0x3cf   :  { %6544 = vmatprep.subr.mxu1 %v7717_v52 }
 0x3d0   :  { %6545 = vmatpush3.msra.mxu1 %v7717_v52 }
 0x3d1   :  { %6546 = vmatprep.subr.mxu1 %v7719_v53 }
 0x3d2   :  { %6547 = vmatpush3.msra.mxu1 %v7719_v53 }
 0x3d3   :  { %6549 = vmatmul.mubr.f32.vlgmr.msra.gmra.mxu1 %v8819_v54 }
 0x3d4   :  { %6551 = vmatprep.mubr.f32.mxu1 %v8821_v55 }
 0x3d7   :  { %6552 = vmatmul.mubr.f32.gmra.mxu1 %v8825_v58 }
 0x3d8   :  { %6554 = vmatprep.mubr.f32.mxu1 %v8827_v60 }
 0x3db   :  { %6555 = vmatmul.mubr.f32.gmra.mxu1 %v8831_v63 }
 0x3dc   :  { %6557 = vmatprep.mubr.f32.mxu1 %v8833_v1 }
 0x3df   :  { %6558 = vmatmul.mubr.f32.gmra.mxu1 %v8837_v3 }
 0x3e0   :  { %6560 = vmatprep.mubr.f32.mxu1 %v8839_v6 }
 0x3e3   :  { %6561 = vmatmul.mubr.f32.gmra.mxu1 %v8843_v8 }
 0x3e4   :  { %6563 = vmatprep.mubr.f32.mxu1 %v8845_v10 }
 0x3e7   :  { %6564 = vmatmul.mubr.f32.gmra.mxu1 %v8849_v12 }
 0x3e8   :  { %6566 = vmatprep.mubr.f32.mxu1 %v8851_v14 }
 0x3eb   :  { %6567 = vmatmul.mubr.f32.gmra.mxu1 %v8855_v16 }
 0x3ec   :  { %6569 = vmatprep.mubr.f32.mxu1 %v8857_v5 }
 0x3ef   :  { %6570 = vmatmul.mubr.f32.gmra.mxu1 %v8861_v20 }
 0x3f0   :  { %6660 = vmatprep.mubr.f32.mxu1 %v8816_v30 }
 0x431   :  { %v8865_v28 = vpop.f32.mrf.mxu1 }
 0x433   :  { %v8867_v32 = vpop.f32.mrf.mxu1 }
 0x435   :  { %v8869_v34 = vpop.f32.mrf.mxu1 }
 0x437   :  { %v8871_v36 = vpop.f32.mrf.mxu1 }
 0x439   :  { %v8873_v24 = vpop.f32.mrf.mxu1 }
 0x43b   :  { %v8875_v38 = vpop.f32.mrf.mxu1 }
 0x43d   :  { %v8877_v40 = vpop.f32.mrf.mxu1 }
 0x43f   :  { %v8879_v42 = vpop.f32.mrf.mxu1 }
 0x441   :  { %v8881_v43 = vpop.f32.mrf.mxu1 }
 0x443   :  { %v8883_v44 = vpop.f32.mrf.mxu1 }
 0x445   :  { %v8885_v17 = vpop.f32.mrf.mxu1 }
 0x447   :  { %v8887_v19 = vpop.f32.mrf.mxu1 }
 0x449   :  { %v8889_v61 = vpop.f32.mrf.mxu1 }
 0x44b   :  { %v8891_v21 = vpop.f32.mrf.mxu1 }
 0x44d   :  { %v8893_v23 = vpop.f32.mrf.mxu1 }
 0x44f   :  { %v8895_v25 = vpop.f32.mrf.mxu1 }
 0x493   :  { %v6550_v27 = vpop.f32.mrf.mxu1 }
 0x495   :  { %v1435_v29 = vpop.f32.mrf.mxu1 }
 0x496   :  { %6604 = vmatprep.mubr.f32.mxu0 %v1435_v29 }
 0x497   :  { %v6553_v31 = vpop.f32.mrf.mxu1  ;;  %6605 = vmatmul.mubr.f32.vlgmr.msra.gmra.mxu0 %v6550_v27 }
 0x498   :  { %6685 = vmatpush3.msra.mxu0 %v1851_v56 }
 0x499   :  { %v1445_v33 = vpop.f32.mrf.mxu1  ;;  %6686 = vmatprep.subr.mxu0 %v1850_v57 }
 0x49a   :  { %6607 = vmatprep.mubr.f32.mxu0 %v1445_v33  ;;  %6687 = vmatpush3.msra.mxu0 %v1850_v57 }
 0x49b   :  { %v6556_v35 = vpop.f32.mrf.mxu1  ;;  %6608 = vmatmul.mubr.f32.gmra.mxu0 %v6553_v31  ;;  %6688 = vmatprep.subr.mxu0 %v1849_v59 }
 0x49c   :  { %6689 = vmatpush3.msra.mxu0 %v1849_v59 }
 0x49d   :  { %v1455_v37 = vpop.f32.mrf.mxu1  ;;  %6690 = vmatprep.subr.mxu0 %v1848_v62 }
 0x49e   :  { %6610 = vmatprep.mubr.f32.mxu0 %v1455_v37  ;;  %6691 = vmatpush3.msra.mxu0 %v1848_v62 }
 0x49f   :  { %v6559_v39 = vpop.f32.mrf.mxu1  ;;  %6611 = vmatmul.mubr.f32.gmra.mxu0 %v6556_v35  ;;  %6692 = vmatprep.subr.mxu0 %v1847_v0 }
 0x4a0   :  { %6693 = vmatpush3.msra.mxu0 %v1847_v0 }
 0x4a1   :  { %v1465_v41 = vpop.f32.mrf.mxu1  ;;  %6694 = vmatprep.subr.mxu0 %v1846_v2 }
 0x4a2   :  { %6613 = vmatprep.mubr.f32.mxu0 %v1465_v41  ;;  %6695 = vmatpush3.msra.mxu0 %v1846_v2 }
 0x4a3   :  { %v6562_v45 = vpop.f32.mrf.mxu1  ;;  %6614 = vmatmul.mubr.f32.gmra.mxu0 %v6559_v39  ;;  %6696 = vmatprep.subr.mxu0 %v1845_v4 }
 0x4a4   :  { %6697 = vmatpush3.msra.mxu0 %v1845_v4 }
 0x4a5   :  { %v1475_v46 = vpop.f32.mrf.mxu1  ;;  %6698 = vmatprep.subr.mxu0 %v1844_v7 }
 0x4a6   :  { %6616 = vmatprep.mubr.f32.mxu0 %v1475_v46  ;;  %6699 = vmatpush3.msra.mxu0 %v1844_v7 }
 0x4a7   :  { %v6565_v48 = vpop.f32.mrf.mxu1  ;;  %6617 = vmatmul.mubr.f32.gmra.mxu0 %v6562_v45  ;;  %6700 = vmatprep.subr.mxu0 %v1843_v9 }
 0x4a8   :  { %6701 = vmatpush3.msra.mxu0 %v1843_v9 }
 0x4a9   :  { %v1485_v49 = vpop.f32.mrf.mxu1  ;;  %6702 = vmatprep.subr.mxu0 %v1842_v11 }
 0x4aa   :  { %6619 = vmatprep.mubr.f32.mxu0 %v1485_v49  ;;  %6703 = vmatpush3.msra.mxu0 %v1842_v11 }
 0x4ab   :  { %v6568_v50 = vpop.f32.mrf.mxu1  ;;  %6620 = vmatmul.mubr.f32.gmra.mxu0 %v6565_v48  ;;  %6704 = vmatprep.subr.mxu0 %v1841_v13 }
 0x4ac   :  { %6705 = vmatpush3.msra.mxu0 %v1841_v13 }
 0x4ad   :  { %v1495_v51 = vpop.f32.mrf.mxu1  ;;  %6706 = vmatprep.subr.mxu0 %v1840_v15 }
 0x4ae   :  { %6622 = vmatprep.mubr.f32.mxu0 %v1495_v51  ;;  %6707 = vmatpush3.msra.mxu0 %v1840_v15 }
 0x4af   :  { %v6571_v52 = vpop.f32.mrf.mxu1  ;;  %6623 = vmatmul.mubr.f32.gmra.mxu0 %v6568_v50  ;;  %6708 = vmatprep.subr.mxu0 %v1839_v47 }
 0x4b0   :  { %6709 = vmatpush3.msra.mxu0 %v1839_v47 }
 0x4b1   :  { %v1505_v53 = vpop.f32.mrf.mxu1  ;;  %6710 = vmatprep.subr.mxu0 %v1838_v18 }
 0x4b2   :  { %6625 = vmatprep.mubr.f32.mxu0 %v1505_v53  ;;  %6711 = vmatpush3.msra.mxu0 %v1838_v18 }
 0x4b3   :  { %6626 = vmatmul.mubr.f32.gmra.mxu0 %v6571_v52 }
 0x557   :  { %v6606_v22 = vpop.f32.mrf.mxu0 }
 0x559   :  { %v1596_v26 = vpop.f32.mrf.mxu0 }
 0x55b   :  { %v6609_v27 = vpop.f32.mrf.mxu0 }
 0x55d   :  { %v1606_v29 = vpop.f32.mrf.mxu0 }
 0x55f   :  { %v6612_v31 = vpop.f32.mrf.mxu0 }
 0x561   :  { %v1616_v33 = vpop.f32.mrf.mxu0 }
 0x563   :  { %v6615_v35 = vpop.f32.mrf.mxu0 }
 0x565   :  { %v1626_v37 = vpop.f32.mrf.mxu0 }
 0x567   :  { %v6618_v39 = vpop.f32.mrf.mxu0 }
 0x569   :  { %v1636_v41 = vpop.f32.mrf.mxu0 }
 0x56b   :  { %v6621_v45 = vpop.f32.mrf.mxu0 }
 0x56d   :  { %v1646_v46 = vpop.f32.mrf.mxu0 }
 0x56f   :  { %v6624_v48 = vpop.f32.mrf.mxu0 }
 0x571   :  { %v1656_v49 = vpop.f32.mrf.mxu0 }
 0x573   :  { %v6627_v50 = vpop.f32.mrf.mxu0 }
 0x574   :  { %7720 = vtanh.f32 %v6627_v50 }
 0x575   :  { %v1666_v51 = vpop.f32.mrf.mxu0 }
 0x576   :  { %7722 = vtanh.f32 %v1666_v51 }
 0x577   :  { %7724 = vtanh.f32 %v6624_v48 }
 0x578   :  { %7726 = vtanh.f32 %v1656_v49 }
 0x579   :  { %7728 = vtanh.f32 %v6621_v45 }
 0x57a   :  { %7730 = vtanh.f32 %v1646_v46 }
 0x57b   :  { %7732 = vtanh.f32 %v6618_v39 }
 0x57c   :  { %7734 = vtanh.f32 %v1636_v41 }
 0x57d   :  { %7736 = vtanh.f32 %v6615_v35 }
 0x57e   :  { %7738 = vtanh.f32 %v1626_v37 }
 0x57f   :  { %7740 = vtanh.f32 %v6612_v31 }
 0x580   :  { %7742 = vtanh.f32 %v1616_v33 }
 0x581   :  { %v7721_v52 = vpop.eup %7720  ;;  %7744 = vtanh.f32 %v6609_v27 }
 0x582   :  { %6628 = vmatprep.subr.mxu1 %v7721_v52  ;;  %7746 = vtanh.f32 %v1606_v29 }
 0x583   :  { %v7723_v53 = vpop.eup %7722  ;;  %6629 = vmatpush3.msra.mxu1 %v7721_v52  ;;  %7748 = vtanh.f32 %v6606_v22  ;;  %v1837_v22 = vld [vmem:[#allocation22 + $0x8] sm:$0xff] }
 0x584   :  { %6630 = vmatprep.subr.mxu1 %v7723_v53  ;;  %v7725_v56 = vpop.eup %7724  ;;  %7750 = vtanh.f32 %v1596_v26  ;;  %6712 = vmatprep.subr.mxu0 %v1837_v22  ;;  %v1836_v26 = vld [vmem:[#allocation22] sm:$0xff] }
 0x585   :  { %6631 = vmatpush3.msra.mxu1 %v7723_v53  ;;  %v7727_v57 = vpop.eup %7726  ;;  %6713 = vmatpush3.msra.mxu0 %v1837_v22 }
 0x586   :  { %6632 = vmatprep.subr.mxu1 %v7725_v56  ;;  %v7729_v59 = vpop.eup %7728  ;;  %6714 = vmatprep.subr.mxu0 %v1836_v26 }
 0x587   :  { %6633 = vmatpush3.msra.mxu1 %v7725_v56  ;;  %v7731_v62 = vpop.eup %7730  ;;  %6715 = vmatpush3.msra.mxu0 %v1836_v26 }
 0x588   :  { %6634 = vmatprep.subr.mxu1 %v7727_v57  ;;  %v7733_v0 = vpop.eup %7732 }
 0x589   :  { %6635 = vmatpush3.msra.mxu1 %v7727_v57  ;;  %v7735_v2 = vpop.eup %7734 }
 0x58a   :  { %6636 = vmatprep.subr.mxu1 %v7729_v59  ;;  %v7737_v4 = vpop.eup %7736 }
 0x58b   :  { %6637 = vmatpush3.msra.mxu1 %v7729_v59  ;;  %v7739_v7 = vpop.eup %7738 }
 0x58c   :  { %6638 = vmatprep.subr.mxu1 %v7731_v62  ;;  %v7741_v9 = vpop.eup %7740 }
 0x58d   :  { %6639 = vmatpush3.msra.mxu1 %v7731_v62  ;;  %v7743_v11 = vpop.eup %7742 }
 0x58e   :  { %6640 = vmatprep.subr.mxu1 %v7733_v0  ;;  %v7745_v13 = vpop.eup %7744 }
 0x58f   :  { %6641 = vmatpush3.msra.mxu1 %v7733_v0  ;;  %v7747_v15 = vpop.eup %7746 }
 0x590   :  { %6642 = vmatprep.subr.mxu1 %v7735_v2  ;;  %v7749_v47 = vpop.eup %7748 }
 0x591   :  { %6643 = vmatpush3.msra.mxu1 %v7735_v2  ;;  %v7751_v18 = vpop.eup %7750 }
 0x592   :  { %6644 = vmatprep.subr.mxu1 %v7737_v4 }
 0x593   :  { %6645 = vmatpush3.msra.mxu1 %v7737_v4 }
 0x594   :  { %6646 = vmatprep.subr.mxu1 %v7739_v7 }
 0x595   :  { %6647 = vmatpush3.msra.mxu1 %v7739_v7 }
 0x596   :  { %6648 = vmatprep.subr.mxu1 %v7741_v9 }
 0x597   :  { %6649 = vmatpush3.msra.mxu1 %v7741_v9 }
 0x598   :  { %6650 = vmatprep.subr.mxu1 %v7743_v11 }
 0x599   :  { %6651 = vmatpush3.msra.mxu1 %v7743_v11 }
 0x59a   :  { %6652 = vmatprep.subr.mxu1 %v7745_v13 }
 0x59b   :  { %6653 = vmatpush3.msra.mxu1 %v7745_v13 }
 0x59c   :  { %6654 = vmatprep.subr.mxu1 %v7747_v15 }
 0x59d   :  { %6655 = vmatpush3.msra.mxu1 %v7747_v15 }
 0x59e   :  { %6656 = vmatprep.subr.mxu1 %v7749_v47 }
 0x59f   :  { %6657 = vmatpush3.msra.mxu1 %v7749_v47 }
 0x5a0   :  { %6658 = vmatprep.subr.mxu1 %v7751_v18 }
 0x5a1   :  { %6659 = vmatpush3.msra.mxu1 %v7751_v18 }
 0x5a2   :  { %6661 = vmatmul.mubr.f32.vlgmr.msra.gmra.mxu1 %v8819_v54 }
 0x5a3   :  { %6663 = vmatprep.mubr.f32.mxu1 %v8821_v55 }
 0x5a6   :  { %6664 = vmatmul.mubr.f32.gmra.mxu1 %v8825_v58 }
 0x5a7   :  { %6666 = vmatprep.mubr.f32.mxu1 %v8827_v60 }
 0x5aa   :  { %6667 = vmatmul.mubr.f32.gmra.mxu1 %v8831_v63 }
 0x5ab   :  { %6669 = vmatprep.mubr.f32.mxu1 %v8833_v1 }
 0x5ae   :  { %6670 = vmatmul.mubr.f32.gmra.mxu1 %v8837_v3 }
 0x5af   :  { %6672 = vmatprep.mubr.f32.mxu1 %v8839_v6 }
 0x5b2   :  { %6673 = vmatmul.mubr.f32.gmra.mxu1 %v8843_v8 }
 0x5b3   :  { %6675 = vmatprep.mubr.f32.mxu1 %v8845_v10 }
 0x5b6   :  { %6676 = vmatmul.mubr.f32.gmra.mxu1 %v8849_v12 }
 0x5b7   :  { %6678 = vmatprep.mubr.f32.mxu1 %v8851_v14 }
 0x5ba   :  { %6679 = vmatmul.mubr.f32.gmra.mxu1 %v8855_v16 }
 0x5bb   :  { %6681 = vmatprep.mubr.f32.mxu1 %v8857_v5 }
 0x5be   :  { %6682 = vmatmul.mubr.f32.gmra.mxu1 %v8861_v20 }
 0x5bf   :  { %6772 = vmatprep.mubr.f32.mxu1 %v8816_v30 }
 0x662   :  { %v6662_v27 = vpop.f32.mrf.mxu1 }
 0x664   :  { %v1757_v29 = vpop.f32.mrf.mxu1 }
 0x665   :  { %6716 = vmatprep.mubr.f32.mxu0 %v1757_v29 }
 0x666   :  { %v6665_v31 = vpop.f32.mrf.mxu1  ;;  %6717 = vmatmul.mubr.f32.vlgmr.msra.gmra.mxu0 %v6662_v27 }
 0x668   :  { %v1767_v33 = vpop.f32.mrf.mxu1 }
 0x669   :  { %6719 = vmatprep.mubr.f32.mxu0 %v1767_v33  ;;  %v8955_v33 = vld [vmem:[%s9660_s16] ss:$0 sm:$0xff] }
 0x66a   :  { %v6668_v35 = vpop.f32.mrf.mxu1  ;;  %6720 = vmatmul.mubr.f32.gmra.mxu0 %v6665_v31 }
 0x66c   :  { %v1777_v37 = vpop.f32.mrf.mxu1 }
 0x66d   :  { %6722 = vmatprep.mubr.f32.mxu0 %v1777_v37 }
 0x66e   :  { %v6671_v39 = vpop.f32.mrf.mxu1  ;;  %6723 = vmatmul.mubr.f32.gmra.mxu0 %v6668_v35  ;;  %v2414_v35 = vld [vmem:[#allocation5 + $0x78] sm:$0xff] }
 0x670   :  { %v1787_v41 = vpop.f32.mrf.mxu1 }
 0x671   :  { %6725 = vmatprep.mubr.f32.mxu0 %v1787_v41  ;;  %v2446_v41 = vsub.f32 1.0, %v2414_v35 }
 0x672   :  { %v6674_v45 = vpop.f32.mrf.mxu1  ;;  %6726 = vmatmul.mubr.f32.gmra.mxu0 %v6671_v39  ;;  %v1189_v39 = vadd.f32 %v8893_v23, %v8955_v33 }
 0x674   :  { %v1797_v46 = vpop.f32.mrf.mxu1 }
 0x675   :  { %6728 = vmatprep.mubr.f32.mxu0 %v1797_v46  ;;  %v2413_v46 = vld [vmem:[#allocation5 + $0x70] sm:$0xff] }
 0x676   :  { %v6677_v48 = vpop.f32.mrf.mxu1  ;;  %6729 = vmatmul.mubr.f32.gmra.mxu0 %v6674_v45  ;;  %v2412_v45 = vld [vmem:[#allocation5 + $0x68] sm:$0xff] }
 0x678   :  { %v1807_v49 = vpop.f32.mrf.mxu1 }
 0x679   :  { %6731 = vmatprep.mubr.f32.mxu0 %v1807_v49  ;;  %v2444_v49 = vsub.f32 1.0, %v2412_v45 }
 0x67a   :  { %v6680_v50 = vpop.f32.mrf.mxu1  ;;  %6732 = vmatmul.mubr.f32.gmra.mxu0 %v6677_v48 }
 0x67c   :  { %v1817_v51 = vpop.f32.mrf.mxu1 }
 0x67d   :  { %6734 = vmatprep.mubr.f32.mxu0 %v1817_v51  ;;  %v2445_v51 = vsub.f32 1.0, %v2413_v46 }
 0x67e   :  { %v6683_v52 = vpop.f32.mrf.mxu1  ;;  %6735 = vmatmul.mubr.f32.gmra.mxu0 %v6680_v50  ;;  %v1184_v50 = vadd.f32 %v8955_v33, %v8895_v25  ;;  %v2409_v25 = vld [vmem:[#allocation5 + $0x50] sm:$0xff] }
 0x680   :  { %v1827_v53 = vpop.f32.mrf.mxu1 }
 0x681   :  { %6737 = vmatprep.mubr.f32.mxu0 %v1827_v53 }
 0x682   :  { %6738 = vmatmul.mubr.f32.gmra.mxu0 %v6683_v52  ;;  %v2411_v52 = vld [vmem:[#allocation5 + $0x60] sm:$0xff] }
 0x726   :  { %v6718_v56 = vpop.f32.mrf.mxu0 }
 0x728   :  { %v1918_v57 = vpop.f32.mrf.mxu0 }
 0x72a   :  { %v6721_v59 = vpop.f32.mrf.mxu0 }
 0x72c   :  { %v1928_v62 = vpop.f32.mrf.mxu0 }
 0x72e   :  { %v6724_v0 = vpop.f32.mrf.mxu0 }
 0x730   :  { %v1938_v2 = vpop.f32.mrf.mxu0 }
 0x732   :  { %v6727_v4 = vpop.f32.mrf.mxu0 }
 0x734   :  { %v1948_v7 = vpop.f32.mrf.mxu0 }
 0x736   :  { %v6730_v9 = vpop.f32.mrf.mxu0 }
 0x738   :  { %v1958_v11 = vpop.f32.mrf.mxu0 }
 0x73a   :  { %v6733_v13 = vpop.f32.mrf.mxu0 }
 0x73c   :  { %v1968_v15 = vpop.f32.mrf.mxu0 }
 0x73e   :  { %v6736_v47 = vpop.f32.mrf.mxu0 }
 0x740   :  { %v1978_v18 = vpop.f32.mrf.mxu0 }
 0x742   :  { %v6739_v22 = vpop.f32.mrf.mxu0 }
 0x743   :  { %6740 = vmatprep.subr.mxu1 %v6739_v22 }
 0x744   :  { %v1988_v26 = vpop.f32.mrf.mxu0  ;;  %6741 = vmatpush3.msra.mxu1 %v6739_v22  ;;  %v2408_v22 = vld [vmem:[#allocation5 + $0x48] sm:$0xff] }
 0x745   :  { %6742 = vmatprep.subr.mxu1 %v1988_v26 }
 0x746   :  { %6743 = vmatpush3.msra.mxu1 %v1988_v26  ;;  %v1164_v26 = vadd.f32 %v8955_v33, %v8887_v19 }
 0x747   :  { %6744 = vmatprep.subr.mxu1 %v6736_v47 }
 0x748   :  { %6745 = vmatpush3.msra.mxu1 %v6736_v47 }
 0x749   :  { %6746 = vmatprep.subr.mxu1 %v1978_v18 }
 0x74a   :  { %6747 = vmatpush3.msra.mxu1 %v1978_v18 }
 0x74b   :  { %6748 = vmatprep.subr.mxu1 %v6733_v13 }
 0x74c   :  { %6749 = vmatpush3.msra.mxu1 %v6733_v13  ;;  %v2441_v13 = vsub.f32 1.0, %v2409_v25 }
 0x74d   :  { %6750 = vmatprep.subr.mxu1 %v1968_v15 }
 0x74e   :  { %6751 = vmatpush3.msra.mxu1 %v1968_v15  ;;  %v1169_v15 = vadd.f32 %v8885_v17, %v8955_v33 }
 0x74f   :  { %6752 = vmatprep.subr.mxu1 %v6730_v9 }
 0x750   :  { %6753 = vmatpush3.msra.mxu1 %v6730_v9 }
 0x751   :  { %6754 = vmatprep.subr.mxu1 %v1958_v11 }
 0x752   :  { %6755 = vmatpush3.msra.mxu1 %v1958_v11 }
 0x753   :  { %6756 = vmatprep.subr.mxu1 %v6727_v4 }
 0x754   :  { %6757 = vmatpush3.msra.mxu1 %v6727_v4 }
 0x755   :  { %6758 = vmatprep.subr.mxu1 %v1948_v7 }
 0x756   :  { %6759 = vmatpush3.msra.mxu1 %v1948_v7  ;;  %v2429_v7 = vmul.f32 %v2413_v46, %v1184_v50 }
 0x757   :  { %6760 = vmatprep.subr.mxu1 %v6724_v0 }
 0x758   :  { %6761 = vmatpush3.msra.mxu1 %v6724_v0 }
 0x759   :  { %6762 = vmatprep.subr.mxu1 %v1938_v2 }
 0x75a   :  { %6763 = vmatpush3.msra.mxu1 %v1938_v2  ;;  %v1174_v2 = vadd.f32 %v8955_v33, %v8891_v21 }
 0x75b   :  { %6764 = vmatprep.subr.mxu1 %v6721_v59 }
 0x75c   :  { %6765 = vmatpush3.msra.mxu1 %v6721_v59  ;;  %v2443_v59 = vsub.f32 1.0, %v2411_v52 }
 0x75d   :  { %6766 = vmatprep.subr.mxu1 %v1928_v62 }
 0x75e   :  { %6767 = vmatpush3.msra.mxu1 %v1928_v62  ;;  %v2430_v62 = vmul.f32 %v2414_v35, %v1189_v39  ;;  %v2440_v35 = vsub.f32 1.0, %v2408_v22  ;;  %v2407_v39 = vld [vmem:[#allocation5 + $0x40] sm:$0xff] }
 0x75f   :  { %6768 = vmatprep.subr.mxu1 %v6718_v56 }
 0x760   :  { %6769 = vmatpush3.msra.mxu1 %v6718_v56  ;;  %v2410_v56 = vld [vmem:[#allocation5 + $0x58] sm:$0xff] }
 0x761   :  { %6770 = vmatprep.subr.mxu1 %v1918_v57  ;;  %v2442_v0 = vsub.f32 1.0, %v2410_v56  ;;  %v2426_v50 = vmul.f32 %v2410_v56, %v1169_v15 }
 0x762   :  { %6771 = vmatpush3.msra.mxu1 %v1918_v57  ;;  %v1179_v57 = vadd.f32 %v8889_v61, %v8955_v33 }
 0x763   :  { %6773 = vmatmul.mubr.f32.vlgmr.msra.gmra.mxu1 %v8819_v54 }
 0x764   :  { %6775 = vmatprep.mubr.f32.mxu1 %v8821_v55  ;;  %v2428_v47 = vmul.f32 %v2412_v45, %v1179_v57  ;;  %v2439_v45 = vsub.f32 1.0, %v2407_v39  ;;  %v2406_v57 = vld [vmem:[#allocation5 + $0x38] sm:$0xff] }
 0x767   :  { %6776 = vmatmul.mubr.f32.gmra.mxu1 %v8825_v58 }
 0x768   :  { %6778 = vmatprep.mubr.f32.mxu1 %v8827_v60 }
 0x76b   :  { %6779 = vmatmul.mubr.f32.gmra.mxu1 %v8831_v63 }
 0x76c   :  { %6781 = vmatprep.mubr.f32.mxu1 %v8833_v1 }
 0x76f   :  { %6782 = vmatmul.mubr.f32.gmra.mxu1 %v8837_v3 }
 0x770   :  { %6784 = vmatprep.mubr.f32.mxu1 %v8839_v6 }
 0x773   :  { %6785 = vmatmul.mubr.f32.gmra.mxu1 %v8843_v8 }
 0x774   :  { %6787 = vmatprep.mubr.f32.mxu1 %v8845_v10 }
 0x777   :  { %6788 = vmatmul.mubr.f32.gmra.mxu1 %v8849_v12 }
 0x778   :  { %6790 = vmatprep.mubr.f32.mxu1 %v8851_v14 }
 0x77b   :  { %6791 = vmatmul.mubr.f32.gmra.mxu1 %v8855_v16 }
 0x77c   :  { %6793 = vmatprep.mubr.f32.mxu1 %v8857_v5 }
 0x77f   :  { %6794 = vmatmul.mubr.f32.gmra.mxu1 %v8861_v20 }
 0x780   :  { %6884 = vmatprep.mubr.f32.mxu1 %v8816_v30 }
 0x823   :  { %v8929_v54 = vpop.f32.mrf.mxu1 }
 0x825   :  { %v8931_v55 = vpop.f32.mrf.mxu1 }
 0x826   :  { %6828 = vmatprep.mubr.f32.mxu0 %v8931_v55 }
 0x827   :  { %v8934_v58 = vpop.f32.mrf.mxu1 }
 0x829   :  { %v8936_v60 = vpop.f32.mrf.mxu1 }
 0x82b   :  { %v8938_v63 = vpop.f32.mrf.mxu1 }
 0x82d   :  { %v8940_v1 = vpop.f32.mrf.mxu1 }
 0x82f   :  { %v8942_v3 = vpop.f32.mrf.mxu1 }
 0x831   :  { %v8944_v6 = vpop.f32.mrf.mxu1 }
 0x833   :  { %v8946_v27 = vpop.f32.mrf.mxu1 }
 0x835   :  { %v8948_v30 = vpop.f32.mrf.mxu1 }
 0x837   :  { %v8950_v29 = vpop.f32.mrf.mxu1 }
 0x838   :  { %v2458_v46 = vmul.f32 %v8950_v29, %v2442_v0  ;;  %v2456_v0 = vmul.f32 %v8946_v27, %v2440_v35  ;;  %v2402_v35 = vld [vmem:[#allocation5 + $0x18] sm:$0xff] }
 0x839   :  { %v8952_v31 = vpop.f32.mrf.mxu1 }
 0x83b   :  { %v8957_v37 = vpop.f32.mrf.mxu1 }
 0x83c   :  { %v2460_v9 = vmul.f32 %v8957_v37, %v2444_v49  ;;  %v1159_v49 = vadd.f32 %v8881_v43, %v8955_v33  ;;  %v2474_v43 = vadd.f32 %v2458_v46, %v2426_v50  ;;  %v2401_v46 = vld [vmem:[#allocation5 + $0x10] sm:$0xff]  ;;  %v1129_v50 = vadd.f32 %v8869_v34, %v8955_v33 }
 0x83d   :  { %v8961_v48 = vpop.f32.mrf.mxu1 }
 0x83e   :  { %v2459_v18 = vmul.f32 %v2443_v59, %v8961_v48  ;;  %v2476_v17 = vadd.f32 %v2460_v9, %v2428_v47  ;;  %v2438_v59 = vsub.f32 1.0, %v2406_v57  ;;  %v2455_v9 = vmul.f32 %v2439_v45, %v8948_v30 }
 0x83f   :  { %v8965_v53 = vpop.f32.mrf.mxu1 }
 0x840   :  { %v2462_v23 = vmul.f32 %v8965_v53, %v2446_v41  ;;  %6796 = vmatprep.subr.mxu0 %v8965_v53  ;;  %v2427_v41 = vmul.f32 %v2411_v52, %v1174_v2  ;;  %v1154_v52 = vadd.f32 %v8955_v33, %v8883_v44  ;;  %v1149_v2 = vadd.f32 %v8877_v40, %v8955_v33 }
 0x841   :  { %v8973_v4 = vpop.f32.mrf.mxu1  ;;  %6797 = vmatpush3.xpose.msra.mxu0 %v8965_v53  ;;  %v2454_v47 = vmul.f32 %v8942_v3, %v2438_v59 }
 0x842   :  { %6798 = vmatprep.subr.mxu0 %v8973_v4  ;;  %v2478_v61 = vadd.f32 %v2462_v23, %v2430_v62  ;;  %v2461_v11 = vmul.f32 %v2445_v51, %v8973_v4  ;;  %v2475_v19 = vadd.f32 %v2459_v18, %v2427_v41  ;;  %v2457_v51 = vmul.f32 %v2441_v13, %v8952_v31  ;;  %v2405_v62 = vld [vmem:[#allocation5 + $0x30] sm:$0xff]  ;;  %v2403_v13 = vld [vmem:[#allocation5 + $0x20] sm:$0xff] }
 0x843   :  { %v2425_v23 = vmul.f32 %v2409_v25, %v1164_v26  ;;  %v2437_v56 = vsub.f32 1.0, %v2405_v62  ;;  %v1144_v25 = vadd.f32 %v8955_v33, %v8879_v42  ;;  %v2423_v15 = vmul.f32 %v2407_v39, %v1154_v52 }
 0x844   :  { %6852 = vmatprep.subr.mxu1 %v2478_v61  ;;  %v2477_v21 = vadd.f32 %v2461_v11, %v2429_v7  ;;  %v2424_v7 = vmul.f32 %v2408_v22, %v1159_v49  ;;  %v1139_v18 = vadd.f32 %v8873_v24, %v8955_v33  ;;  %v2422_v22 = vmul.f32 %v2406_v57, %v1149_v2  ;;  %v2400_v57 = vld [vmem:[#allocation5 + $0x8] sm:$0xff] }
 0x845   :  { %6799 = vmatpush3.xpose.msra.mxu0 %v8973_v4  ;;  %6853 = vmatpush3.msra.mxu1 %v2478_v61  ;;  %v2473_v44 = vadd.f32 %v2457_v51, %v2425_v23  ;;  %v2404_v61 = vld [vmem:[#allocation5 + $0x28] sm:$0xff]  ;;  %v2471_v42 = vadd.f32 %v2455_v9, %v2423_v15  ;;  %v2453_v26 = vmul.f32 %v2437_v56, %v8944_v6  ;;  %v2434_v41 = vsub.f32 1.0, %v2402_v35 }
 0x846   :  { %6800 = vmatprep.subr.mxu0 %v8957_v37  ;;  %6854 = vmatprep.subr.mxu1 %v2477_v21  ;;  %v2436_v11 = vsub.f32 1.0, %v2404_v61  ;;  %v2472_v40 = vadd.f32 %v2456_v0, %v2424_v7  ;;  %v1134_v39 = vadd.f32 %v8955_v33, %v8875_v38  ;;  %v2470_v24 = vadd.f32 %v2454_v47, %v2422_v22  ;;  %v8040_v47 = vld [vmem:[#allocation3 + $0x8] sm:$0xff] }
 0x847   :  { %6855 = vmatpush3.msra.mxu1 %v2477_v21  ;;  %v2435_v21 = vsub.f32 1.0, %v2403_v13  ;;  %v2433_v49 = vsub.f32 1.0, %v2401_v46  ;;  %v1124_v52 = vadd.f32 %v8955_v33, %v8871_v36  ;;  %v2432_v59 = vsub.f32 1.0, %v2400_v57  ;;  %v8044_v22 = vld [vmem:[#allocation3 + $0x28] sm:$0xff] }
 0x848   :  { %6856 = vmatprep.subr.mxu1 %v2476_v17  ;;  %v2452_v45 = vmul.f32 %v8938_v63, %v2436_v11  ;;  %v2419_v23 = vmul.f32 %v2403_v13, %v1134_v39  ;;  %v2450_v0 = vmul.f32 %v8934_v58, %v2434_v41  ;;  %v1119_v56 = vadd.f32 %v8865_v28, %v8955_v33 }
 0x849   :  { %6801 = vmatpush3.xpose.msra.mxu0 %v8957_v37  ;;  %6857 = vmatpush3.msra.mxu1 %v2476_v17  ;;  %v2421_v17 = vmul.f32 %v2405_v62, %v1144_v25  ;;  %v2451_v51 = vmul.f32 %v2435_v21, %v8940_v1  ;;  %v2399_v62 = vld [vmem:[#allocation5] sm:$0xff]  ;;  %v2418_v2 = vmul.f32 %v2402_v35, %v1129_v50  ;;  %v8042_v21 = vld [vmem:[#allocation3 + $0x18] sm:$0xff] }
 0x84a   :  { %6802 = vmatprep.subr.mxu0 %v8961_v48  ;;  %6858 = vmatprep.subr.mxu1 %v2475_v19  ;;  %v2449_v7 = vmul.f32 %v2433_v49, %v8936_v60  ;;  %v2417_v9 = vmul.f32 %v2401_v46, %v1124_v52  ;;  %v2416_v28 = vmul.f32 %v2400_v57, %v1119_v56  ;;  %v8047_v35 = vld [vmem:[#allocation3 + $0x40] sm:$0xff] }
 0x84b   :  { %6859 = vmatpush3.msra.mxu1 %v2475_v19  ;;  %v2420_v19 = vmul.f32 %v2404_v61, %v1139_v18  ;;  %v2469_v38 = vadd.f32 %v2453_v26, %v2421_v17  ;;  %v2467_v36 = vadd.f32 %v2451_v51, %v2419_v23  ;;  %v2448_v61 = vmul.f32 %v8929_v54, %v2432_v59  ;;  %v8043_v18 = vld [vmem:[#allocation3 + $0x20] sm:$0xff]  ;;  %v8046_v26 = vld [vmem:[#allocation3 + $0x38] sm:$0xff] }
 0x84c   :  { %6860 = vmatprep.subr.mxu1 %v2474_v43  ;;  %v2466_v25 = vadd.f32 %v2450_v0, %v2418_v2  ;;  %v2465_v11 = vadd.f32 %v2449_v7, %v2417_v9 }
 0x84d   :  { %6803 = vmatpush3.xpose.msra.mxu0 %v8961_v48  ;;  %6861 = vmatpush3.msra.mxu1 %v2474_v43  ;;  %v2468_v34 = vadd.f32 %v2452_v45, %v2420_v19  ;;  %v2431_v43 = vsub.f32 1.0, %v2399_v62 }
 0x84e   :  { %6804 = vmatprep.subr.mxu0 %v8950_v29  ;;  %6862 = vmatprep.subr.mxu1 %v2473_v44 }
 0x84f   :  { %6863 = vmatpush3.msra.mxu1 %v2473_v44  ;;  %v1114_v44 = vadd.f32 %v8955_v33, %v8867_v32  ;;  %v2447_v13 = vmul.f32 %v2431_v43, %v8931_v55  ;;  %v2464_v33 = vadd.f32 %v2448_v61, %v2416_v28 }
 0x850   :  { %6864 = vmatprep.subr.mxu1 %v2472_v40 }
 0x851   :  { %6805 = vmatpush3.xpose.msra.mxu0 %v8950_v29  ;;  %6865 = vmatpush3.msra.mxu1 %v2472_v40  ;;  %v2415_v32 = vmul.f32 %v2399_v62, %v1114_v44  ;;  %v8041_v40 = vld [vmem:[#allocation3 + $0x10] sm:$0xff] }
 0x852   :  { %6806 = vmatprep.subr.mxu0 %v8952_v31  ;;  %6866 = vmatprep.subr.mxu1 %v2471_v42 }
 0x853   :  { %6867 = vmatpush3.msra.mxu1 %v2471_v42  ;;  %v2463_v15 = vadd.f32 %v2447_v13, %v2415_v32  ;;  %v8045_v42 = vld [vmem:[#allocation3 + $0x30] sm:$0xff] }
 0x854   :  { %6868 = vmatprep.subr.mxu1 %v2470_v24 }
 0x855   :  { %6807 = vmatpush3.xpose.msra.mxu0 %v8952_v31  ;;  %6869 = vmatpush3.msra.mxu1 %v2470_v24 }
 0x856   :  { %6808 = vmatprep.subr.mxu0 %v8946_v27  ;;  %6870 = vmatprep.subr.mxu1 %v2469_v38 }
 0x857   :  { %6871 = vmatpush3.msra.mxu1 %v2469_v38 }
 0x858   :  { %6872 = vmatprep.subr.mxu1 %v2468_v34 }
 0x859   :  { %6809 = vmatpush3.xpose.msra.mxu0 %v8946_v27  ;;  %6873 = vmatpush3.msra.mxu1 %v2468_v34 }
 0x85a   :  { %6810 = vmatprep.subr.mxu0 %v8948_v30  ;;  %6874 = vmatprep.subr.mxu1 %v2467_v36 }
 0x85b   :  { %6875 = vmatpush3.msra.mxu1 %v2467_v36 }
 0x85c   :  { %6876 = vmatprep.subr.mxu1 %v2466_v25 }
 0x85d   :  { %6811 = vmatpush3.xpose.msra.mxu0 %v8948_v30  ;;  %6877 = vmatpush3.msra.mxu1 %v2466_v25 }
 0x85e   :  { %6812 = vmatprep.subr.mxu0 %v8942_v3  ;;  %6878 = vmatprep.subr.mxu1 %v2465_v11 }
 0x85f   :  { %6879 = vmatpush3.msra.mxu1 %v2465_v11 }
 0x860   :  { %6880 = vmatprep.subr.mxu1 %v2464_v33 }
 0x861   :  { %6813 = vmatpush3.xpose.msra.mxu0 %v8942_v3  ;;  %6881 = vmatpush3.msra.mxu1 %v2464_v33 }
 0x862   :  { %6814 = vmatprep.subr.mxu0 %v8944_v6  ;;  %6882 = vmatprep.subr.mxu1 %v2463_v15 }
 0x863   :  { %6883 = vmatpush3.msra.mxu1 %v2463_v15 }
 0x864   :  { %6885 = vmatmul.mubr.f32.vlgmr.msra.gmra.mxu1 %v8040_v47 }
 0x865   :  { %6815 = vmatpush3.xpose.msra.mxu0 %v8944_v6  ;;  %6887 = vmatprep.mubr.f32.mxu1 %v8041_v40 }
 0x866   :  { %6816 = vmatprep.subr.mxu0 %v8938_v63 }
 0x868   :  { %6888 = vmatmul.mubr.f32.gmra.mxu1 %v8042_v21 }
 0x869   :  { %6817 = vmatpush3.xpose.msra.mxu0 %v8938_v63  ;;  %6890 = vmatprep.mubr.f32.mxu1 %v8043_v18 }
 0x86a   :  { %6818 = vmatprep.subr.mxu0 %v8940_v1 }
 0x86c   :  { %6891 = vmatmul.mubr.f32.gmra.mxu1 %v8044_v22 }
 0x86d   :  { %6819 = vmatpush3.xpose.msra.mxu0 %v8940_v1  ;;  %6893 = vmatprep.mubr.f32.mxu1 %v8045_v42 }
 0x86e   :  { %6820 = vmatprep.subr.mxu0 %v8934_v58 }
 0x870   :  { %6894 = vmatmul.mubr.f32.gmra.mxu1 %v8046_v26 }
 0x871   :  { %6821 = vmatpush3.xpose.msra.mxu0 %v8934_v58  ;;  %6896 = vmatprep.mubr.f32.mxu1 %v8047_v35 }
 0x872   :  { %6822 = vmatprep.subr.mxu0 %v8936_v60 }
 0x874   :  { %6897 = vmatmul.mubr.f32.gmra.mxu1 %v8843_v8 }
 0x875   :  { %6823 = vmatpush3.xpose.msra.mxu0 %v8936_v60  ;;  %6899 = vmatprep.mubr.f32.mxu1 %v8845_v10 }
 0x876   :  { %6824 = vmatprep.subr.mxu0 %v8929_v54 }
 0x878   :  { %6900 = vmatmul.mubr.f32.gmra.mxu1 %v8849_v12 }
 0x879   :  { %6825 = vmatpush3.xpose.msra.mxu0 %v8929_v54  ;;  %6902 = vmatprep.mubr.f32.mxu1 %v8851_v14 }
 0x87a   :  { %6826 = vmatprep.subr.mxu0 %v8931_v55 }
 0x87c   :  { %6903 = vmatmul.mubr.f32.gmra.mxu1 %v8855_v16 }
 0x87d   :  { %6827 = vmatpush3.xpose.msra.mxu0 %v8931_v55  ;;  %6905 = vmatprep.mubr.f32.mxu1 %v8857_v5 }
 0x880   :  { %6829 = vmatmul.mubr.f32.vlgmr.msra.gmra.mxu0 %v8929_v54  ;;  %6906 = vmatmul.mubr.f32.gmra.mxu1 %v8861_v20 }
 0x881   :  { %6831 = vmatprep.mubr.f32.mxu0 %v8936_v60 }
 0x884   :  { %6832 = vmatmul.mubr.f32.gmra.mxu0 %v8934_v58 }
 0x885   :  { %6834 = vmatprep.mubr.f32.mxu0 %v8940_v1 }
 0x888   :  { %6835 = vmatmul.mubr.f32.gmra.mxu0 %v8938_v63 }
 0x889   :  { %6837 = vmatprep.mubr.f32.mxu0 %v8944_v6 }
 0x88c   :  { %6838 = vmatmul.mubr.f32.gmra.mxu0 %v8942_v3 }
 0x88d   :  { %6840 = vmatprep.mubr.f32.mxu0 %v8948_v30 }
 0x890   :  { %6841 = vmatmul.mubr.f32.gmra.mxu0 %v8946_v27 }
 0x891   :  { %6843 = vmatprep.mubr.f32.mxu0 %v8952_v31 }
 0x894   :  { %6844 = vmatmul.mubr.f32.gmra.mxu0 %v8950_v29 }
 0x895   :  { %6846 = vmatprep.mubr.f32.mxu0 %v8961_v48 }
 0x898   :  { %6847 = vmatmul.mubr.f32.gmra.mxu0 %v8957_v37 }
 0x899   :  { %6849 = vmatprep.mubr.f32.mxu0 %v8973_v4 }
 0x89c   :  { %6850 = vmatmul.mubr.f32.gmra.mxu0 %v8965_v53 }
 0x924   :  { %v9067_v8 = vpop.f32.mrf.mxu1 }
 0x926   :  { %v9069_v10 = vpop.f32.mrf.mxu1 }
 0x927   :  { %6940 = vmatprep.mubr.f32.mxu1 %v9069_v10 }
 0x928   :  { %v9072_v12 = vpop.f32.mrf.mxu1 }
 0x92a   :  { %v9074_v14 = vpop.f32.mrf.mxu1 }
 0x92c   :  { %v9076_v16 = vpop.f32.mrf.mxu1 }
 0x92e   :  { %v9078_v5 = vpop.f32.mrf.mxu1 }
 0x930   :  { %v9080_v20 = vpop.f32.mrf.mxu1 }
 0x932   :  { %v9082_v54 = vpop.f32.mrf.mxu1 }
 0x934   :  { %v9084_v55 = vpop.f32.mrf.mxu1 }
 0x936   :  { %v9086_v58 = vpop.f32.mrf.mxu1 }
 0x938   :  { %v9088_v60 = vpop.f32.mrf.mxu1 }
 0x93a   :  { %v9090_v63 = vpop.f32.mrf.mxu1 }
 0x93c   :  { %v9092_v1 = vpop.f32.mrf.mxu1 }
 0x93e   :  { %v9094_v3 = vpop.f32.mrf.mxu1 }
 0x940   :  { %v6830_v6 = vpop.f32.mrf.mxu0  ;;  %v9096_v27 = vpop.f32.mrf.mxu1 }
 0x941   :  { %v5399_v30 = vmul.f32 -1.442695, %v6830_v6  ;;  %6908 = vmatprep.subr.mxu1 %v9096_v27  ;;  %6964 = vmatprep.subr.mxu0 %v9096_v27 }
 0x942   :  { %v2208_v29 = vpop.f32.mrf.mxu0  ;;  %v9100_v31 = vpop.f32.mrf.mxu1  ;;  %6909 = vmatpush3.xpose.msra.mxu1 %v9096_v27  ;;  %6965 = vmatpush3.msra.mxu0 %v9096_v27 }
 0x943   :  { %7752 = vpow2.f32 %v5399_v30  ;;  %v5398_v37 = vmul.f32 -1.442695, %v2208_v29  ;;  %6910 = vmatprep.subr.mxu1 %v9100_v31  ;;  %6966 = vmatprep.subr.mxu0 %v9100_v31 }
 0x944   :  { %v6833_v48 = vpop.f32.mrf.mxu0  ;;  %6967 = vmatpush3.msra.mxu0 %v9100_v31 }
 0x945   :  { %7754 = vpow2.f32 %v5398_v37  ;;  %v5401_v53 = vmul.f32 -1.442695, %v6833_v48  ;;  %6968 = vmatprep.subr.mxu0 %v9092_v1 }
 0x946   :  { %v2218_v4 = vpop.f32.mrf.mxu0  ;;  %6911 = vmatpush3.xpose.msra.mxu1 %v9100_v31  ;;  %6969 = vmatpush3.msra.mxu0 %v9092_v1 }
 0x947   :  { %7756 = vpow2.f32 %v5401_v53  ;;  %v5400_v39 = vmul.f32 -1.442695, %v2218_v4  ;;  %6912 = vmatprep.subr.mxu1 %v9092_v1  ;;  %6970 = vmatprep.subr.mxu0 %v9094_v3 }
 0x948   :  { %v6836_v41 = vpop.f32.mrf.mxu0  ;;  %6971 = vmatpush3.msra.mxu0 %v9094_v3 }
 0x949   :  { %7758 = vpow2.f32 %v5400_v39  ;;  %v5403_v46 = vmul.f32 -1.442695, %v6836_v41  ;;  %6972 = vmatprep.subr.mxu0 %v9088_v60 }
 0x94a   :  { %v2228_v17 = vpop.f32.mrf.mxu0  ;;  %6913 = vmatpush3.xpose.msra.mxu1 %v9092_v1  ;;  %6973 = vmatpush3.msra.mxu0 %v9088_v60 }
 0x94b   :  { %7760 = vpow2.f32 %v5403_v46  ;;  %v5402_v45 = vmul.f32 -1.442695, %v2228_v17  ;;  %6914 = vmatprep.subr.mxu1 %v9094_v3  ;;  %6974 = vmatprep.subr.mxu0 %v9090_v63 }
 0x94c   :  { %v6839_v24 = vpop.f32.mrf.mxu0  ;;  %6975 = vmatpush3.msra.mxu0 %v9090_v63 }
 0x94d   :  { %7762 = vpow2.f32 %v5402_v45  ;;  %v5405_v49 = vmul.f32 -1.442695, %v6839_v24  ;;  %6976 = vmatprep.subr.mxu0 %v9084_v55 }
 0x94e   :  { %v2238_v50 = vpop.f32.mrf.mxu0  ;;  %6915 = vmatpush3.xpose.msra.mxu1 %v9094_v3  ;;  %6977 = vmatpush3.msra.mxu0 %v9084_v55 }
 0x94f   :  { %7764 = vpow2.f32 %v5405_v49  ;;  %v5404_v19 = vmul.f32 -1.442695, %v2238_v50  ;;  %6916 = vmatprep.subr.mxu1 %v9088_v60  ;;  %6978 = vmatprep.subr.mxu0 %v9086_v58 }
 0x950   :  { %v7753_v38 = vpop.eup %7752  ;;  %v6842_v51 = vpop.f32.mrf.mxu0  ;;  %6979 = vmatpush3.msra.mxu0 %v9086_v58 }
 0x951   :  { %v2336_v57 = vadd.f32 1.0, %v7753_v38  ;;  %7766 = vpow2.f32 %v5404_v19  ;;  %v5407_v52 = vmul.f32 -1.442695, %v6842_v51  ;;  %6980 = vmatprep.subr.mxu0 %v9080_v20 }
 0x952   :  { %v7755_v59 = vpop.eup %7754  ;;  %v2248_v62 = vpop.f32.mrf.mxu0  ;;  %6917 = vmatpush3.xpose.msra.mxu1 %v9088_v60  ;;  %6981 = vmatpush3.msra.mxu0 %v9080_v20 }
 0x953   :  { %7768 = vrcp.f32 %v2336_v57  ;;  %v2335_v23 = vadd.f32 1.0, %v7755_v59  ;;  %v5406_v0 = vmul.f32 -1.442695, %v2248_v62  ;;  %6918 = vmatprep.subr.mxu1 %v9090_v63  ;;  %6982 = vmatprep.subr.mxu0 %v9082_v54 }
 0x954   :  { %v7757_v34 = vpop.eup %7756  ;;  %7770 = vpow2.f32 %v5407_v52  ;;  %v6845_v43 = vpop.f32.mrf.mxu0  ;;  %6983 = vmatpush3.msra.mxu0 %v9082_v54 }
 0x955   :  { %7772 = vrcp.f32 %v2335_v23  ;;  %v2338_v56 = vadd.f32 1.0, %v7757_v34  ;;  %v5409_v2 = vmul.f32 -1.442695, %v6845_v43  ;;  %6984 = vmatprep.subr.mxu0 %v9076_v16 }
 0x956   :  { %v7759_v36 = vpop.eup %7758  ;;  %7774 = vpow2.f32 %v5406_v0  ;;  %v2258_v7 = vpop.f32.mrf.mxu0  ;;  %6919 = vmatpush3.xpose.msra.mxu1 %v9090_v63  ;;  %6985 = vmatpush3.msra.mxu0 %v9076_v16 }
 0x957   :  { %7776 = vrcp.f32 %v2338_v56  ;;  %v2337_v44 = vadd.f32 1.0, %v7759_v36  ;;  %v5408_v9 = vmul.f32 -1.442695, %v2258_v7  ;;  %6920 = vmatprep.subr.mxu1 %v9084_v55  ;;  %6986 = vmatprep.subr.mxu0 %v9078_v5 }
 0x958   :  { %v7761_v61 = vpop.eup %7760  ;;  %7778 = vpow2.f32 %v5409_v2  ;;  %v6848_v25 = vpop.f32.mrf.mxu0  ;;  %6987 = vmatpush3.msra.mxu0 %v9078_v5 }
 0x959   :  { %7780 = vrcp.f32 %v2337_v44  ;;  %v2340_v28 = vadd.f32 1.0, %v7761_v61  ;;  %v5411_v11 = vmul.f32 -1.442695, %v6848_v25  ;;  %6988 = vmatprep.subr.mxu0 %v9072_v12  ;;  %v5414_v25 = vld [vmem:[%s9661_s21] ss:$0 sm:$0xff] }
 0x95a   :  { %v7763_v13 = vpop.eup %7762  ;;  %7782 = vpow2.f32 %v5408_v9  ;;  %v2268_v32 = vpop.f32.mrf.mxu0  ;;  %6921 = vmatpush3.xpose.msra.mxu1 %v9084_v55  ;;  %6989 = vmatpush3.msra.mxu0 %v9072_v12 }
 0x95b   :  { %7784 = vrcp.f32 %v2340_v28  ;;  %v2339_v33 = vadd.f32 1.0, %v7763_v13  ;;  %v5410_v15 = vmul.f32 -1.442695, %v2268_v32  ;;  %6922 = vmatprep.subr.mxu1 %v9086_v58  ;;  %6990 = vmatprep.subr.mxu0 %v9074_v14 }
 0x95c   :  { %v7765_v47 = vpop.eup %7764  ;;  %7786 = vpow2.f32 %v5411_v11  ;;  %v6851_v40 = vpop.f32.mrf.mxu0  ;;  %6991 = vmatpush3.msra.mxu0 %v9074_v14 }
 0x95d   :  { %7788 = vrcp.f32 %v2339_v33  ;;  %v2342_v21 = vadd.f32 1.0, %v7765_v47  ;;  %v5413_v18 = vmul.f32 -1.442695, %v6851_v40  ;;  %6992 = vmatprep.subr.mxu0 %v9067_v8 }
 0x95e   :  { %v7767_v22 = vpop.eup %7766  ;;  %7790 = vpow2.f32 %v5410_v15  ;;  %v2278_v42 = vpop.f32.mrf.mxu0  ;;  %6923 = vmatpush3.xpose.msra.mxu1 %v9086_v58  ;;  %6993 = vmatpush3.msra.mxu0 %v9067_v8 }
 0x95f   :  { %7792 = vrcp.f32 %v2342_v21  ;;  %v2341_v26 = vadd.f32 1.0, %v7767_v22  ;;  %v5412_v35 = vmul.f32 -1.442695, %v2278_v42  ;;  %6924 = vmatprep.subr.mxu1 %v9080_v20  ;;  %6994 = vmatprep.subr.mxu0 %v9069_v10 }
 0x960   :  { %v7769_v6 = vpop.eup %7768  ;;  %7794 = vpow2.f32 %v5413_v18  ;;  %6995 = vmatpush3.msra.mxu0 %v9069_v10 }
 0x961   :  { %v7771_v30 = vpop.eup %7770  ;;  %2384 = vst [vmem:[%s8603_s5 + $0x8] sm:$0xff] %v7769_v6  ;;  %7796 = vrcp.f32 %v2341_v26 }
 0x962   :  { %v7773_v29 = vpop.eup %7772  ;;  %v2344_v37 = vadd.f32 1.0, %v7771_v30  ;;  %7798 = vpow2.f32 %v5412_v35  ;;  %6925 = vmatpush3.xpose.msra.mxu1 %v9080_v20 }
 0x963   :  { %v7775_v48 = vpop.eup %7774  ;;  %2383 = vst [vmem:[%s8603_s5] sm:$0xff] %v7773_v29  ;;  %6926 = vmatprep.subr.mxu1 %v9082_v54 }
 0x964   :  { %v7777_v53 = vpop.eup %7776  ;;  %7800 = vrcp.f32 %v2344_v37  ;;  %v2343_v4 = vadd.f32 1.0, %v7775_v48 }
 0x965   :  { %v7779_v39 = vpop.eup %7778  ;;  %2386 = vst [vmem:[%s8603_s5 + $0x18] sm:$0xff] %v7777_v53 }
 0x966   :  { %v7781_v41 = vpop.eup %7780  ;;  %7802 = vrcp.f32 %v2343_v4  ;;  %v2346_v46 = vadd.f32 1.0, %v7779_v39  ;;  %6927 = vmatpush3.xpose.msra.mxu1 %v9082_v54 }
 0x967   :  { %v7783_v17 = vpop.eup %7782  ;;  %2385 = vst [vmem:[%s8603_s5 + $0x10] sm:$0xff] %v7781_v41  ;;  %6928 = vmatprep.subr.mxu1 %v9076_v16 }
 0x968   :  { %v7785_v45 = vpop.eup %7784  ;;  %7804 = vrcp.f32 %v2346_v46  ;;  %v2345_v24 = vadd.f32 1.0, %v7783_v17 }
 0x969   :  { %v7787_v49 = vpop.eup %7786  ;;  %2388 = vst [vmem:[%s8603_s5 + $0x28] sm:$0xff] %v7785_v45 }
 0x96a   :  { %v7789_v50 = vpop.eup %7788  ;;  %7806 = vrcp.f32 %v2345_v24  ;;  %v2348_v19 = vadd.f32 1.0, %v7787_v49  ;;  %6929 = vmatpush3.xpose.msra.mxu1 %v9076_v16 }
 0x96b   :  { %v7791_v38 = vpop.eup %7790  ;;  %2387 = vst [vmem:[%s8603_s5 + $0x20] sm:$0xff] %v7789_v50  ;;  %6930 = vmatprep.subr.mxu1 %v9078_v5 }
 0x96c   :  { %v7793_v51 = vpop.eup %7792  ;;  %7808 = vrcp.f32 %v2348_v19  ;;  %v2347_v57 = vadd.f32 1.0, %v7791_v38 }
 0x96d   :  { %v7795_v52 = vpop.eup %7794  ;;  %2390 = vst [vmem:[%s8603_s5 + $0x38] sm:$0xff] %v7793_v51 }
 0x96e   :  { %v7797_v59 = vpop.eup %7796  ;;  %7810 = vrcp.f32 %v2347_v57  ;;  %v2350_v62 = vadd.f32 1.0, %v7795_v52  ;;  %6931 = vmatpush3.xpose.msra.mxu1 %v9078_v5 }
 0x96f   :  { %v7799_v23 = vpop.eup %7798  ;;  %2389 = vst [vmem:[%s8603_s5 + $0x30] sm:$0xff] %v7797_v59  ;;  %6932 = vmatprep.subr.mxu1 %v9072_v12 }
 0x970   :  { %7812 = vrcp.f32 %v2350_v62  ;;  %v2349_v0 = vadd.f32 1.0, %v7799_v23 }
 0x971   :  { %v7801_v34 = vpop.eup %7800 }
 0x972   :  { %2392 = vst [vmem:[%s8603_s5 + $0x48] sm:$0xff] %v7801_v34  ;;  %7814 = vrcp.f32 %v2349_v0  ;;  %6933 = vmatpush3.xpose.msra.mxu1 %v9072_v12 }
 0x973   :  { %v7803_v43 = vpop.eup %7802  ;;  %6934 = vmatprep.subr.mxu1 %v9074_v14 }
 0x974   :  { %2391 = vst [vmem:[%s8603_s5 + $0x40] sm:$0xff] %v7803_v43 }
 0x975   :  { %v7805_v56 = vpop.eup %7804 }
 0x976   :  { %2394 = vst [vmem:[%s8603_s5 + $0x58] sm:$0xff] %v7805_v56  ;;  %6935 = vmatpush3.xpose.msra.mxu1 %v9074_v14 }
 0x977   :  { %v7807_v2 = vpop.eup %7806  ;;  %6936 = vmatprep.subr.mxu1 %v9067_v8 }
 0x978   :  { %2393 = vst [vmem:[%s8603_s5 + $0x50] sm:$0xff] %v7807_v2 }
 0x979   :  { %v7809_v36 = vpop.eup %7808 }
 0x97a   :  { %2396 = vst [vmem:[%s8603_s5 + $0x68] sm:$0xff] %v7809_v36  ;;  %6937 = vmatpush3.xpose.msra.mxu1 %v9067_v8 }
 0x97b   :  { %v7811_v7 = vpop.eup %7810  ;;  %6938 = vmatprep.subr.mxu1 %v9069_v10 }
 0x97c   :  { %2395 = vst [vmem:[%s8603_s5 + $0x60] sm:$0xff] %v7811_v7 }
 0x97d   :  { %v7813_v44 = vpop.eup %7812 }
 0x97e   :  { %2398 = vst [vmem:[%s8603_s5 + $0x78] sm:$0xff] %v7813_v44  ;;  %6939 = vmatpush3.xpose.msra.mxu1 %v9069_v10 }
 0x97f   :  { %v7815_v9 = vpop.eup %7814 }
 0x980   :  { %2397 = vst [vmem:[%s8603_s5 + $0x70] sm:$0xff] %v7815_v9 }
 0x981   :  { %6941 = vmatmul.mubr.f32.vlgmr.msra.gmra.mxu1 %v9067_v8 }
 0x982   :  { %6943 = vmatprep.mubr.f32.mxu1 %v9074_v14 }
 0x985   :  { %6944 = vmatmul.mubr.f32.gmra.mxu1 %v9072_v12 }
 0x986   :  { %6946 = vmatprep.mubr.f32.mxu1 %v9078_v5 }
 0x989   :  { %6947 = vmatmul.mubr.f32.gmra.mxu1 %v9076_v16 }
 0x98a   :  { %6949 = vmatprep.mubr.f32.mxu1 %v9082_v54 }
 0x98d   :  { %6950 = vmatmul.mubr.f32.gmra.mxu1 %v9080_v20 }
 0x98e   :  { %6952 = vmatprep.mubr.f32.mxu1 %v9086_v58 }
 0x991   :  { %6953 = vmatmul.mubr.f32.gmra.mxu1 %v9084_v55 }
 0x992   :  { %6955 = vmatprep.mubr.f32.mxu1 %v9090_v63 }
 0x995   :  { %6956 = vmatmul.mubr.f32.gmra.mxu1 %v9088_v60 }
 0x996   :  { %6958 = vmatprep.mubr.f32.mxu1 %v9094_v3 }
 0x999   :  { %6959 = vmatmul.mubr.f32.gmra.mxu1 %v9092_v1 }
 0x99a   :  { %6961 = vmatprep.mubr.f32.mxu1 %v9100_v31 }
 0x99d   :  { %6962 = vmatmul.mubr.f32.gmra.mxu1 %v9096_v27 }
 0xa41   :  { %v6942_v61 = vpop.f32.mrf.mxu1 }
 0xa42   :  { %v2703_v33 = vadd.f32 %v6942_v61, %v5414_v25 }
 0xa43   :  { %v2697_v28 = vpop.f32.mrf.mxu1 }
 0xa44   :  { %v2698_v11 = vadd.f32 %v5414_v25, %v2697_v28 }
 0xa45   :  { %v6945_v13 = vpop.f32.mrf.mxu1 }
 0xa46   :  { %2776 = vmax.xlane.f32.xlu0 %v2698_v11  ;;  %v2713_v21 = vadd.f32 %v6945_v13, %v5414_v25 }
 0xa47   :  { %v2707_v32 = vpop.f32.mrf.mxu1 }
 0xa48   :  { %v2708_v15 = vadd.f32 %v5414_v25, %v2707_v32 }
 0xa49   :  { %v6948_v47 = vpop.f32.mrf.mxu1 }
 0xa4a   :  { %2780 = vmax.xlane.f32.xlu1 %v2708_v15  ;;  %2778 = vmax.xlane.f32.xlu0 %v2703_v33  ;;  %v2723_v26 = vadd.f32 %v6948_v47, %v5414_v25 }
 0xa4b   :  { %v2717_v40 = vpop.f32.mrf.mxu1 }
 0xa4c   :  { %v2718_v18 = vadd.f32 %v5414_v25, %v2717_v40 }
 0xa4d   :  { %v6951_v22 = vpop.f32.mrf.mxu1 }
 0xa4e   :  { %2782 = vmax.xlane.f32.xlu1 %v2713_v21  ;;  %2784 = vmax.xlane.f32.xlu0 %v2718_v18  ;;  %v2733_v29 = vadd.f32 %v6951_v22, %v5414_v25 }
 0xa4f   :  { %v2727_v42 = vpop.f32.mrf.mxu1 }
 0xa50   :  { %v2728_v35 = vadd.f32 %v5414_v25, %v2727_v42 }
 0xa51   :  { %v6954_v6 = vpop.f32.mrf.mxu1 }
 0xa52   :  { %2786 = vmax.xlane.f32.xlu1 %v2723_v26  ;;  %2788 = vmax.xlane.f32.xlu0 %v2728_v35  ;;  %v2743_v4 = vadd.f32 %v6954_v6, %v5414_v25 }
 0xa53   :  { %v2737_v30 = vpop.f32.mrf.mxu1 }
 0xa54   :  { %v2738_v37 = vadd.f32 %v5414_v25, %v2737_v30 }
 0xa55   :  { %v6957_v48 = vpop.f32.mrf.mxu1 }
 0xa56   :  { %2790 = vmax.xlane.f32.xlu1 %v2733_v29  ;;  %2792 = vmax.xlane.f32.xlu0 %v2738_v37  ;;  %v9196_v17 = vadd.f32 %v6957_v48, %v5414_v25 }
 0xa57   :  { %v2747_v53 = vpop.f32.mrf.mxu1 }
 0xa58   :  { %v2748_v39 = vadd.f32 %v5414_v25, %v2747_v53 }
 0xa59   :  { %v6960_v41 = vpop.f32.mrf.mxu1 }
 0xa5a   :  { %2794 = vmax.xlane.f32.xlu1 %v2743_v4  ;;  %2796 = vmax.xlane.f32.xlu0 %v2748_v39  ;;  %v9202_v50 = vadd.f32 %v6960_v41, %v5414_v25 }
 0xa5b   :  { %v2757_v46 = vpop.f32.mrf.mxu1 }
 0xa5c   :  { %v9198_v45 = vadd.f32 %v5414_v25, %v2757_v46 }
 0xa5d   :  { %v6963_v24 = vpop.f32.mrf.mxu1 }
 0xa5e   :  { %2798 = vmax.xlane.f32.xlu1 %v9196_v17  ;;  %2800 = vmax.xlane.f32.xlu0 %v9198_v45  ;;  %v9208_v38 = vadd.f32 %v6963_v24, %v5414_v25 }
 0xa5f   :  { %v2767_v49 = vpop.f32.mrf.mxu1 }
 0xa60   :  { %v9204_v19 = vadd.f32 %v5414_v25, %v2767_v49 }
 0xa62   :  { %2802 = vmax.xlane.f32.xlu1 %v9202_v50  ;;  %2804 = vmax.xlane.f32.xlu0 %v9204_v19 }
 0xa66   :  { %2806 = vmax.xlane.f32.xlu1 %v9208_v38 }
 0xacf   :  { %v2777_v51 = vpop.xlane.xlu0 %2776 }
 0xad0   :  { %v2808_v57 = vsub.f32 %v2698_v11, %v2777_v51 }
 0xad2   :  { %v2824_v52 = vmul.f32 1.442695, %v2808_v57 }
 0xad3   :  { %v2781_v59 = vpop.xlane.xlu1 %2780  ;;  %v2779_v62 = vpop.xlane.xlu0 %2778 }
 0xad4   :  { %7816 = vpow2.f32 %v2824_v52  ;;  %v2810_v23 = vsub.f32 %v2708_v15, %v2781_v59  ;;  %v2809_v0 = vsub.f32 %v2703_v33, %v2779_v62 }
 0xad6   :  { %v2828_v34 = vmul.f32 1.442695, %v2810_v23  ;;  %v2826_v43 = vmul.f32 1.442695, %v2809_v0 }
 0xad7   :  { %v2783_v56 = vpop.xlane.xlu1 %2782  ;;  %v2785_v2 = vpop.xlane.xlu0 %2784 }
 0xad8   :  { %7818 = vpow2.f32 %v2828_v34  ;;  %v2811_v36 = vsub.f32 %v2713_v21, %v2783_v56  ;;  %v2812_v7 = vsub.f32 %v2718_v18, %v2785_v2 }
 0xad9   :  { %7820 = vpow2.f32 %v2826_v43 }
 0xada   :  { %v2830_v44 = vmul.f32 1.442695, %v2811_v36  ;;  %v2832_v9 = vmul.f32 1.442695, %v2812_v7 }
 0xadb   :  { %v2787_v61 = vpop.xlane.xlu1 %2786  ;;  %v2789_v25 = vpop.xlane.xlu0 %2788 }
 0xadc   :  { %7822 = vpow2.f32 %v2830_v44  ;;  %v2813_v28 = vsub.f32 %v2723_v26, %v2787_v61  ;;  %v2814_v11 = vsub.f32 %v2728_v35, %v2789_v25  ;;  %v8451_v25 = vmov 0  }
 0xadd   :  { %7824 = vpow2.f32 %v2832_v9  ;;  %7687 = vset.pattern.permute.xlu1 %v8451_v25  ;;  %7686 = vset.pattern.permute.xlu0 %v8451_v25 }
 0xade   :  { %v2834_v13 = vmul.f32 1.442695, %v2813_v28  ;;  %v2836_v32 = vmul.f32 1.442695, %v2814_v11  ;;  %v3107_v28 = vld [vmem:[%s9662_s2] sm:$0xff]  ;;  %v3108_v11 = vld [vmem:[%s9662_s2 + $0x8] sm:$0xff] }
 0xadf   :  { %v2791_v15 = vpop.xlane.xlu1 %2790  ;;  %v2793_v33 = vpop.xlane.xlu0 %2792 }
 0xae0   :  { %7826 = vpow2.f32 %v2834_v13  ;;  %v2815_v47 = vsub.f32 %v2733_v29, %v2791_v15  ;;  %v2816_v40 = vsub.f32 %v2738_v37, %v2793_v33  ;;  %v3109_v13 = vld [vmem:[%s9662_s2 + $0x10] sm:$0xff]  ;;  %v5415_v15 = vld [vmem:[#allocation2] ss:$0 sm:$0xff] }
 0xae1   :  { %v9211_v22 = vpop.eup %7816  ;;  %7828 = vpow2.f32 %v2836_v32  ;;  %v3110_v32 = vld [vmem:[%s9662_s2 + $0x18] sm:$0xff]  ;;  %v3111_v33 = vld [vmem:[%s9662_s2 + $0x20] sm:$0xff] }
 0xae2   :  { %v2838_v21 = vmul.f32 1.442695, %v2815_v47  ;;  %v2840_v18 = vmul.f32 1.442695, %v2816_v40  ;;  %2856 = vadd.xlane.f32.xlu0 %v9211_v22  ;;  %v3115_v47 = vld [vmem:[%s9662_s2 + $0x40] sm:$0xff]  ;;  %v3112_v40 = vld [vmem:[%s9662_s2 + $0x28] sm:$0xff] }
 0xae3   :  { %v2795_v42 = vpop.xlane.xlu1 %2794  ;;  %v2797_v6 = vpop.xlane.xlu0 %2796 }
 0xae4   :  { %7830 = vpow2.f32 %v2838_v21  ;;  %v2817_v26 = vsub.f32 %v2743_v4, %v2795_v42  ;;  %v2818_v35 = vsub.f32 %v2748_v39, %v2797_v6  ;;  %v3117_v21 = vld [vmem:[%s9662_s2 + $0x50] sm:$0xff]  ;;  %v3119_v42 = vld [vmem:[%s9662_s2 + $0x60] sm:$0xff] }
 0xae5   :  { %v9214_v30 = vpop.eup %7818  ;;  %7832 = vpow2.f32 %v2840_v18  ;;  %v3113_v18 = vld [vmem:[%s9662_s2 + $0x30] sm:$0xff]  ;;  %v3250_v6 = vld [vmem:[#allocation13 + $0x78] sm:$0xff] }
 0xae6   :  { %v9216_v48 = vpop.eup %7820  ;;  %v2842_v53 = vmul.f32 1.442695, %v2817_v26  ;;  %v2844_v29 = vmul.f32 1.442695, %v2818_v35  ;;  %2860 = vadd.xlane.f32.xlu0 %v9214_v30  ;;  %v3114_v26 = vld [vmem:[%s9662_s2 + $0x38] sm:$0xff]  ;;  %v3121_v35 = vld [vmem:[%s9662_s2 + $0x70] sm:$0xff]  ;;  %7020 = vmatprep.subr.mxu0 %v3250_v6 }
 0xae7   :  { %2858 = vadd.xlane.f32.xlu1 %v9216_v48  ;;  %v2799_v37 = vpop.xlane.xlu1 %2798  ;;  %v2801_v41 = vpop.xlane.xlu0 %2800 }
 0xae8   :  { %7834 = vpow2.f32 %v2842_v53  ;;  %v2819_v46 = vsub.f32 %v9196_v17, %v2799_v37  ;;  %v2820_v24 = vsub.f32 %v9198_v45, %v2801_v41  ;;  %v3116_v53 = vld [vmem:[%s9662_s2 + $0x48] sm:$0xff]  ;;  %v3122_v41 = vld [vmem:[%s9662_s2 + $0x78] sm:$0xff] }
 0xae9   :  { %v9222_v4 = vpop.eup %7822  ;;  %7836 = vpow2.f32 %v2844_v29  ;;  %v3118_v29 = vld [vmem:[%s9662_s2 + $0x58] sm:$0xff]  ;;  %v3120_v37 = vld [vmem:[%s9662_s2 + $0x68] sm:$0xff] }
 0xaea   :  { %v9224_v39 = vpop.eup %7824  ;;  %v2846_v49 = vmul.f32 1.442695, %v2819_v46  ;;  %v2848_v51 = vmul.f32 1.442695, %v2820_v24 }
 0xaeb   :  { %2862 = vadd.xlane.f32.xlu1 %v9222_v4  ;;  %2864 = vadd.xlane.f32.xlu0 %v9224_v39  ;;  %v2803_v57 = vpop.xlane.xlu1 %2802  ;;  %v2805_v52 = vpop.xlane.xlu0 %2804 }
 0xaec   :  { %7838 = vpow2.f32 %v2846_v49  ;;  %v2821_v59 = vsub.f32 %v9202_v50, %v2803_v57  ;;  %v2822_v17 = vsub.f32 %v9204_v19, %v2805_v52 }
 0xaed   :  { %v9230_v62 = vpop.eup %7826  ;;  %7840 = vpow2.f32 %v2848_v51 }
 0xaee   :  { %v9232_v45 = vpop.eup %7828  ;;  %v2850_v23 = vmul.f32 1.442695, %v2821_v59  ;;  %v2852_v0 = vmul.f32 1.442695, %v2822_v17 }
 0xaef   :  { %2866 = vadd.xlane.f32.xlu1 %v9230_v62  ;;  %2868 = vadd.xlane.f32.xlu0 %v9232_v45  ;;  %v2807_v34 = vpop.xlane.xlu1 %2806 }
 0xaf0   :  { %7842 = vpow2.f32 %v2850_v23  ;;  %v2823_v43 = vsub.f32 %v9208_v38, %v2807_v34 }
 0xaf1   :  { %v9237_v56 = vpop.eup %7830  ;;  %7844 = vpow2.f32 %v2852_v0 }
 0xaf2   :  { %v9239_v50 = vpop.eup %7832  ;;  %v2854_v19 = vmul.f32 1.442695, %v2823_v43 }
 0xaf3   :  { %2870 = vadd.xlane.f32.xlu1 %v9237_v56  ;;  %2872 = vadd.xlane.f32.xlu0 %v9239_v50 }
 0xaf4   :  { %7846 = vpow2.f32 %v2854_v19 }
 0xaf5   :  { %v9243_v2 = vpop.eup %7834 }
 0xaf6   :  { %v9245_v36 = vpop.eup %7836 }
 0xaf7   :  { %2874 = vadd.xlane.f32.xlu1 %v9243_v2  ;;  %2876 = vadd.xlane.f32.xlu0 %v9245_v36 }
 0xaf9   :  { %v9249_v38 = vpop.eup %7838 }
 0xafa   :  { %v9251_v7 = vpop.eup %7840 }
 0xafb   :  { %2878 = vadd.xlane.f32.xlu1 %v9249_v38  ;;  %2880 = vadd.xlane.f32.xlu0 %v9251_v7 }
 0xafd   :  { %v9255_v44 = vpop.eup %7842 }
 0xafe   :  { %v9257_v9 = vpop.eup %7844 }
 0xaff   :  { %2882 = vadd.xlane.f32.xlu1 %v9255_v44  ;;  %2884 = vadd.xlane.f32.xlu0 %v9257_v9 }
 0xb01   :  { %v9261_v61 = vpop.eup %7846 }
 0xb03   :  { %2886 = vadd.xlane.f32.xlu1 %v9261_v61 }
 0xb14   :  { %3125 = vperm.xlu1 %7687, %v3107_v28  }
 0xb15   :  { %3072 = vperm.xlu0 %7686, %v5415_v15  }
 0xb18   :  { %3130 = vperm.xlu1 %7687, %v3108_v11  }
 0xb19   :  { %3165 = vperm.xlu0 %7686, %v3115_v47  }
 0xb1c   :  { %3135 = vperm.xlu1 %7687, %v3109_v13  }
 0xb1d   :  { %3175 = vperm.xlu0 %7686, %v3117_v21  }
 0xb20   :  { %3140 = vperm.xlu1 %7687, %v3110_v32   ;;  %v3249_v32 = vld [vmem:[#allocation13 + $0x70] sm:$0xff] }
 0xb21   :  { %3185 = vperm.xlu0 %7686, %v3119_v42   ;;  %v3246_v42 = vld [vmem:[#allocation13 + $0x58] sm:$0xff] }
 0xb24   :  { %3145 = vperm.xlu1 %7687, %v3111_v33  }
 0xb25   :  { %3195 = vperm.xlu0 %7686, %v3121_v35  }
 0xb28   :  { %3150 = vperm.xlu1 %7687, %v3112_v40  }
 0xb2c   :  { %3155 = vperm.xlu1 %7687, %v3113_v18  }
 0xb30   :  { %3160 = vperm.xlu1 %7687, %v3114_v26  }
 0xb34   :  { %3170 = vperm.xlu1 %7687, %v3116_v53  }
 0xb38   :  { %3180 = vperm.xlu1 %7687, %v3118_v29  }
 0xb3c   :  { %3190 = vperm.xlu1 %7687, %v3120_v37   ;;  %v3244_v37 = vld [vmem:[#allocation13 + $0x48] sm:$0xff] }
 0xb40   :  { %3200 = vperm.xlu1 %7687, %v3122_v41  }
 0xb6b   :  { %v2857_v46 = vpop.xlane.xlu0 %2856 }
 0xb6c   :  { %7848 = vrcp.f32 %v2857_v46 }
 0xb6f   :  { %v2861_v24 = vpop.xlane.xlu0 %2860 }
 0xb70   :  { %v2859_v49 = vpop.xlane.xlu1 %2858  ;;  %7850 = vrcp.f32 %v2861_v24 }
 0xb71   :  { %7852 = vrcp.f32 %v2859_v49  ;;  %v3243_v49 = vld [vmem:[#allocation13 + $0x40] sm:$0xff] }
 0xb74   :  { %v2863_v51 = vpop.xlane.xlu1 %2862  ;;  %v2865_v57 = vpop.xlane.xlu0 %2864 }
 0xb75   :  { %7854 = vrcp.f32 %v2863_v51  ;;  %v3242_v51 = vld [vmem:[#allocation13 + $0x38] sm:$0xff] }
 0xb76   :  { %7856 = vrcp.f32 %v2865_v57 }
 0xb78   :  { %v2867_v52 = vpop.xlane.xlu1 %2866  ;;  %v2869_v59 = vpop.xlane.xlu0 %2868 }
 0xb79   :  { %v7849_v17 = vpop.eup %7848  ;;  %7858 = vrcp.f32 %v2867_v52 }
 0xb7a   :  { %7860 = vrcp.f32 %v2869_v59  ;;  %v2904_v23 = vmul.f32 %v7849_v17, %v9211_v22  ;;  %v3248_v22 = vld [vmem:[#allocation13 + $0x68] sm:$0xff] }
 0xb7b   :  { %v3240_v17 = vld [vmem:[#allocation13 + $0x28] sm:$0xff] }
 0xb7c   :  { %v2871_v0 = vpop.xlane.xlu1 %2870  ;;  %v2873_v34 = vpop.xlane.xlu0 %2872  ;;  %6996 = vmatprep.mubr.f32.mxu0 %v2904_v23 }
 0xb7d   :  { %v7851_v43 = vpop.eup %7850  ;;  %7862 = vrcp.f32 %v2871_v0 }
 0xb7e   :  { %v7853_v19 = vpop.eup %7852  ;;  %7864 = vrcp.f32 %v2873_v34  ;;  %v2906_v25 = vmul.f32 %v7851_v43, %v9214_v30 }
 0xb7f   :  { %v2905_v28 = vmul.f32 %v7853_v19, %v9216_v48  ;;  %v3247_v48 = vld [vmem:[#allocation13 + $0x60] sm:$0xff] }
 0xb80   :  { %v2875_v11 = vpop.xlane.xlu1 %2874  ;;  %v2877_v13 = vpop.xlane.xlu0 %2876 }
 0xb81   :  { %7866 = vrcp.f32 %v2875_v11  ;;  %6997 = vmatmul.mubr.f32.vlgmr.msra.gmra.mxu0 %v2905_v28  ;;  %v3237_v11 = vld [vmem:[#allocation13 + $0x10] sm:$0xff] }
 0xb82   :  { %v7855_v15 = vpop.eup %7854  ;;  %7868 = vrcp.f32 %v2877_v13  ;;  %6999 = vmatprep.mubr.f32.mxu0 %v2906_v25  ;;  %7021 = vmatpush3.msra.mxu0 %v3250_v6  ;;  %v3236_v13 = vld [vmem:[#allocation13 + $0x8] sm:$0xff] }
 0xb83   :  { %v7857_v33 = vpop.eup %7856  ;;  %v2907_v47 = vmul.f32 %v7855_v15, %v9222_v4  ;;  %7022 = vmatprep.subr.mxu0 %v3249_v32  ;;  %v3463_v15 = vld [vmem:[#allocation14 + $0x60] sm:$0xff] }
 0xb84   :  { %v2879_v40 = vpop.xlane.xlu1 %2878  ;;  %v2881_v21 = vpop.xlane.xlu0 %2880  ;;  %v2908_v30 = vmul.f32 %v7857_v33, %v9224_v39  ;;  %7023 = vmatpush3.msra.mxu0 %v3249_v32  ;;  %v3245_v39 = vld [vmem:[#allocation13 + $0x50] sm:$0xff] }
 0xb85   :  { %7870 = vrcp.f32 %v2879_v40  ;;  %7000 = vmatmul.mubr.f32.gmra.mxu0 %v2907_v47  ;;  %7024 = vmatprep.subr.mxu0 %v3248_v22  ;;  %v3465_v32 = vld [vmem:[#allocation14 + $0x70] sm:$0xff]  ;;  %v3460_v47 = vld [vmem:[#allocation14 + $0x48] sm:$0xff]  ;;  %v3459_v40 = vld [vmem:[#allocation14 + $0x40] sm:$0xff] }
 0xb86   :  { %v7859_v18 = vpop.eup %7858  ;;  %7872 = vrcp.f32 %v2881_v21  ;;  %7002 = vmatprep.mubr.f32.mxu0 %v2908_v30  ;;  %7025 = vmatpush3.msra.mxu0 %v3248_v22  ;;  %v3462_v22 = vld [vmem:[#allocation14 + $0x58] sm:$0xff]  ;;  %v3461_v33 = vld [vmem:[#allocation14 + $0x50] sm:$0xff] }
 0xb87   :  { %v7861_v6 = vpop.eup %7860  ;;  %v2909_v26 = vmul.f32 %v7859_v18, %v9230_v62  ;;  %7026 = vmatprep.subr.mxu0 %v3247_v48  ;;  %v3458_v21 = vld [vmem:[#allocation14 + $0x38] sm:$0xff]  ;;  %v3457_v30 = vld [vmem:[#allocation14 + $0x30] sm:$0xff]  ;;  %v3455_v18 = vld [vmem:[#allocation14 + $0x20] sm:$0xff] }
 0xb88   :  { %v2883_v4 = vpop.xlane.xlu1 %2882  ;;  %v2885_v35 = vpop.xlane.xlu0 %2884  ;;  %v2910_v53 = vmul.f32 %v7861_v6, %v9232_v45  ;;  %7027 = vmatpush3.msra.mxu0 %v3247_v48  ;;  %v3456_v48 = vld [vmem:[#allocation14 + $0x28] sm:$0xff] }
 0xb89   :  { %7874 = vrcp.f32 %v2883_v4  ;;  %7003 = vmatmul.mubr.f32.gmra.mxu0 %v2909_v26  ;;  %7028 = vmatprep.subr.mxu0 %v3246_v42 }
 0xb8a   :  { %v7863_v29 = vpop.eup %7862  ;;  %7876 = vrcp.f32 %v2885_v35  ;;  %7005 = vmatprep.mubr.f32.mxu0 %v2910_v53  ;;  %7029 = vmatpush3.msra.mxu0 %v3246_v42 }
 0xb8b   :  { %v7865_v41 = vpop.eup %7864  ;;  %v2911_v46 = vmul.f32 %v7863_v29, %v9237_v56  ;;  %7030 = vmatprep.subr.mxu0 %v3245_v39  ;;  %v3241_v56 = vld [vmem:[#allocation13 + $0x30] sm:$0xff] }
 0xb8c   :  { %v2887_v62 = vpop.xlane.xlu1 %2886  ;;  %v2912_v24 = vmul.f32 %v7865_v41, %v9239_v50  ;;  %7031 = vmatpush3.msra.mxu0 %v3245_v39 }
 0xb8d   :  { %7878 = vrcp.f32 %v2887_v62  ;;  %7006 = vmatmul.mubr.f32.gmra.mxu0 %v2911_v46  ;;  %7032 = vmatprep.subr.mxu0 %v3244_v37 }
 0xb8e   :  { %v7867_v45 = vpop.eup %7866  ;;  %7008 = vmatprep.mubr.f32.mxu0 %v2912_v24  ;;  %7033 = vmatpush3.msra.mxu0 %v3244_v37 }
 0xb8f   :  { %v7869_v57 = vpop.eup %7868  ;;  %v2913_v52 = vmul.f32 %v7867_v45, %v9243_v2  ;;  %7034 = vmatprep.subr.mxu0 %v3243_v49 }
 0xb90   :  { %v2914_v59 = vmul.f32 %v7869_v57, %v9245_v36  ;;  %7035 = vmatpush3.msra.mxu0 %v3243_v49  ;;  %v3126_v42 = vpop.permute.xlu1 %3125  ;;  %v9296_v39 = vpop.permute.xlu0 %3072 }
 0xb91   :  { %7009 = vmatmul.mubr.f32.gmra.mxu0 %v2913_v52  ;;  %7036 = vmatprep.subr.mxu0 %v3242_v51 }
 0xb92   :  { %v7871_v50 = vpop.eup %7870  ;;  %7011 = vmatprep.mubr.f32.mxu0 %v2914_v59  ;;  %7037 = vmatpush3.msra.mxu0 %v3242_v51 }
 0xb93   :  { %v7873_v23 = vpop.eup %7872  ;;  %v2915_v0 = vmul.f32 %v7871_v50, %v9249_v38  ;;  %7038 = vmatprep.subr.mxu0 %v3241_v56  ;;  %v3239_v38 = vld [vmem:[#allocation13 + $0x20] sm:$0xff] }
 0xb94   :  { %v2916_v34 = vmul.f32 %v7873_v23, %v9251_v7  ;;  %7039 = vmatpush3.msra.mxu0 %v3241_v56  ;;  %v3238_v7 = vld [vmem:[#allocation13 + $0x18] sm:$0xff]  ;;  %v3131_v6 = vpop.permute.xlu1 %3130 }
 0xb95   :  { %7012 = vmatmul.mubr.f32.gmra.mxu0 %v2915_v0  ;;  %7040 = vmatprep.subr.mxu0 %v3240_v17 }
 0xb96   :  { %v7875_v2 = vpop.eup %7874  ;;  %7014 = vmatprep.mubr.f32.mxu0 %v2916_v34  ;;  %7041 = vmatpush3.msra.mxu0 %v3240_v17 }
 0xb97   :  { %v7877_v36 = vpop.eup %7876  ;;  %v2917_v43 = vmul.f32 %v7875_v2, %v9255_v44  ;;  %7042 = vmatprep.subr.mxu0 %v3239_v38  ;;  %v3235_v44 = vld [vmem:[#allocation13] sm:$0xff] }
 0xb98   :  { %v2918_v19 = vmul.f32 %v7877_v36, %v9257_v9  ;;  %7043 = vmatpush3.msra.mxu0 %v3239_v38  ;;  %v3466_v9 = vld [vmem:[#allocation14 + $0x78] sm:$0xff]  ;;  %v3136_v26 = vpop.permute.xlu1 %3135 }
 0xb99   :  { %7015 = vmatmul.mubr.f32.gmra.mxu0 %v2917_v43  ;;  %7044 = vmatprep.subr.mxu0 %v3238_v7 }
 0xb9a   :  { %v7879_v25 = vpop.eup %7878  ;;  %7017 = vmatprep.mubr.f32.mxu0 %v2918_v19  ;;  %7045 = vmatpush3.msra.mxu0 %v3238_v7 }
 0xb9b   :  { %v2919_v28 = vmul.f32 %v7879_v25, %v9261_v61  ;;  %7046 = vmatprep.subr.mxu0 %v3237_v11  ;;  %7076 = vmatprep.subr.mxu1 %v3466_v9  ;;  %v3464_v61 = vld [vmem:[#allocation14 + $0x68] sm:$0xff] }
 0xb9c   :  { %7047 = vmatpush3.msra.mxu0 %v3237_v11  ;;  %7077 = vmatpush3.msra.mxu1 %v3466_v9  ;;  %v3141_v4 = vpop.permute.xlu1 %3140 }
 0xb9d   :  { %7018 = vmatmul.mubr.f32.gmra.mxu0 %v2919_v28  ;;  %7048 = vmatprep.subr.mxu0 %v3236_v13 }
 0xb9e   :  { %7049 = vmatpush3.msra.mxu0 %v3236_v13  ;;  %7078 = vmatprep.subr.mxu1 %v3465_v32 }
 0xb9f   :  { %7050 = vmatprep.subr.mxu0 %v3235_v44  ;;  %7079 = vmatpush3.msra.mxu1 %v3465_v32 }
 0xba0   :  { %7051 = vmatpush3.msra.mxu0 %v3235_v44  ;;  %7080 = vmatprep.subr.mxu1 %v3464_v61  ;;  %v3146_v35 = vpop.permute.xlu1 %3145 }
 0xba1   :  { %7081 = vmatpush3.msra.mxu1 %v3464_v61 }
 0xba2   :  { %7082 = vmatprep.subr.mxu1 %v3463_v15 }
 0xba3   :  { %7083 = vmatpush3.msra.mxu1 %v3463_v15 }
 0xba4   :  { %7084 = vmatprep.subr.mxu1 %v3462_v22  ;;  %v3151_v53 = vpop.permute.xlu1 %3150 }
 0xba5   :  { %7085 = vmatpush3.msra.mxu1 %v3462_v22 }
 0xba6   :  { %7086 = vmatprep.subr.mxu1 %v3461_v33 }
 0xba7   :  { %7087 = vmatpush3.msra.mxu1 %v3461_v33 }
 0xba8   :  { %7088 = vmatprep.subr.mxu1 %v3460_v47  ;;  %v3156_v41 = vpop.permute.xlu1 %3155 }
 0xba9   :  { %7089 = vmatpush3.msra.mxu1 %v3460_v47 }
 0xbaa   :  { %7090 = vmatprep.subr.mxu1 %v3459_v40 }
 0xbab   :  { %7091 = vmatpush3.msra.mxu1 %v3459_v40 }
 0xbac   :  { %7092 = vmatprep.subr.mxu1 %v3458_v21 }
 0xbad   :  { %7093 = vmatpush3.msra.mxu1 %v3458_v21 }
 0xbae   :  { %7094 = vmatprep.subr.mxu1 %v3457_v30 }
 0xbaf   :  { %7095 = vmatpush3.msra.mxu1 %v3457_v30 }
 0xbb0   :  { %7096 = vmatprep.subr.mxu1 %v3456_v48 }
 0xbb1   :  { %7097 = vmatpush3.msra.mxu1 %v3456_v48 }
 0xbb2   :  { %7098 = vmatprep.subr.mxu1 %v3455_v18 }
 0xbb3   :  { %7099 = vmatpush3.msra.mxu1 %v3455_v18 }
 0xc41   :  { %v6998_v29 = vpop.f32.mrf.mxu0 }
 0xc42   :  { %v3076_v37 = vmul.f32 %v6998_v29, %v9296_v39 }
 0xc43   :  { %v2986_v46 = vpop.f32.mrf.mxu0 }
 0xc44   :  { %v3092_v62 = vadd.f32 %v9067_v8, %v3076_v37  ;;  %v3075_v24 = vmul.f32 %v9296_v39, %v2986_v46  ;;  %v3161_v8 = vpop.permute.xlu1 %3160 }
 0xc45   :  { %v7001_v49 = vpop.f32.mrf.mxu0 }
 0xc46   :  { %v9301_v45 = vmul.f32 %v3131_v6, %v3092_v62  ;;  %v3091_v51 = vadd.f32 %v3075_v24, %v9069_v10  ;;  %v3078_v57 = vmul.f32 %v7001_v49, %v9296_v39 }
 0xc47   :  { %v2996_v52 = vpop.f32.mrf.mxu0 }
 0xc48   :  { %3220 = vst [vmem:[%s8613_s17 + $0x8] sm:$0xff] %v9301_v45  ;;  %v3094_v59 = vadd.f32 %v9072_v12, %v3078_v57  ;;  %v3077_v56 = vmul.f32 %v9296_v39, %v2996_v52  ;;  %v9309_v50 = vmul.f32 %v3126_v42, %v3091_v51 }
 0xc49   :  { %v7004_v17 = vpop.f32.mrf.mxu0 }
 0xc4a   :  { %v3093_v23 = vadd.f32 %v3077_v56, %v9074_v14  ;;  %v3080_v0 = vmul.f32 %v7004_v17, %v9296_v39  ;;  %3219 = vst [vmem:[%s8613_s17] sm:$0xff] %v9309_v50  ;;  %7052 = vmatprep.mubr.f32.mxu0 %v9309_v50  ;;  %v9316_v10 = vmul.f32 %v3141_v4, %v3094_v59  ;;  %v3451_v17 = vld [vmem:[#allocation14] sm:$0xff] }
 0xc4b   :  { %v3006_v34 = vpop.f32.mrf.mxu0  ;;  %7053 = vmatmul.mubr.f32.vlgmr.msra.gmra.mxu0 %v9301_v45 }
 0xc4c   :  { %v3096_v12 = vadd.f32 %v9076_v16, %v3080_v0  ;;  %v3079_v2 = vmul.f32 %v9296_v39, %v3006_v34  ;;  %v9321_v36 = vmul.f32 %v3136_v26, %v3093_v23  ;;  %3222 = vst [vmem:[%s8613_s17 + $0x18] sm:$0xff] %v9316_v10  ;;  %v3171_v16 = vpop.permute.xlu1 %3170  ;;  %v3682_v23 = vld [vmem:[#allocation16 + $0x78] sm:$0xff]  ;;  %v3681_v0 = vld [vmem:[#allocation16 + $0x70] sm:$0xff]  ;;  %v3680_v34 = vld [vmem:[#allocation16 + $0x68] sm:$0xff] }
 0xc4d   :  { %v7007_v14 = vpop.f32.mrf.mxu0  ;;  %7132 = vmatprep.subr.mxu0 %v3682_v23 }
 0xc4e   :  { %v3095_v43 = vadd.f32 %v3079_v2, %v9078_v5  ;;  %v3082_v19 = vmul.f32 %v7007_v14, %v9296_v39  ;;  %3221 = vst [vmem:[%s8613_s17 + $0x10] sm:$0xff] %v9321_v36  ;;  %7055 = vmatprep.mubr.f32.mxu0 %v9321_v36  ;;  %v9330_v25 = vmul.f32 %v3151_v53, %v3096_v12  ;;  %v3166_v5 = vpop.permute.xlu0 %3165  ;;  %v3679_v12 = vld [vmem:[#allocation16 + $0x60] sm:$0xff]  ;;  %v3678_v2 = vld [vmem:[#allocation16 + $0x58] sm:$0xff]  ;;  %v3677_v14 = vld [vmem:[#allocation16 + $0x50] sm:$0xff] }
 0xc4f   :  { %v3016_v28 = vpop.f32.mrf.mxu0  ;;  %7056 = vmatmul.mubr.f32.gmra.mxu0 %v9316_v10 }
 0xc50   :  { %v3098_v38 = vadd.f32 %v9080_v20, %v3082_v19  ;;  %v3081_v7 = vmul.f32 %v9296_v39, %v3016_v28  ;;  %v9335_v11 = vmul.f32 %v3146_v35, %v3095_v43  ;;  %3224 = vst [vmem:[%s8613_s17 + $0x28] sm:$0xff] %v9330_v25  ;;  %7133 = vmatpush3.msra.mxu0 %v3682_v23  ;;  %v3676_v43 = vld [vmem:[#allocation16 + $0x48] sm:$0xff]  ;;  %v3675_v19 = vld [vmem:[#allocation16 + $0x40] sm:$0xff]  ;;  %v3673_v28 = vld [vmem:[#allocation16 + $0x30] sm:$0xff] }
 0xc51   :  { %v7010_v13 = vpop.f32.mrf.mxu0  ;;  %7134 = vmatprep.subr.mxu0 %v3681_v0 }
 0xc52   :  { %v3097_v44 = vadd.f32 %v3081_v7, %v9082_v54  ;;  %v3084_v9 = vmul.f32 %v7010_v13, %v9296_v39  ;;  %3223 = vst [vmem:[%s8613_s17 + $0x20] sm:$0xff] %v9335_v11  ;;  %7058 = vmatprep.mubr.f32.mxu0 %v9335_v11  ;;  %v9344_v32 = vmul.f32 %v3161_v8, %v3098_v38  ;;  %v3181_v54 = vpop.permute.xlu1 %3180  ;;  %v3672_v38 = vld [vmem:[#allocation16 + $0x28] sm:$0xff]  ;;  %v3671_v7 = vld [vmem:[#allocation16 + $0x20] sm:$0xff] }
 0xc53   :  { %v3026_v20 = vpop.f32.mrf.mxu0  ;;  %7059 = vmatmul.mubr.f32.gmra.mxu0 %v9330_v25 }
 0xc54   :  { %v3100_v61 = vadd.f32 %v9084_v55, %v3084_v9  ;;  %v3083_v15 = vmul.f32 %v9296_v39, %v3026_v20  ;;  %v9349_v22 = vmul.f32 %v3156_v41, %v3097_v44  ;;  %3226 = vst [vmem:[%s8613_s17 + $0x38] sm:$0xff] %v9344_v32  ;;  %v3176_v55 = vpop.permute.xlu0 %3175  ;;  %7135 = vmatpush3.msra.mxu0 %v3681_v0 }
 0xc55   :  { %v7013_v33 = vpop.f32.mrf.mxu0  ;;  %7136 = vmatprep.subr.mxu0 %v3680_v34 }
 0xc56   :  { %v3099_v47 = vadd.f32 %v3083_v15, %v9086_v58  ;;  %v3086_v40 = vmul.f32 %v7013_v33, %v9296_v39  ;;  %3225 = vst [vmem:[%s8613_s17 + $0x30] sm:$0xff] %v9349_v22  ;;  %7061 = vmatprep.mubr.f32.mxu0 %v9349_v22  ;;  %v9358_v21 = vmul.f32 %v3171_v16, %v3100_v61  ;;  %v3674_v16 = vld [vmem:[#allocation16 + $0x38] sm:$0xff] }
 0xc57   :  { %v3036_v30 = vpop.f32.mrf.mxu0  ;;  %7062 = vmatmul.mubr.f32.gmra.mxu0 %v9344_v32 }
 0xc58   :  { %v3102_v48 = vadd.f32 %v9088_v60, %v3086_v40  ;;  %v3085_v18 = vmul.f32 %v9296_v39, %v3036_v30  ;;  %v9363_v42 = vmul.f32 %v3166_v5, %v3099_v47  ;;  %3228 = vst [vmem:[%s8613_s17 + $0x48] sm:$0xff] %v9358_v21  ;;  %v3191_v60 = vpop.permute.xlu1 %3190  ;;  %7137 = vmatpush3.msra.mxu0 %v3680_v34 }
 0xc59   :  { %v7016_v58 = vpop.f32.mrf.mxu0  ;;  %7138 = vmatprep.subr.mxu0 %v3679_v12 }
 0xc5a   :  { %v3101_v6 = vadd.f32 %v3085_v18, %v9090_v63  ;;  %v3088_v26 = vmul.f32 %v7016_v58, %v9296_v39  ;;  %3227 = vst [vmem:[%s8613_s17 + $0x40] sm:$0xff] %v9363_v42  ;;  %7064 = vmatprep.mubr.f32.mxu0 %v9363_v42  ;;  %v9372_v4 = vmul.f32 %v3181_v54, %v3102_v48  ;;  %v3186_v63 = vpop.permute.xlu0 %3185 }
 0xc5b   :  { %v3046_v35 = vpop.f32.mrf.mxu0  ;;  %7065 = vmatmul.mubr.f32.gmra.mxu0 %v9358_v21 }
 0xc5c   :  { %v3104_v53 = vadd.f32 %v9092_v1, %v3088_v26  ;;  %v3087_v29 = vmul.f32 %v9296_v39, %v3046_v35  ;;  %v9377_v37 = vmul.f32 %v3176_v55, %v3101_v6  ;;  %3230 = vst [vmem:[%s8613_s17 + $0x58] sm:$0xff] %v9372_v4  ;;  %7139 = vmatpush3.msra.mxu0 %v3679_v12 }
 0xc5d   :  { %v7019_v41 = vpop.f32.mrf.mxu0  ;;  %7140 = vmatprep.subr.mxu0 %v3678_v2 }
 0xc5e   :  { %v3103_v46 = vadd.f32 %v3087_v29, %v9094_v3  ;;  %v3090_v62 = vmul.f32 %v7019_v41, %v9296_v39  ;;  %3229 = vst [vmem:[%s8613_s17 + $0x50] sm:$0xff] %v9377_v37  ;;  %7067 = vmatprep.mubr.f32.mxu0 %v9377_v37  ;;  %v9386_v1 = vmul.f32 %v3191_v60, %v3104_v53  ;;  %v3201_v3 = vpop.permute.xlu1 %3200  ;;  %v3196_v56 = vpop.permute.xlu0 %3195 }
 0xc5f   :  { %v3056_v24 = vpop.f32.mrf.mxu0  ;;  %7068 = vmatmul.mubr.f32.gmra.mxu0 %v9372_v4 }
 0xc60   :  { %v3106_v49 = vadd.f32 %v9096_v27, %v3090_v62  ;;  %v3089_v51 = vmul.f32 %v9296_v39, %v3056_v24  ;;  %v9391_v57 = vmul.f32 %v3186_v63, %v3103_v46  ;;  %3232 = vst [vmem:[%s8613_s17 + $0x68] sm:$0xff] %v9386_v1  ;;  %v3454_v27 = vld [vmem:[#allocation14 + $0x18] sm:$0xff]  ;;  %v3452_v39 = vld [vmem:[#allocation14 + $0x8] sm:$0xff]  ;;  %7141 = vmatpush3.msra.mxu0 %v3678_v2 }
 0xc61   :  { %7100 = vmatprep.subr.mxu1 %v3454_v27  ;;  %7142 = vmatprep.subr.mxu0 %v3677_v14 }
 0xc62   :  { %v3105_v52 = vadd.f32 %v3089_v51, %v9100_v31  ;;  %3231 = vst [vmem:[%s8613_s17 + $0x60] sm:$0xff] %v9391_v57  ;;  %7070 = vmatprep.mubr.f32.mxu0 %v9391_v57  ;;  %v9399_v59 = vmul.f32 %v3201_v3, %v3106_v49  ;;  %7101 = vmatpush3.msra.mxu1 %v3454_v27  ;;  %v3453_v31 = vld [vmem:[#allocation14 + $0x10] sm:$0xff] }
 0xc63   :  { %7071 = vmatmul.mubr.f32.gmra.mxu0 %v9386_v1  ;;  %7102 = vmatprep.subr.mxu1 %v3453_v31 }
 0xc64   :  { %v9402_v8 = vmul.f32 %v3196_v56, %v3105_v52  ;;  %3234 = vst [vmem:[%s8613_s17 + $0x78] sm:$0xff] %v9399_v59  ;;  %7103 = vmatpush3.msra.mxu1 %v3453_v31  ;;  %7143 = vmatpush3.msra.mxu0 %v3677_v14 }
 0xc65   :  { %7104 = vmatprep.subr.mxu1 %v3452_v39  ;;  %7144 = vmatprep.subr.mxu0 %v3676_v43 }
 0xc66   :  { %3233 = vst [vmem:[%s8613_s17 + $0x70] sm:$0xff] %v9402_v8  ;;  %7073 = vmatprep.mubr.f32.mxu0 %v9402_v8  ;;  %7105 = vmatpush3.msra.mxu1 %v3452_v39  ;;  %s9663_s17 = sld [smem:[#allocation46_spill]] }
 0xc67   :  { %7074 = vmatmul.mubr.f32.gmra.mxu0 %v9399_v59  ;;  %7106 = vmatprep.subr.mxu1 %v3451_v17 }
 0xc68   :  { %7107 = vmatpush3.msra.mxu1 %v3451_v17  ;;  %7145 = vmatpush3.msra.mxu0 %v3676_v43 }
 0xc69   :  { %7146 = vmatprep.subr.mxu0 %v3675_v19 }
 0xc6a   :  { %7147 = vmatpush3.msra.mxu0 %v3675_v19 }
 0xc6b   :  { %7148 = vmatprep.subr.mxu0 %v3674_v16 }
 0xc6c   :  { %7149 = vmatpush3.msra.mxu0 %v3674_v16  ;;  %v9411_v5 = vld [vmem:[%s9663_s17] ss:$0 sm:$0xff] }
 0xc6d   :  { %7150 = vmatprep.subr.mxu0 %v3673_v28 }
 0xc6e   :  { %7151 = vmatpush3.msra.mxu0 %v3673_v28 }
 0xc6f   :  { %7152 = vmatprep.subr.mxu0 %v3672_v38 }
 0xc70   :  { %7153 = vmatpush3.msra.mxu0 %v3672_v38 }
 0xc71   :  { %7154 = vmatprep.subr.mxu0 %v3671_v7 }
 0xc72   :  { %7155 = vmatpush3.msra.mxu0 %v3671_v7 }
 0xd0b   :  { %v7054_v13 = vpop.f32.mrf.mxu0 }
 0xd0c   :  { %v3330_v44 = vadd.f32 %v7054_v13, %v9411_v5 }
 0xd0d   :  { %v3324_v9 = vpop.f32.mrf.mxu0 }
 0xd0e   :  { %v3325_v20 = vadd.f32 %v9411_v5, %v3324_v9  ;;  %v3420_v61 = vmul.f32 0.2, %v3330_v44  ;;  %vm3404_vm0 = vcmp.gt.f32.partialorder %v3330_v44, 0.0 }
 0xd0f   :  { %v7057_v15 = vpop.f32.mrf.mxu0 }
 0xd10   :  { %v3419_v54 = vmul.f32 0.2, %v3325_v20  ;;  %v3340_v33 = vadd.f32 %v7057_v15, %v9411_v5  ;;  %vm3403_vm1 = vcmp.gt.f32.partialorder %v3325_v20, 0.0  ;;  %v3436_v30 = vsel %vm3404_vm0, %v3330_v44, %v3420_v61 }
 0xd11   :  { %v3334_v47 = vpop.f32.mrf.mxu0 }
 0xd12   :  { %v3335_v40 = vadd.f32 %v9411_v5, %v3334_v47  ;;  %v3435_v55 = vsel %vm3403_vm1, %v3325_v20, %v3419_v54  ;;  %v3422_v48 = vmul.f32 0.2, %v3340_v33  ;;  %vm3406_vm2 = vcmp.gt.f32.partialorder %v3340_v33, 0.0 }
 0xd13   :  { %v7060_v18 = vpop.f32.mrf.mxu0  ;;  %7108 = vmatprep.mubr.f32.mxu1 %v3435_v55 }
 0xd14   :  { %v3421_v58 = vmul.f32 0.2, %v3335_v40  ;;  %v3350_v6 = vadd.f32 %v7060_v18, %v9411_v5  ;;  %7109 = vmatmul.mubr.f32.vlgmr.msra.gmra.mxu1 %v3436_v30  ;;  %vm3405_vm3 = vcmp.gt.f32.partialorder %v3335_v40, 0.0  ;;  %v3438_v63 = vsel %vm3406_vm2, %v3340_v33, %v3422_v48 }
 0xd15   :  { %v3344_v26 = vpop.f32.mrf.mxu0 }
 0xd16   :  { %v3345_v60 = vadd.f32 %v9411_v5, %v3344_v26  ;;  %v3437_v35 = vsel %vm3405_vm3, %v3335_v40, %v3421_v58  ;;  %v3424_v53 = vmul.f32 0.2, %v3350_v6  ;;  %vm3408_vm4 = vcmp.gt.f32.partialorder %v3350_v6, 0.0 }
 0xd17   :  { %v7063_v29 = vpop.f32.mrf.mxu0  ;;  %7111 = vmatprep.mubr.f32.mxu1 %v3437_v35  ;;  %v3669_v35 = vld [vmem:[#allocation16 + $0x10] sm:$0xff] }
 0xd18   :  { %v3423_v41 = vmul.f32 0.2, %v3345_v60  ;;  %v3360_v46 = vadd.f32 %v7063_v29, %v9411_v5  ;;  %7112 = vmatmul.mubr.f32.gmra.mxu1 %v3438_v63  ;;  %vm3407_vm5 = vcmp.gt.f32.partialorder %v3345_v60, 0.0  ;;  %v3440_v52 = vsel %vm3408_vm4, %v3350_v6, %v3424_v53  ;;  %v3668_v53 = vld [vmem:[#allocation16 + $0x8] sm:$0xff]  ;;  %v4082_v29 = vld [vmem:[#allocation23 + $0x78] sm:$0xff] }
 0xd19   :  { %v3354_v62 = vpop.f32.mrf.mxu0  ;;  %v3898_v63 = vld [vmem:[#allocation17 + $0x78] sm:$0xff] }
 0xd1a   :  { %v3355_v24 = vadd.f32 %v9411_v5, %v3354_v62  ;;  %v3439_v49 = vsel %vm3407_vm5, %v3345_v60, %v3423_v41  ;;  %v3426_v51 = vmul.f32 0.2, %v3360_v46  ;;  %vm3410_vm6 = vcmp.gt.f32.partialorder %v3360_v46, 0.0  ;;  %v3670_v60 = vld [vmem:[#allocation16 + $0x18] sm:$0xff]  ;;  %v3897_v41 = vld [vmem:[#allocation17 + $0x70] sm:$0xff]  ;;  %7188 = vmatprep.subr.mxu1 %v3898_v63  ;;  %v3895_v62 = vld [vmem:[#allocation17 + $0x60] sm:$0xff] }
 0xd1b   :  { %v7066_v3 = vpop.f32.mrf.mxu0  ;;  %7114 = vmatprep.mubr.f32.mxu1 %v3439_v49  ;;  %7156 = vmatprep.subr.mxu0 %v3670_v60  ;;  %v3893_v49 = vld [vmem:[#allocation17 + $0x50] sm:$0xff] }
 0xd1c   :  { %v3425_v56 = vmul.f32 0.2, %v3355_v24  ;;  %v3370_v27 = vadd.f32 %v7066_v3, %v9411_v5  ;;  %7115 = vmatmul.mubr.f32.gmra.mxu1 %v3440_v52  ;;  %vm3409_vm7 = vcmp.gt.f32.partialorder %v3355_v24, 0.0  ;;  %v3442_v34 = vsel %vm3410_vm6, %v3360_v46, %v3426_v51  ;;  %7157 = vmatpush3.msra.mxu0 %v3670_v60  ;;  %v3896_v46 = vld [vmem:[#allocation17 + $0x68] sm:$0xff]  ;;  %v3891_v3 = vld [vmem:[#allocation17 + $0x40] sm:$0xff]  ;;  %v3890_v52 = vld [vmem:[#allocation17 + $0x38] sm:$0xff] }
 0xd1d   :  { %v3364_v31 = vpop.f32.mrf.mxu0  ;;  %7158 = vmatprep.subr.mxu0 %v3669_v35  ;;  %7189 = vmatpush3.msra.mxu1 %v3898_v63  ;;  %v3892_v51 = vld [vmem:[#allocation17 + $0x48] sm:$0xff] }
 0xd1e   :  { %v3365_v39 = vadd.f32 %v9411_v5, %v3364_v31  ;;  %v3441_v17 = vsel %vm3409_vm7, %v3355_v24, %v3425_v56  ;;  %v3428_v23 = vmul.f32 0.2, %v3370_v27  ;;  %vm3412_vm8 = vcmp.gt.f32.partialorder %v3370_v27, 0.0  ;;  %7159 = vmatpush3.msra.mxu0 %v3669_v35  ;;  %7190 = vmatprep.subr.mxu1 %v3897_v41  ;;  %v3894_v24 = vld [vmem:[#allocation17 + $0x58] sm:$0xff]  ;;  %v3889_v56 = vld [vmem:[#allocation17 + $0x30] sm:$0xff]  ;;  %v3887_v31 = vld [vmem:[#allocation17 + $0x20] sm:$0xff] }
 0xd1f   :  { %v7069_v0 = vpop.f32.mrf.mxu0  ;;  %7117 = vmatprep.mubr.f32.mxu1 %v3441_v17  ;;  %7160 = vmatprep.subr.mxu0 %v3668_v53 }
 0xd20   :  { %v3427_v12 = vmul.f32 0.2, %v3365_v39  ;;  %v3380_v2 = vadd.f32 %v7069_v0, %v9411_v5  ;;  %7118 = vmatmul.mubr.f32.gmra.mxu1 %v3442_v34  ;;  %vm3411_vm9 = vcmp.gt.f32.partialorder %v3365_v39, 0.0  ;;  %v3444_v38 = vsel %vm3412_vm8, %v3370_v27, %v3428_v23  ;;  %7161 = vmatpush3.msra.mxu0 %v3668_v53  ;;  %v3888_v27 = vld [vmem:[#allocation17 + $0x28] sm:$0xff] }
 0xd21   :  { %v3374_v14 = vpop.f32.mrf.mxu0  ;;  %7191 = vmatpush3.msra.mxu1 %v3897_v41 }
 0xd22   :  { %v3375_v43 = vadd.f32 %v9411_v5, %v3374_v14  ;;  %v3443_v19 = vsel %vm3411_vm9, %v3365_v39, %v3427_v12  ;;  %v3430_v16 = vmul.f32 0.2, %v3380_v2  ;;  %vm3414_vm10 = vcmp.gt.f32.partialorder %v3380_v2, 0.0  ;;  %7192 = vmatprep.subr.mxu1 %v3896_v46  ;;  %v9430_v39 = vld [vmem:[%s9664_s9] ss:$0 sm:$0xff] }
 0xd23   :  { %v7072_v28 = vpop.f32.mrf.mxu0  ;;  %7120 = vmatprep.mubr.f32.mxu1 %v3443_v19  ;;  %7193 = vmatpush3.msra.mxu1 %v3896_v46 }
 0xd24   :  { %v3429_v7 = vmul.f32 0.2, %v3375_v43  ;;  %v3390_v13 = vadd.f32 %v7072_v28, %v9411_v5  ;;  %7121 = vmatmul.mubr.f32.gmra.mxu1 %v3444_v38  ;;  %vm3413_vm11 = vcmp.gt.f32.partialorder %v3375_v43, 0.0  ;;  %v3446_v54 = vsel %vm3414_vm10, %v3380_v2, %v3430_v16  ;;  %7194 = vmatprep.subr.mxu1 %v3895_v62 }
 0xd25   :  { %v3384_v44 = vpop.f32.mrf.mxu0  ;;  %7195 = vmatpush3.msra.mxu1 %v3895_v62  ;;  %v4076_v62 = vld [vmem:[#allocation23 + $0x48] sm:$0xff] }
 0xd26   :  { %v3385_v9 = vadd.f32 %v9411_v5, %v3384_v44  ;;  %v3445_v20 = vsel %vm3413_vm11, %v3375_v43, %v3429_v7  ;;  %v3432_v61 = vmul.f32 0.2, %v3390_v13  ;;  %vm3416_vm12 = vcmp.gt.f32.partialorder %v3390_v13, 0.0  ;;  %7196 = vmatprep.subr.mxu1 %v3894_v24  ;;  %v4081_v44 = vld [vmem:[#allocation23 + $0x70] sm:$0xff] }
 0xd27   :  { %v7075_v15 = vpop.f32.mrf.mxu0  ;;  %7123 = vmatprep.mubr.f32.mxu1 %v3445_v20  ;;  %7197 = vmatpush3.msra.mxu1 %v3894_v24 }
 0xd28   :  { %v3431_v33 = vmul.f32 0.2, %v3385_v9  ;;  %v3400_v47 = vadd.f32 %v7075_v15, %v9411_v5  ;;  %7124 = vmatmul.mubr.f32.gmra.mxu1 %v3446_v54  ;;  %vm3415_vm13 = vcmp.gt.f32.partialorder %v3385_v9, 0.0  ;;  %v3448_v18 = vsel %vm3416_vm12, %v3390_v13, %v3432_v61  ;;  %7198 = vmatprep.subr.mxu1 %v3893_v49  ;;  %v4080_v15 = vld [vmem:[#allocation23 + $0x68] sm:$0xff] }
 0xd29   :  { %v3394_v40 = vpop.f32.mrf.mxu0  ;;  %7199 = vmatpush3.msra.mxu1 %v3893_v49 }
 0xd2a   :  { %v3395_v55 = vadd.f32 %v9411_v5, %v3394_v40  ;;  %v3447_v30 = vsel %vm3415_vm13, %v3385_v9, %v3431_v33  ;;  %v3434_v48 = vmul.f32 0.2, %v3400_v47  ;;  %vm3418_vm14 = vcmp.gt.f32.partialorder %v3400_v47, 0.0  ;;  %v3667_v5 = vld [vmem:[#allocation16] sm:$0xff]  ;;  %7200 = vmatprep.subr.mxu1 %v3892_v51 }
 0xd2b   :  { %7126 = vmatprep.mubr.f32.mxu1 %v3447_v30  ;;  %7162 = vmatprep.subr.mxu0 %v3667_v5  ;;  %v4079_v30 = vld [vmem:[#allocation23 + $0x60] sm:$0xff] }
 0xd2c   :  { %v3433_v58 = vmul.f32 0.2, %v3395_v55  ;;  %7127 = vmatmul.mubr.f32.gmra.mxu1 %v3448_v18  ;;  %vm3417_vm15 = vcmp.gt.f32.partialorder %v3395_v55, 0.0  ;;  %v3450_v26 = vsel %vm3418_vm14, %v3400_v47, %v3434_v48  ;;  %7163 = vmatpush3.msra.mxu0 %v3667_v5 }
 0xd2d   :  { %7244 = vmatprep.subr.mxu0 %v4082_v29  ;;  %7201 = vmatpush3.msra.mxu1 %v3892_v51 }
 0xd2e   :  { %v3449_v6 = vsel %vm3417_vm15, %v3395_v55, %v3433_v58  ;;  %7202 = vmatprep.subr.mxu1 %v3891_v3 }
 0xd2f   :  { %7129 = vmatprep.mubr.f32.mxu1 %v3449_v6  ;;  %7203 = vmatpush3.msra.mxu1 %v3891_v3  ;;  %v4078_v6 = vld [vmem:[#allocation23 + $0x58] sm:$0xff] }
 0xd30   :  { %7130 = vmatmul.mubr.f32.gmra.mxu1 %v3450_v26  ;;  %7204 = vmatprep.subr.mxu1 %v3890_v52 }
 0xd31   :  { %7205 = vmatpush3.msra.mxu1 %v3890_v52 }
 0xd32   :  { %7206 = vmatprep.subr.mxu1 %v3889_v56 }
 0xd33   :  { %7207 = vmatpush3.msra.mxu1 %v3889_v56  ;;  %v4075_v56 = vld [vmem:[#allocation23 + $0x40] sm:$0xff] }
 0xd34   :  { %7208 = vmatprep.subr.mxu1 %v3888_v27 }
 0xd35   :  { %7209 = vmatpush3.msra.mxu1 %v3888_v27 }
 0xd36   :  { %7210 = vmatprep.subr.mxu1 %v3887_v31 }
 0xd37   :  { %7211 = vmatpush3.msra.mxu1 %v3887_v31 }
 0xdd4   :  { %v7110_v17 = vpop.f32.mrf.mxu1 }
 0xdd5   :  { %v3546_v23 = vadd.f32 %v7110_v17, %v9430_v39 }
 0xdd6   :  { %v3540_v0 = vpop.f32.mrf.mxu1 }
 0xdd7   :  { %v3541_v34 = vadd.f32 %v9430_v39, %v3540_v0  ;;  %v3636_v12 = vmul.f32 0.2, %v3546_v23  ;;  %vm3620_vm0 = vcmp.gt.f32.partialorder %v3546_v23, 0.0 }
 0xdd8   :  { %v7113_v2 = vpop.f32.mrf.mxu1 }
 0xdd9   :  { %v3635_v14 = vmul.f32 0.2, %v3541_v34  ;;  %v3556_v43 = vadd.f32 %v7113_v2, %v9430_v39  ;;  %vm3619_vm1 = vcmp.gt.f32.partialorder %v3541_v34, 0.0  ;;  %v3652_v38 = vsel %vm3620_vm0, %v3546_v23, %v3636_v12  ;;  %v4074_v23 = vld [vmem:[#allocation23 + $0x38] sm:$0xff] }
 0xdda   :  { %v3550_v19 = vpop.f32.mrf.mxu1 }
 0xddb   :  { %v3551_v16 = vadd.f32 %v9430_v39, %v3550_v19  ;;  %v3651_v28 = vsel %vm3619_vm1, %v3541_v34, %v3635_v14  ;;  %v3638_v7 = vmul.f32 0.2, %v3556_v43  ;;  %vm3622_vm2 = vcmp.gt.f32.partialorder %v3556_v43, 0.0 }
 0xddc   :  { %v7116_v13 = vpop.f32.mrf.mxu1  ;;  %7164 = vmatprep.mubr.f32.mxu0 %v3651_v28 }
 0xddd   :  { %v3637_v9 = vmul.f32 0.2, %v3551_v16  ;;  %v3566_v20 = vadd.f32 %v7116_v13, %v9430_v39  ;;  %7165 = vmatmul.mubr.f32.vlgmr.msra.gmra.mxu0 %v3652_v38  ;;  %vm3621_vm3 = vcmp.gt.f32.partialorder %v3551_v16, 0.0  ;;  %v3654_v55 = vsel %vm3622_vm2, %v3556_v43, %v3638_v7  ;;  %v4073_v43 = vld [vmem:[#allocation23 + $0x30] sm:$0xff]  ;;  %v4072_v38 = vld [vmem:[#allocation23 + $0x28] sm:$0xff] }
 0xdde   :  { %v3560_v61 = vpop.f32.mrf.mxu1  ;;  %7245 = vmatpush3.msra.mxu0 %v4082_v29  ;;  %v4077_v29 = vld [vmem:[#allocation23 + $0x50] sm:$0xff] }
 0xddf   :  { %v3561_v54 = vadd.f32 %v9430_v39, %v3560_v61  ;;  %7246 = vmatprep.subr.mxu0 %v4081_v44  ;;  %v3653_v33 = vsel %vm3621_vm3, %v3551_v16, %v3637_v9  ;;  %v3640_v47 = vmul.f32 0.2, %v3566_v20  ;;  %vm3624_vm4 = vcmp.gt.f32.partialorder %v3566_v20, 0.0  ;;  %v4071_v61 = vld [vmem:[#allocation23 + $0x20] sm:$0xff] }
 0xde0   :  { %v7119_v40 = vpop.f32.mrf.mxu1  ;;  %7167 = vmatprep.mubr.f32.mxu0 %v3653_v33  ;;  %7247 = vmatpush3.msra.mxu0 %v4081_v44 }
 0xde1   :  { %v3639_v48 = vmul.f32 0.2, %v3561_v54  ;;  %v3576_v18 = vadd.f32 %v7119_v40, %v9430_v39  ;;  %7168 = vmatmul.mubr.f32.gmra.mxu0 %v3654_v55  ;;  %7248 = vmatprep.subr.mxu0 %v4080_v15  ;;  %vm3623_vm5 = vcmp.gt.f32.partialorder %v3561_v54, 0.0  ;;  %v3656_v5 = vsel %vm3624_vm4, %v3566_v20, %v3640_v47  ;;  %v4070_v47 = vld [vmem:[#allocation23 + $0x18] sm:$0xff] }
 0xde2   :  { %v3570_v58 = vpop.f32.mrf.mxu1  ;;  %7249 = vmatpush3.msra.mxu0 %v4080_v15 }
 0xde3   :  { %v3571_v26 = vadd.f32 %v9430_v39, %v3570_v58  ;;  %7250 = vmatprep.subr.mxu0 %v4079_v30  ;;  %v3655_v60 = vsel %vm3623_vm5, %v3561_v54, %v3639_v48  ;;  %v3642_v35 = vmul.f32 0.2, %v3576_v18  ;;  %vm3626_vm6 = vcmp.gt.f32.partialorder %v3576_v18, 0.0 }
 0xde4   :  { %v7122_v53 = vpop.f32.mrf.mxu1  ;;  %7170 = vmatprep.mubr.f32.mxu0 %v3655_v60  ;;  %7251 = vmatpush3.msra.mxu0 %v4079_v30 }
 0xde5   :  { %v3641_v63 = vmul.f32 0.2, %v3571_v26  ;;  %v3586_v41 = vadd.f32 %v7122_v53, %v9430_v39  ;;  %7171 = vmatmul.mubr.f32.gmra.mxu0 %v3656_v5  ;;  %7252 = vmatprep.subr.mxu0 %v4078_v6  ;;  %vm3625_vm7 = vcmp.gt.f32.partialorder %v3571_v26, 0.0  ;;  %v3658_v52 = vsel %vm3626_vm6, %v3576_v18, %v3642_v35  ;;  %v4069_v18 = vld [vmem:[#allocation23 + $0x10] sm:$0xff] }
 0xde6   :  { %v3580_v46 = vpop.f32.mrf.mxu1  ;;  %7253 = vmatpush3.msra.mxu0 %v4078_v6  ;;  %v4068_v6 = vld [vmem:[#allocation23 + $0x8] sm:$0xff] }
 0xde7   :  { %v3581_v24 = vadd.f32 %v9430_v39, %v3580_v46  ;;  %7254 = vmatprep.subr.mxu0 %v4077_v29  ;;  %v3657_v49 = vsel %vm3625_vm7, %v3571_v26, %v3641_v63  ;;  %v3644_v51 = vmul.f32 0.2, %v3586_v41  ;;  %vm3628_vm8 = vcmp.gt.f32.partialorder %v3586_v41, 0.0 }
 0xde8   :  { %v7125_v3 = vpop.f32.mrf.mxu1  ;;  %7173 = vmatprep.mubr.f32.mxu0 %v3657_v49  ;;  %7255 = vmatpush3.msra.mxu0 %v4077_v29 }
 0xde9   :  { %v3643_v27 = vmul.f32 0.2, %v3581_v24  ;;  %v3596_v31 = vadd.f32 %v7125_v3, %v9430_v39  ;;  %7174 = vmatmul.mubr.f32.gmra.mxu0 %v3658_v52  ;;  %7256 = vmatprep.subr.mxu0 %v4076_v62  ;;  %vm3627_vm9 = vcmp.gt.f32.partialorder %v3581_v24, 0.0  ;;  %v3660_v14 = vsel %vm3628_vm8, %v3586_v41, %v3644_v51 }
 0xdea   :  { %v3590_v17 = vpop.f32.mrf.mxu1  ;;  %7257 = vmatpush3.msra.mxu0 %v4076_v62 }
 0xdeb   :  { %v3591_v0 = vadd.f32 %v9430_v39, %v3590_v17  ;;  %7258 = vmatprep.subr.mxu0 %v4075_v56  ;;  %v3659_v34 = vsel %vm3627_vm9, %v3581_v24, %v3643_v27  ;;  %v3646_v12 = vmul.f32 0.2, %v3596_v31  ;;  %vm3630_vm10 = vcmp.gt.f32.partialorder %v3596_v31, 0.0 }
 0xdec   :  { %v7128_v2 = vpop.f32.mrf.mxu1  ;;  %7176 = vmatprep.mubr.f32.mxu0 %v3659_v34  ;;  %7259 = vmatpush3.msra.mxu0 %v4075_v56 }
 0xded   :  { %v3645_v19 = vmul.f32 0.2, %v3591_v0  ;;  %v3606_v16 = vadd.f32 %v7128_v2, %v9430_v39  ;;  %7177 = vmatmul.mubr.f32.gmra.mxu0 %v3660_v14  ;;  %7260 = vmatprep.subr.mxu0 %v4074_v23  ;;  %vm3629_vm11 = vcmp.gt.f32.partialorder %v3591_v0, 0.0  ;;  %v3662_v20 = vsel %vm3630_vm10, %v3596_v31, %v3646_v12 }
 0xdee   :  { %v3600_v28 = vpop.f32.mrf.mxu1  ;;  %7261 = vmatpush3.msra.mxu0 %v4074_v23 }
 0xdef   :  { %v3601_v7 = vadd.f32 %v9430_v39, %v3600_v28  ;;  %7262 = vmatprep.subr.mxu0 %v4073_v43  ;;  %v3661_v13 = vsel %vm3629_vm11, %v3591_v0, %v3645_v19  ;;  %v3648_v44 = vmul.f32 0.2, %v3606_v16  ;;  %vm3632_vm12 = vcmp.gt.f32.partialorder %v3606_v16, 0.0 }
 0xdf0   :  { %v7131_v9 = vpop.f32.mrf.mxu1  ;;  %7179 = vmatprep.mubr.f32.mxu0 %v3661_v13  ;;  %7263 = vmatpush3.msra.mxu0 %v4073_v43 }
 0xdf1   :  { %v3647_v15 = vmul.f32 0.2, %v3601_v7  ;;  %v3616_v54 = vadd.f32 %v7131_v9, %v9430_v39  ;;  %7180 = vmatmul.mubr.f32.gmra.mxu0 %v3662_v20  ;;  %7264 = vmatprep.subr.mxu0 %v4072_v38  ;;  %vm3631_vm13 = vcmp.gt.f32.partialorder %v3601_v7, 0.0  ;;  %v3664_v48 = vsel %vm3632_vm12, %v3606_v16, %v3648_v44 }
 0xdf2   :  { %v3610_v33 = vpop.f32.mrf.mxu1  ;;  %7265 = vmatpush3.msra.mxu0 %v4072_v38 }
 0xdf3   :  { %v3611_v40 = vadd.f32 %v9430_v39, %v3610_v33  ;;  %7266 = vmatprep.subr.mxu0 %v4071_v61  ;;  %v3663_v55 = vsel %vm3631_vm13, %v3601_v7, %v3647_v15  ;;  %v3650_v30 = vmul.f32 0.2, %v3616_v54  ;;  %vm3634_vm14 = vcmp.gt.f32.partialorder %v3616_v54, 0.0  ;;  %v4067_v39 = vld [vmem:[#allocation23] sm:$0xff] }
 0xdf4   :  { %7182 = vmatprep.mubr.f32.mxu0 %v3663_v55  ;;  %7267 = vmatpush3.msra.mxu0 %v4071_v61 }
 0xdf5   :  { %v3649_v58 = vmul.f32 0.2, %v3611_v40  ;;  %7183 = vmatmul.mubr.f32.gmra.mxu0 %v3664_v48  ;;  %7268 = vmatprep.subr.mxu0 %v4070_v47  ;;  %vm3633_vm15 = vcmp.gt.f32.partialorder %v3611_v40, 0.0  ;;  %v3666_v60 = vsel %vm3634_vm14, %v3616_v54, %v3650_v30 }
 0xdf6   :  { %7269 = vmatpush3.msra.mxu0 %v4070_v47 }
 0xdf7   :  { %7270 = vmatprep.subr.mxu0 %v4069_v18  ;;  %v3665_v26 = vsel %vm3633_vm15, %v3611_v40, %v3649_v58 }
 0xdf8   :  { %7185 = vmatprep.mubr.f32.mxu0 %v3665_v26  ;;  %7271 = vmatpush3.msra.mxu0 %v4069_v18 }
 0xdf9   :  { %7186 = vmatmul.mubr.f32.gmra.mxu0 %v3666_v60  ;;  %7272 = vmatprep.subr.mxu0 %v4068_v6 }
 0xdfa   :  { %7273 = vmatpush3.msra.mxu0 %v4068_v6  ;;  %7276 = vmatprep.mubr.f32.mxu0 %v9309_v50  ;;  %v3885_v50 = vld [vmem:[#allocation17 + $0x10] sm:$0xff] }
 0xdfb   :  { %7274 = vmatprep.subr.mxu0 %v4067_v39 }
 0xdfc   :  { %7275 = vmatpush3.msra.mxu0 %v4067_v39 }
 0xdfd   :  { %7277 = vmatmul.mubr.f32.vlgmr.msra.gmra.mxu0 %v9301_v45  ;;  %v3886_v45 = vld [vmem:[#allocation17 + $0x18] sm:$0xff] }
 0xdfe   :  { %7279 = vmatprep.mubr.f32.mxu0 %v9321_v36  ;;  %7212 = vmatprep.subr.mxu1 %v3886_v45  ;;  %v3883_v36 = vld [vmem:[#allocation17] sm:$0xff] }
 0xdff   :  { %7213 = vmatpush3.msra.mxu1 %v3886_v45 }
 0xe00   :  { %7214 = vmatprep.subr.mxu1 %v3885_v50 }
 0xe01   :  { %7280 = vmatmul.mubr.f32.gmra.mxu0 %v9316_v10  ;;  %7215 = vmatpush3.msra.mxu1 %v3885_v50  ;;  %v3884_v10 = vld [vmem:[#allocation17 + $0x8] sm:$0xff] }
 0xe02   :  { %7282 = vmatprep.mubr.f32.mxu0 %v9335_v11  ;;  %7216 = vmatprep.subr.mxu1 %v3884_v10 }
 0xe03   :  { %7217 = vmatpush3.msra.mxu1 %v3884_v10 }
 0xe04   :  { %7218 = vmatprep.subr.mxu1 %v3883_v36 }
 0xe05   :  { %7283 = vmatmul.mubr.f32.gmra.mxu0 %v9330_v25  ;;  %7219 = vmatpush3.msra.mxu1 %v3883_v36  ;;  %v9469_v25 = vld [vmem:[%s9665_s3] ss:$0 sm:$0xff] }
 0xe06   :  { %7285 = vmatprep.mubr.f32.mxu0 %v9349_v22 }
 0xe09   :  { %7286 = vmatmul.mubr.f32.gmra.mxu0 %v9344_v32 }
 0xe0a   :  { %7288 = vmatprep.mubr.f32.mxu0 %v9363_v42 }
 0xe0d   :  { %7289 = vmatmul.mubr.f32.gmra.mxu0 %v9358_v21 }
 0xe0e   :  { %7291 = vmatprep.mubr.f32.mxu0 %v9377_v37 }
 0xe11   :  { %7292 = vmatmul.mubr.f32.gmra.mxu0 %v9372_v4 }
 0xe12   :  { %7294 = vmatprep.mubr.f32.mxu0 %v9391_v57 }
 0xe15   :  { %7295 = vmatmul.mubr.f32.gmra.mxu0 %v9386_v1 }
 0xe16   :  { %7297 = vmatprep.mubr.f32.mxu0 %v9402_v8 }
 0xe19   :  { %7298 = vmatmul.mubr.f32.gmra.mxu0 %v9399_v59 }
 0xe9d   :  { %v7166_v11 = vpop.f32.mrf.mxu0 }
 0xe9e   :  { %v3762_v32 = vadd.f32 %v7166_v11, %v9469_v25 }
 0xe9f   :  { %v3756_v22 = vpop.f32.mrf.mxu0 }
 0xea0   :  { %v3757_v21 = vadd.f32 %v9469_v25, %v3756_v22  ;;  %v3852_v42 = vmul.f32 0.2, %v3762_v32  ;;  %vm3836_vm0 = vcmp.gt.f32.partialorder %v3762_v32, 0.0 }
 0xea1   :  { %v7169_v4 = vpop.f32.mrf.mxu0 }
 0xea2   :  { %v3851_v37 = vmul.f32 0.2, %v3757_v21  ;;  %v3772_v1 = vadd.f32 %v7169_v4, %v9469_v25  ;;  %vm3835_vm1 = vcmp.gt.f32.partialorder %v3757_v21, 0.0  ;;  %v3868_v35 = vsel %vm3836_vm0, %v3762_v32, %v3852_v42  ;;  %v9487_v4 = vld [vmem:[#allocation3] sm:$0xff] }
 0xea3   :  { %v3766_v57 = vpop.f32.mrf.mxu0 }
 0xea4   :  { %v3767_v59 = vadd.f32 %v9469_v25, %v3766_v57  ;;  %v3867_v8 = vsel %vm3835_vm1, %v3757_v21, %v3851_v37  ;;  %v3854_v53 = vmul.f32 0.2, %v3772_v1  ;;  %vm3838_vm2 = vcmp.gt.f32.partialorder %v3772_v1, 0.0 }
 0xea5   :  { %v7172_v5 = vpop.f32.mrf.mxu0  ;;  %7220 = vmatprep.mubr.f32.mxu1 %v3867_v8 }
 0xea6   :  { %v3853_v29 = vmul.f32 0.2, %v3767_v59  ;;  %v3782_v63 = vadd.f32 %v7172_v5, %v9469_v25  ;;  %7221 = vmatmul.mubr.f32.vlgmr.msra.gmra.mxu1 %v3868_v35  ;;  %vm3837_vm3 = vcmp.gt.f32.partialorder %v3767_v59, 0.0  ;;  %v3870_v51 = vsel %vm3838_vm2, %v3772_v1, %v3854_v53 }
 0xea7   :  { %v3776_v41 = vpop.f32.mrf.mxu0 }
 0xea8   :  { %v3777_v46 = vadd.f32 %v9469_v25, %v3776_v41  ;;  %v3869_v62 = vsel %vm3837_vm3, %v3767_v59, %v3853_v29  ;;  %v3856_v24 = vmul.f32 0.2, %v3782_v63  ;;  %vm3840_vm4 = vcmp.gt.f32.partialorder %v3782_v63, 0.0 }
 0xea9   :  { %v7175_v49 = vpop.f32.mrf.mxu0  ;;  %7223 = vmatprep.mubr.f32.mxu1 %v3869_v62 }
 0xeaa   :  { %v3855_v3 = vmul.f32 0.2, %v3777_v46  ;;  %v3792_v52 = vadd.f32 %v7175_v49, %v9469_v25  ;;  %7224 = vmatmul.mubr.f32.gmra.mxu1 %v3870_v51  ;;  %vm3839_vm5 = vcmp.gt.f32.partialorder %v3777_v46, 0.0  ;;  %v3872_v0 = vsel %vm3840_vm4, %v3782_v63, %v3856_v24 }
 0xeab   :  { %v3786_v56 = vpop.f32.mrf.mxu0 }
 0xeac   :  { %v3787_v27 = vadd.f32 %v9469_v25, %v3786_v56  ;;  %v3871_v31 = vsel %vm3839_vm5, %v3777_v46, %v3855_v3  ;;  %v3858_v17 = vmul.f32 0.2, %v3792_v52  ;;  %vm3842_vm6 = vcmp.gt.f32.partialorder %v3792_v52, 0.0 }
 0xead   :  { %v7178_v23 = vpop.f32.mrf.mxu0  ;;  %7226 = vmatprep.mubr.f32.mxu1 %v3871_v31 }
 0xeae   :  { %v3857_v34 = vmul.f32 0.2, %v3787_v27  ;;  %v3802_v12 = vadd.f32 %v7178_v23, %v9469_v25  ;;  %7227 = vmatmul.mubr.f32.gmra.mxu1 %v3872_v0  ;;  %vm3841_vm7 = vcmp.gt.f32.partialorder %v3787_v27, 0.0  ;;  %v3874_v28 = vsel %vm3842_vm6, %v3792_v52, %v3858_v17 }
 0xeaf   :  { %v3796_v2 = vpop.f32.mrf.mxu0 }
 0xeb0   :  { %v3797_v14 = vadd.f32 %v9469_v25, %v3796_v2  ;;  %v3873_v43 = vsel %vm3841_vm7, %v3787_v27, %v3857_v34  ;;  %v3860_v19 = vmul.f32 0.2, %v3802_v12  ;;  %vm3844_vm8 = vcmp.gt.f32.partialorder %v3802_v12, 0.0 }
 0xeb1   :  { %v7181_v16 = vpop.f32.mrf.mxu0  ;;  %7229 = vmatprep.mubr.f32.mxu1 %v3873_v43  ;;  %v4403_v43 = vld [vmem:[#allocation25 + $0x70] sm:$0xff] }
 0xeb2   :  { %v3859_v38 = vmul.f32 0.2, %v3797_v14  ;;  %v3812_v7 = vadd.f32 %v7181_v16, %v9469_v25  ;;  %7230 = vmatmul.mubr.f32.gmra.mxu1 %v3874_v28  ;;  %vm3843_vm9 = vcmp.gt.f32.partialorder %v3797_v14, 0.0  ;;  %v3876_v15 = vsel %vm3844_vm8, %v3802_v12, %v3860_v19  ;;  %v9490_v19 = vld [vmem:[#allocation3 + $0x8] sm:$0xff]  ;;  %v9493_v16 = vld [vmem:[#allocation3 + $0x10] sm:$0xff] }
 0xeb3   :  { %v3806_v13 = vpop.f32.mrf.mxu0  ;;  %v4402_v28 = vld [vmem:[#allocation25 + $0x68] sm:$0xff] }
 0xeb4   :  { %v3807_v44 = vadd.f32 %v9469_v25, %v3806_v13  ;;  %v3875_v9 = vsel %vm3843_vm9, %v3797_v14, %v3859_v38  ;;  %v3862_v20 = vmul.f32 0.2, %v3812_v7  ;;  %vm3846_vm10 = vcmp.gt.f32.partialorder %v3812_v7, 0.0  ;;  %v4404_v14 = vld [vmem:[#allocation25 + $0x78] sm:$0xff]  ;;  %v4401_v38 = vld [vmem:[#allocation25 + $0x60] sm:$0xff] }
 0xeb5   :  { %v7184_v61 = vpop.f32.mrf.mxu0  ;;  %7232 = vmatprep.mubr.f32.mxu1 %v3875_v9  ;;  %7356 = vmatprep.subr.mxu0 %v4404_v14  ;;  %v9499_v13 = vld [vmem:[#allocation3 + $0x20] sm:$0xff]  ;;  %v4399_v9 = vld [vmem:[#allocation25 + $0x50] sm:$0xff] }
 0xeb6   :  { %v3861_v54 = vmul.f32 0.2, %v3807_v44  ;;  %v3822_v33 = vadd.f32 %v7184_v61, %v9469_v25  ;;  %7233 = vmatmul.mubr.f32.gmra.mxu1 %v3876_v15  ;;  %vm3845_vm11 = vcmp.gt.f32.partialorder %v3807_v44, 0.0  ;;  %v3878_v18 = vsel %vm3846_vm10, %v3812_v7, %v3862_v20  ;;  %7357 = vmatpush3.msra.mxu0 %v4404_v14  ;;  %v9496_v7 = vld [vmem:[#allocation3 + $0x18] sm:$0xff]  ;;  %v9502_v20 = vld [vmem:[#allocation3 + $0x28] sm:$0xff]  ;;  %v9505_v61 = vld [vmem:[#allocation3 + $0x30] sm:$0xff] }
 0xeb7   :  { %v3816_v47 = vpop.f32.mrf.mxu0  ;;  %7358 = vmatprep.subr.mxu0 %v4403_v43  ;;  %v4398_v15 = vld [vmem:[#allocation25 + $0x48] sm:$0xff] }
 0xeb8   :  { %v3817_v40 = vadd.f32 %v9469_v25, %v3816_v47  ;;  %v3877_v55 = vsel %vm3845_vm11, %v3807_v44, %v3861_v54  ;;  %v3864_v30 = vmul.f32 0.2, %v3822_v33  ;;  %vm3848_vm12 = vcmp.gt.f32.partialorder %v3822_v33, 0.0  ;;  %7359 = vmatpush3.msra.mxu0 %v4403_v43  ;;  %v4400_v44 = vld [vmem:[#allocation25 + $0x58] sm:$0xff]  ;;  %v4397_v54 = vld [vmem:[#allocation25 + $0x40] sm:$0xff] }
 0xeb9   :  { %v7187_v48 = vpop.f32.mrf.mxu0  ;;  %7235 = vmatprep.mubr.f32.mxu1 %v3877_v55  ;;  %7360 = vmatprep.subr.mxu0 %v4402_v28  ;;  %v9511_v47 = vld [vmem:[#allocation3 + $0x40] sm:$0xff]  ;;  %v4395_v55 = vld [vmem:[#allocation25 + $0x30] sm:$0xff] }
 0xeba   :  { %v3863_v58 = vmul.f32 0.2, %v3817_v40  ;;  %v3832_v6 = vadd.f32 %v7187_v48, %v9469_v25  ;;  %7236 = vmatmul.mubr.f32.gmra.mxu1 %v3878_v18  ;;  %vm3847_vm13 = vcmp.gt.f32.partialorder %v3817_v40, 0.0  ;;  %v3880_v10 = vsel %vm3848_vm12, %v3822_v33, %v3864_v30  ;;  %7361 = vmatpush3.msra.mxu0 %v4402_v28  ;;  %v9508_v33 = vld [vmem:[#allocation3 + $0x38] sm:$0xff]  ;;  %v9514_v30 = vld [vmem:[#allocation3 + $0x48] sm:$0xff]  ;;  %v9517_v48 = vld [vmem:[#allocation3 + $0x50] sm:$0xff] }
 0xebb   :  { %v3826_v26 = vpop.f32.mrf.mxu0  ;;  %7362 = vmatprep.subr.mxu0 %v4401_v38  ;;  %v4394_v18 = vld [vmem:[#allocation25 + $0x28] sm:$0xff] }
 0xebc   :  { %v3827_v60 = vadd.f32 %v9469_v25, %v3826_v26  ;;  %v3879_v39 = vsel %vm3847_vm13, %v3817_v40, %v3863_v58  ;;  %v3866_v45 = vmul.f32 0.2, %v3832_v6  ;;  %vm3850_vm14 = vcmp.gt.f32.partialorder %v3832_v6, 0.0  ;;  %7363 = vmatpush3.msra.mxu0 %v4401_v38  ;;  %v4396_v40 = vld [vmem:[#allocation25 + $0x38] sm:$0xff]  ;;  %v4393_v58 = vld [vmem:[#allocation25 + $0x20] sm:$0xff] }
 0xebd   :  { %7238 = vmatprep.mubr.f32.mxu1 %v3879_v39  ;;  %v7278_v50 = vpop.f32.mrf.mxu0  ;;  %7364 = vmatprep.subr.mxu0 %v4400_v44  ;;  %v9523_v26 = vld [vmem:[#allocation3 + $0x60] sm:$0xff]  ;;  %v4391_v39 = vld [vmem:[#allocation25 + $0x10] sm:$0xff] }
 0xebe   :  { %v3865_v36 = vmul.f32 0.2, %v3827_v60  ;;  %7239 = vmatmul.mubr.f32.gmra.mxu1 %v3880_v10  ;;  %vm3849_vm15 = vcmp.gt.f32.partialorder %v3827_v60, 0.0  ;;  %v3882_v21 = vsel %vm3850_vm14, %v3832_v6, %v3866_v45  ;;  %7365 = vmatpush3.msra.mxu0 %v4400_v44  ;;  %v9520_v6 = vld [vmem:[#allocation3 + $0x58] sm:$0xff]  ;;  %v9526_v45 = vld [vmem:[#allocation3 + $0x68] sm:$0xff] }
 0xebf   :  { %v4149_v11 = vpop.f32.mrf.mxu0  ;;  %7366 = vmatprep.subr.mxu0 %v4399_v9  ;;  %v9532_v10 = vld [vmem:[#allocation3 + $0x78] sm:$0xff] }
 0xec0   :  { %v3881_v32 = vsel %vm3849_vm15, %v3827_v60, %v3865_v36  ;;  %7367 = vmatpush3.msra.mxu0 %v4399_v9  ;;  %v4392_v60 = vld [vmem:[#allocation25 + $0x18] sm:$0xff]  ;;  %v4390_v36 = vld [vmem:[#allocation25 + $0x8] sm:$0xff] }
 0xec1   :  { %7241 = vmatprep.mubr.f32.mxu1 %v3881_v32  ;;  %v7281_v22 = vpop.f32.mrf.mxu0  ;;  %7368 = vmatprep.subr.mxu0 %v4398_v15  ;;  %v5419_v32 = vld [vmem:[%s9666_s20] ss:$0 sm:$0xff] }
 0xec2   :  { %7242 = vmatmul.mubr.f32.gmra.mxu1 %v3882_v21  ;;  %7369 = vmatpush3.msra.mxu0 %v4398_v15 }
 0xec3   :  { %v4159_v42 = vpop.f32.mrf.mxu0  ;;  %7332 = vmatprep.mubr.f32.mxu1 %v9487_v4  ;;  %7370 = vmatprep.subr.mxu0 %v4397_v54 }
 0xec4   :  { %7371 = vmatpush3.msra.mxu0 %v4397_v54 }
 0xec5   :  { %v7284_v25 = vpop.f32.mrf.mxu0  ;;  %7372 = vmatprep.subr.mxu0 %v4396_v40 }
 0xec6   :  { %7373 = vmatpush3.msra.mxu0 %v4396_v40 }
 0xec7   :  { %v4169_v37 = vpop.f32.mrf.mxu0  ;;  %7374 = vmatprep.subr.mxu0 %v4395_v55 }
 0xec8   :  { %7375 = vmatpush3.msra.mxu0 %v4395_v55 }
 0xec9   :  { %v7287_v1 = vpop.f32.mrf.mxu0  ;;  %7376 = vmatprep.subr.mxu0 %v4394_v18 }
 0xeca   :  { %7377 = vmatpush3.msra.mxu0 %v4394_v18 }
 0xecb   :  { %v4179_v57 = vpop.f32.mrf.mxu0  ;;  %7378 = vmatprep.subr.mxu0 %v4393_v58 }
 0xecc   :  { %7379 = vmatpush3.msra.mxu0 %v4393_v58 }
 0xecd   :  { %v7290_v59 = vpop.f32.mrf.mxu0  ;;  %7380 = vmatprep.subr.mxu0 %v4392_v60 }
 0xece   :  { %7381 = vmatpush3.msra.mxu0 %v4392_v60 }
 0xecf   :  { %v4189_v8 = vpop.f32.mrf.mxu0  ;;  %7382 = vmatprep.subr.mxu0 %v4391_v39 }
 0xed0   :  { %7383 = vmatpush3.msra.mxu0 %v4391_v39 }
 0xed1   :  { %v7293_v35 = vpop.f32.mrf.mxu0  ;;  %7384 = vmatprep.subr.mxu0 %v4390_v36 }
 0xed2   :  { %7385 = vmatpush3.msra.mxu0 %v4390_v36 }
 0xed3   :  { %v4199_v53 = vpop.f32.mrf.mxu0 }
 0xed5   :  { %v7296_v5 = vpop.f32.mrf.mxu0 }
 0xed7   :  { %v4209_v29 = vpop.f32.mrf.mxu0 }
 0xed9   :  { %v7299_v63 = vpop.f32.mrf.mxu0 }
 0xeda   :  { %7880 = vtanh.f32 %v7299_v63 }
 0xedb   :  { %v4219_v41 = vpop.f32.mrf.mxu0 }
 0xedc   :  { %7882 = vtanh.f32 %v4219_v41 }
 0xedd   :  { %7884 = vtanh.f32 %v7296_v5 }
 0xede   :  { %7886 = vtanh.f32 %v4209_v29 }
 0xedf   :  { %7888 = vtanh.f32 %v7293_v35 }
 0xee0   :  { %7890 = vtanh.f32 %v4199_v53 }
 0xee1   :  { %7892 = vtanh.f32 %v7290_v59 }
 0xee2   :  { %7894 = vtanh.f32 %v4189_v8 }
 0xee3   :  { %7896 = vtanh.f32 %v7287_v1 }
 0xee4   :  { %7898 = vtanh.f32 %v4179_v57 }
 0xee5   :  { %7900 = vtanh.f32 %v7284_v25 }
 0xee6   :  { %7902 = vtanh.f32 %v4169_v37 }
 0xee7   :  { %v7881_v46 = vpop.eup %7880  ;;  %7904 = vtanh.f32 %v7281_v22 }
 0xee8   :  { %7300 = vmatprep.subr.mxu1 %v7881_v46  ;;  %7906 = vtanh.f32 %v4159_v42 }
 0xee9   :  { %v7883_v62 = vpop.eup %7882  ;;  %7301 = vmatpush3.msra.mxu1 %v7881_v46  ;;  %7908 = vtanh.f32 %v7278_v50  ;;  %v9529_v50 = vld [vmem:[#allocation3 + $0x70] sm:$0xff] }
 0xeea   :  { %7302 = vmatprep.subr.mxu1 %v7883_v62  ;;  %v7885_v24 = vpop.eup %7884  ;;  %7910 = vtanh.f32 %v4149_v11  ;;  %v4389_v11 = vld [vmem:[#allocation25] sm:$0xff] }
 0xeeb   :  { %7303 = vmatpush3.msra.mxu1 %v7883_v62  ;;  %v7887_v49 = vpop.eup %7886  ;;  %7386 = vmatprep.subr.mxu0 %v4389_v11 }
 0xeec   :  { %7304 = vmatprep.subr.mxu1 %v7885_v24  ;;  %v7889_v51 = vpop.eup %7888  ;;  %7387 = vmatpush3.msra.mxu0 %v4389_v11 }
 0xeed   :  { %7305 = vmatpush3.msra.mxu1 %v7885_v24  ;;  %v7891_v3 = vpop.eup %7890 }
 0xeee   :  { %7306 = vmatprep.subr.mxu1 %v7887_v49  ;;  %v7893_v52 = vpop.eup %7892 }
 0xeef   :  { %7307 = vmatpush3.msra.mxu1 %v7887_v49  ;;  %v7895_v56 = vpop.eup %7894 }
 0xef0   :  { %7308 = vmatprep.subr.mxu1 %v7889_v51  ;;  %v7897_v27 = vpop.eup %7896 }
 0xef1   :  { %7309 = vmatpush3.msra.mxu1 %v7889_v51  ;;  %v7899_v31 = vpop.eup %7898 }
 0xef2   :  { %7310 = vmatprep.subr.mxu1 %v7891_v3  ;;  %v7901_v17 = vpop.eup %7900 }
 0xef3   :  { %7311 = vmatpush3.msra.mxu1 %v7891_v3  ;;  %v7903_v23 = vpop.eup %7902 }
 0xef4   :  { %7312 = vmatprep.subr.mxu1 %v7893_v52  ;;  %v7905_v0 = vpop.eup %7904 }
 0xef5   :  { %7313 = vmatpush3.msra.mxu1 %v7893_v52  ;;  %v7907_v34 = vpop.eup %7906 }
 0xef6   :  { %7314 = vmatprep.subr.mxu1 %v7895_v56  ;;  %v7909_v12 = vpop.eup %7908 }
 0xef7   :  { %7315 = vmatpush3.msra.mxu1 %v7895_v56  ;;  %v7911_v2 = vpop.eup %7910 }
 0xef8   :  { %7316 = vmatprep.subr.mxu1 %v7897_v27 }
 0xef9   :  { %7317 = vmatpush3.msra.mxu1 %v7897_v27 }
 0xefa   :  { %7318 = vmatprep.subr.mxu1 %v7899_v31 }
 0xefb   :  { %7319 = vmatpush3.msra.mxu1 %v7899_v31 }
 0xefc   :  { %7320 = vmatprep.subr.mxu1 %v7901_v17 }
 0xefd   :  { %7321 = vmatpush3.msra.mxu1 %v7901_v17 }
 0xefe   :  { %7322 = vmatprep.subr.mxu1 %v7903_v23 }
 0xeff   :  { %7323 = vmatpush3.msra.mxu1 %v7903_v23 }
 0xf00   :  { %7324 = vmatprep.subr.mxu1 %v7905_v0 }
 0xf01   :  { %7325 = vmatpush3.msra.mxu1 %v7905_v0 }
 0xf02   :  { %7326 = vmatprep.subr.mxu1 %v7907_v34 }
 0xf03   :  { %7327 = vmatpush3.msra.mxu1 %v7907_v34 }
 0xf04   :  { %7328 = vmatprep.subr.mxu1 %v7909_v12 }
 0xf05   :  { %7329 = vmatpush3.msra.mxu1 %v7909_v12 }
 0xf06   :  { %7330 = vmatprep.subr.mxu1 %v7911_v2 }
 0xf07   :  { %7331 = vmatpush3.msra.mxu1 %v7911_v2 }
 0xf08   :  { %7333 = vmatmul.mubr.f32.vlgmr.msra.gmra.mxu1 %v9490_v19 }
 0xf09   :  { %7335 = vmatprep.mubr.f32.mxu1 %v9493_v16 }
 0xf0c   :  { %7336 = vmatmul.mubr.f32.gmra.mxu1 %v9496_v7 }
 0xf0d   :  { %7338 = vmatprep.mubr.f32.mxu1 %v9499_v13 }
 0xf10   :  { %7339 = vmatmul.mubr.f32.gmra.mxu1 %v9502_v20 }
 0xf11   :  { %7341 = vmatprep.mubr.f32.mxu1 %v9505_v61 }
 0xf14   :  { %7342 = vmatmul.mubr.f32.gmra.mxu1 %v9508_v33 }
 0xf15   :  { %7344 = vmatprep.mubr.f32.mxu1 %v9511_v47 }
 0xf18   :  { %7345 = vmatmul.mubr.f32.gmra.mxu1 %v9514_v30 }
 0xf19   :  { %7347 = vmatprep.mubr.f32.mxu1 %v9517_v48 }
 0xf1c   :  { %7348 = vmatmul.mubr.f32.gmra.mxu1 %v9520_v6 }
 0xf1d   :  { %7350 = vmatprep.mubr.f32.mxu1 %v9523_v26 }
 0xf20   :  { %7351 = vmatmul.mubr.f32.gmra.mxu1 %v9526_v45 }
 0xf21   :  { %7353 = vmatprep.mubr.f32.mxu1 %v9529_v50 }
 0xf24   :  { %7354 = vmatmul.mubr.f32.gmra.mxu1 %v9532_v10 }
 0xf25   :  { %7444 = vmatprep.mubr.f32.mxu1 %v9487_v4 }
 0xf66   :  { %v7222_v22 = vpop.f32.mrf.mxu1 }
 0xf67   :  { %v3978_v21 = vadd.f32 %v7222_v22, %v5419_v32  ;;  %v4726_v22 = vld [vmem:[#allocation26 + $0x78] sm:$0xff] }
 0xf68   :  { %v3972_v42 = vpop.f32.mrf.mxu1  ;;  %7468 = vmatprep.subr.mxu0 %v4726_v22 }
 0xf69   :  { %4052 = vst [vmem:[%s8598_s13 + $0x8] sm:$0xff] %v3978_v21  ;;  %v3973_v25 = vadd.f32 %v5419_v32, %v3972_v42  ;;  %v4725_v21 = vld [vmem:[#allocation26 + $0x70] sm:$0xff]  ;;  %v4724_v42 = vld [vmem:[#allocation26 + $0x68] sm:$0xff] }
 0xf6a   :  { %v7225_v37 = vpop.f32.mrf.mxu1 }
 0xf6b   :  { %4051 = vst [vmem:[%s8598_s13] sm:$0xff] %v3973_v25  ;;  %v3988_v1 = vadd.f32 %v7225_v37, %v5419_v32  ;;  %v4723_v25 = vld [vmem:[#allocation26 + $0x60] sm:$0xff]  ;;  %v4722_v37 = vld [vmem:[#allocation26 + $0x58] sm:$0xff] }
 0xf6c   :  { %v3982_v57 = vpop.f32.mrf.mxu1 }
 0xf6d   :  { %4054 = vst [vmem:[%s8598_s13 + $0x18] sm:$0xff] %v3988_v1  ;;  %v3983_v59 = vadd.f32 %v5419_v32, %v3982_v57  ;;  %v4721_v1 = vld [vmem:[#allocation26 + $0x50] sm:$0xff]  ;;  %v4720_v57 = vld [vmem:[#allocation26 + $0x48] sm:$0xff] }
 0xf6e   :  { %v7228_v8 = vpop.f32.mrf.mxu1 }
 0xf6f   :  { %4053 = vst [vmem:[%s8598_s13 + $0x10] sm:$0xff] %v3983_v59  ;;  %v3998_v35 = vadd.f32 %v7228_v8, %v5419_v32  ;;  %v4719_v59 = vld [vmem:[#allocation26 + $0x40] sm:$0xff]  ;;  %v4718_v8 = vld [vmem:[#allocation26 + $0x38] sm:$0xff] }
 0xf70   :  { %v3992_v53 = vpop.f32.mrf.mxu1 }
 0xf71   :  { %4056 = vst [vmem:[%s8598_s13 + $0x28] sm:$0xff] %v3998_v35  ;;  %v3993_v5 = vadd.f32 %v5419_v32, %v3992_v53  ;;  %v4717_v35 = vld [vmem:[#allocation26 + $0x30] sm:$0xff]  ;;  %v4716_v53 = vld [vmem:[#allocation26 + $0x28] sm:$0xff] }
 0xf72   :  { %v7231_v29 = vpop.f32.mrf.mxu1 }
 0xf73   :  { %4055 = vst [vmem:[%s8598_s13 + $0x20] sm:$0xff] %v3993_v5  ;;  %v4008_v63 = vadd.f32 %v7231_v29, %v5419_v32  ;;  %v4715_v5 = vld [vmem:[#allocation26 + $0x20] sm:$0xff]  ;;  %v4714_v29 = vld [vmem:[#allocation26 + $0x18] sm:$0xff] }
 0xf74   :  { %v4002_v41 = vpop.f32.mrf.mxu1 }
 0xf75   :  { %4058 = vst [vmem:[%s8598_s13 + $0x38] sm:$0xff] %v4008_v63  ;;  %v4003_v46 = vadd.f32 %v5419_v32, %v4002_v41  ;;  %v4713_v63 = vld [vmem:[#allocation26 + $0x10] sm:$0xff] }
 0xf76   :  { %v7234_v62 = vpop.f32.mrf.mxu1 }
 0xf77   :  { %4057 = vst [vmem:[%s8598_s13 + $0x30] sm:$0xff] %v4003_v46  ;;  %v4018_v24 = vadd.f32 %v7234_v62, %v5419_v32 }
 0xf78   :  { %v4012_v49 = vpop.f32.mrf.mxu1 }
 0xf79   :  { %4060 = vst [vmem:[%s8598_s13 + $0x48] sm:$0xff] %v4018_v24  ;;  %v4013_v51 = vadd.f32 %v5419_v32, %v4012_v49 }
 0xf7a   :  { %v7237_v3 = vpop.f32.mrf.mxu1 }
 0xf7b   :  { %4059 = vst [vmem:[%s8598_s13 + $0x40] sm:$0xff] %v4013_v51  ;;  %v4028_v52 = vadd.f32 %v7237_v3, %v5419_v32 }
 0xf7c   :  { %v4022_v56 = vpop.f32.mrf.mxu1 }
 0xf7d   :  { %4062 = vst [vmem:[%s8598_s13 + $0x58] sm:$0xff] %v4028_v52  ;;  %v4023_v27 = vadd.f32 %v5419_v32, %v4022_v56 }
 0xf7e   :  { %v7240_v31 = vpop.f32.mrf.mxu1 }
 0xf7f   :  { %4061 = vst [vmem:[%s8598_s13 + $0x50] sm:$0xff] %v4023_v27  ;;  %v4038_v17 = vadd.f32 %v7240_v31, %v5419_v32 }
 0xf80   :  { %v4032_v23 = vpop.f32.mrf.mxu1 }
 0xf81   :  { %4064 = vst [vmem:[%s8598_s13 + $0x68] sm:$0xff] %v4038_v17  ;;  %v4033_v0 = vadd.f32 %v5419_v32, %v4032_v23 }
 0xf82   :  { %v7243_v34 = vpop.f32.mrf.mxu1 }
 0xf83   :  { %4063 = vst [vmem:[%s8598_s13 + $0x60] sm:$0xff] %v4033_v0  ;;  %v4048_v12 = vadd.f32 %v7243_v34, %v5419_v32 }
 0xf84   :  { %v4042_v2 = vpop.f32.mrf.mxu1 }
 0xf85   :  { %4066 = vst [vmem:[%s8598_s13 + $0x78] sm:$0xff] %v4048_v12  ;;  %v4043_v14 = vadd.f32 %v5419_v32, %v4042_v2 }
 0xf87   :  { %4065 = vst [vmem:[%s8598_s13 + $0x70] sm:$0xff] %v4043_v14 }
 0xfc8   :  { %v7334_v43 = vpop.f32.mrf.mxu1 }
 0xfca   :  { %v4310_v28 = vpop.f32.mrf.mxu1 }
 0xfcb   :  { %7388 = vmatprep.mubr.f32.mxu0 %v4310_v28 }
 0xfcc   :  { %v7337_v38 = vpop.f32.mrf.mxu1  ;;  %7389 = vmatmul.mubr.f32.vlgmr.msra.gmra.mxu0 %v7334_v43 }
 0xfcd   :  { %7469 = vmatpush3.msra.mxu0 %v4726_v22 }
 0xfce   :  { %v4320_v44 = vpop.f32.mrf.mxu1  ;;  %7470 = vmatprep.subr.mxu0 %v4725_v21 }
 0xfcf   :  { %7391 = vmatprep.mubr.f32.mxu0 %v4320_v44  ;;  %7471 = vmatpush3.msra.mxu0 %v4725_v21 }
 0xfd0   :  { %v7340_v9 = vpop.f32.mrf.mxu1  ;;  %7392 = vmatmul.mubr.f32.gmra.mxu0 %v7337_v38  ;;  %7472 = vmatprep.subr.mxu0 %v4724_v42 }
 0xfd1   :  { %7473 = vmatpush3.msra.mxu0 %v4724_v42 }
 0xfd2   :  { %v4330_v15 = vpop.f32.mrf.mxu1  ;;  %7474 = vmatprep.subr.mxu0 %v4723_v25 }
 0xfd3   :  { %7394 = vmatprep.mubr.f32.mxu0 %v4330_v15  ;;  %7475 = vmatpush3.msra.mxu0 %v4723_v25 }
 0xfd4   :  { %v7343_v54 = vpop.f32.mrf.mxu1  ;;  %7395 = vmatmul.mubr.f32.gmra.mxu0 %v7340_v9  ;;  %7476 = vmatprep.subr.mxu0 %v4722_v37 }
 0xfd5   :  { %7477 = vmatpush3.msra.mxu0 %v4722_v37 }
 0xfd6   :  { %v4340_v40 = vpop.f32.mrf.mxu1  ;;  %7478 = vmatprep.subr.mxu0 %v4721_v1 }
 0xfd7   :  { %7397 = vmatprep.mubr.f32.mxu0 %v4340_v40  ;;  %7479 = vmatpush3.msra.mxu0 %v4721_v1 }
 0xfd8   :  { %v7346_v55 = vpop.f32.mrf.mxu1  ;;  %7398 = vmatmul.mubr.f32.gmra.mxu0 %v7343_v54  ;;  %7480 = vmatprep.subr.mxu0 %v4720_v57 }
 0xfd9   :  { %7481 = vmatpush3.msra.mxu0 %v4720_v57 }
 0xfda   :  { %v4350_v18 = vpop.f32.mrf.mxu1  ;;  %7482 = vmatprep.subr.mxu0 %v4719_v59 }
 0xfdb   :  { %7400 = vmatprep.mubr.f32.mxu0 %v4350_v18  ;;  %7483 = vmatpush3.msra.mxu0 %v4719_v59 }
 0xfdc   :  { %v7349_v58 = vpop.f32.mrf.mxu1  ;;  %7401 = vmatmul.mubr.f32.gmra.mxu0 %v7346_v55  ;;  %7484 = vmatprep.subr.mxu0 %v4718_v8 }
 0xfdd   :  { %7485 = vmatpush3.msra.mxu0 %v4718_v8 }
 0xfde   :  { %v4360_v60 = vpop.f32.mrf.mxu1  ;;  %7486 = vmatprep.subr.mxu0 %v4717_v35 }
 0xfdf   :  { %7403 = vmatprep.mubr.f32.mxu0 %v4360_v60  ;;  %7487 = vmatpush3.msra.mxu0 %v4717_v35 }
 0xfe0   :  { %v7352_v39 = vpop.f32.mrf.mxu1  ;;  %7404 = vmatmul.mubr.f32.gmra.mxu0 %v7349_v58  ;;  %7488 = vmatprep.subr.mxu0 %v4716_v53 }
 0xfe1   :  { %7489 = vmatpush3.msra.mxu0 %v4716_v53 }
 0xfe2   :  { %v4370_v36 = vpop.f32.mrf.mxu1  ;;  %7490 = vmatprep.subr.mxu0 %v4715_v5 }
 0xfe3   :  { %7406 = vmatprep.mubr.f32.mxu0 %v4370_v36  ;;  %7491 = vmatpush3.msra.mxu0 %v4715_v5 }
 0xfe4   :  { %v7355_v11 = vpop.f32.mrf.mxu1  ;;  %7407 = vmatmul.mubr.f32.gmra.mxu0 %v7352_v39  ;;  %7492 = vmatprep.subr.mxu0 %v4714_v29 }
 0xfe5   :  { %7493 = vmatpush3.msra.mxu0 %v4714_v29 }
 0xfe6   :  { %v4380_v32 = vpop.f32.mrf.mxu1  ;;  %7494 = vmatprep.subr.mxu0 %v4713_v63 }
 0xfe7   :  { %7409 = vmatprep.mubr.f32.mxu0 %v4380_v32  ;;  %7495 = vmatpush3.msra.mxu0 %v4713_v63  ;;  %v4711_v32 = vld [vmem:[#allocation26] sm:$0xff] }
 0xfe8   :  { %7410 = vmatmul.mubr.f32.gmra.mxu0 %v7355_v11  ;;  %v4712_v11 = vld [vmem:[#allocation26 + $0x8] sm:$0xff] }
 0xfe9   :  { %7496 = vmatprep.subr.mxu0 %v4712_v11 }
 0xfea   :  { %7497 = vmatpush3.msra.mxu0 %v4712_v11 }
 0xfeb   :  { %7498 = vmatprep.subr.mxu0 %v4711_v32 }
 0xfec   :  { %7499 = vmatpush3.msra.mxu0 %v4711_v32 }
0x108c   :  { %v7390_v41 = vpop.f32.mrf.mxu0 }
0x108e   :  { %v4471_v46 = vpop.f32.mrf.mxu0 }
0x1090   :  { %v7393_v62 = vpop.f32.mrf.mxu0 }
0x1092   :  { %v4481_v24 = vpop.f32.mrf.mxu0 }
0x1094   :  { %v7396_v49 = vpop.f32.mrf.mxu0 }
0x1096   :  { %v4491_v51 = vpop.f32.mrf.mxu0 }
0x1098   :  { %v7399_v3 = vpop.f32.mrf.mxu0 }
0x109a   :  { %v4501_v52 = vpop.f32.mrf.mxu0 }
0x109c   :  { %v7402_v56 = vpop.f32.mrf.mxu0 }
0x109e   :  { %v4511_v27 = vpop.f32.mrf.mxu0 }
0x10a0   :  { %v7405_v31 = vpop.f32.mrf.mxu0 }
0x10a2   :  { %v4521_v17 = vpop.f32.mrf.mxu0 }
0x10a4   :  { %v7408_v23 = vpop.f32.mrf.mxu0 }
0x10a6   :  { %v4531_v0 = vpop.f32.mrf.mxu0 }
0x10a8   :  { %v7411_v34 = vpop.f32.mrf.mxu0 }
0x10a9   :  { %7912 = vtanh.f32 %v7411_v34 }
0x10aa   :  { %v4541_v12 = vpop.f32.mrf.mxu0 }
0x10ab   :  { %7914 = vtanh.f32 %v4541_v12 }
0x10ac   :  { %7916 = vtanh.f32 %v7408_v23 }
0x10ad   :  { %7918 = vtanh.f32 %v4531_v0 }
0x10ae   :  { %7920 = vtanh.f32 %v7405_v31 }
0x10af   :  { %7922 = vtanh.f32 %v4521_v17 }
0x10b0   :  { %7924 = vtanh.f32 %v7402_v56 }
0x10b1   :  { %7926 = vtanh.f32 %v4511_v27 }
0x10b2   :  { %7928 = vtanh.f32 %v7399_v3 }
0x10b3   :  { %7930 = vtanh.f32 %v4501_v52 }
0x10b4   :  { %7932 = vtanh.f32 %v7396_v49 }
0x10b5   :  { %7934 = vtanh.f32 %v4491_v51 }
0x10b6   :  { %v7913_v2 = vpop.eup %7912  ;;  %7936 = vtanh.f32 %v7393_v62 }
0x10b7   :  { %7412 = vmatprep.subr.mxu1 %v7913_v2  ;;  %7938 = vtanh.f32 %v4481_v24 }
0x10b8   :  { %v7915_v14 = vpop.eup %7914  ;;  %7413 = vmatpush3.msra.mxu1 %v7913_v2  ;;  %7940 = vtanh.f32 %v7390_v41 }
0x10b9   :  { %7414 = vmatprep.subr.mxu1 %v7915_v14  ;;  %v7917_v43 = vpop.eup %7916  ;;  %7942 = vtanh.f32 %v4471_v46 }
0x10ba   :  { %7415 = vmatpush3.msra.mxu1 %v7915_v14  ;;  %v7919_v28 = vpop.eup %7918 }
0x10bb   :  { %7416 = vmatprep.subr.mxu1 %v7917_v43  ;;  %v7921_v38 = vpop.eup %7920 }
0x10bc   :  { %7417 = vmatpush3.msra.mxu1 %v7917_v43  ;;  %v7923_v44 = vpop.eup %7922 }
0x10bd   :  { %7418 = vmatprep.subr.mxu1 %v7919_v28  ;;  %v7925_v9 = vpop.eup %7924 }
0x10be   :  { %7419 = vmatpush3.msra.mxu1 %v7919_v28  ;;  %v7927_v15 = vpop.eup %7926 }
0x10bf   :  { %7420 = vmatprep.subr.mxu1 %v7921_v38  ;;  %v7929_v54 = vpop.eup %7928 }
0x10c0   :  { %7421 = vmatpush3.msra.mxu1 %v7921_v38  ;;  %v7931_v40 = vpop.eup %7930 }
0x10c1   :  { %7422 = vmatprep.subr.mxu1 %v7923_v44  ;;  %v7933_v55 = vpop.eup %7932 }
0x10c2   :  { %7423 = vmatpush3.msra.mxu1 %v7923_v44  ;;  %v7935_v18 = vpop.eup %7934 }
0x10c3   :  { %7424 = vmatprep.subr.mxu1 %v7925_v9  ;;  %v7937_v58 = vpop.eup %7936 }
0x10c4   :  { %7425 = vmatpush3.msra.mxu1 %v7925_v9  ;;  %v7939_v60 = vpop.eup %7938 }
0x10c5   :  { %7426 = vmatprep.subr.mxu1 %v7927_v15  ;;  %v7941_v39 = vpop.eup %7940 }
0x10c6   :  { %7427 = vmatpush3.msra.mxu1 %v7927_v15  ;;  %v7943_v36 = vpop.eup %7942 }
0x10c7   :  { %7428 = vmatprep.subr.mxu1 %v7929_v54 }
0x10c8   :  { %7429 = vmatpush3.msra.mxu1 %v7929_v54 }
0x10c9   :  { %7430 = vmatprep.subr.mxu1 %v7931_v40 }
0x10ca   :  { %7431 = vmatpush3.msra.mxu1 %v7931_v40 }
0x10cb   :  { %7432 = vmatprep.subr.mxu1 %v7933_v55 }
0x10cc   :  { %7433 = vmatpush3.msra.mxu1 %v7933_v55 }
0x10cd   :  { %7434 = vmatprep.subr.mxu1 %v7935_v18 }
0x10ce   :  { %7435 = vmatpush3.msra.mxu1 %v7935_v18 }
0x10cf   :  { %7436 = vmatprep.subr.mxu1 %v7937_v58 }
0x10d0   :  { %7437 = vmatpush3.msra.mxu1 %v7937_v58 }
0x10d1   :  { %7438 = vmatprep.subr.mxu1 %v7939_v60 }
0x10d2   :  { %7439 = vmatpush3.msra.mxu1 %v7939_v60 }
0x10d3   :  { %7440 = vmatprep.subr.mxu1 %v7941_v39 }
0x10d4   :  { %7441 = vmatpush3.msra.mxu1 %v7941_v39 }
0x10d5   :  { %7442 = vmatprep.subr.mxu1 %v7943_v36 }
0x10d6   :  { %7443 = vmatpush3.msra.mxu1 %v7943_v36 }
0x10d7   :  { %7445 = vmatmul.mubr.f32.vlgmr.msra.gmra.mxu1 %v9490_v19 }
0x10d8   :  { %7447 = vmatprep.mubr.f32.mxu1 %v9493_v16 }
0x10db   :  { %7448 = vmatmul.mubr.f32.gmra.mxu1 %v9496_v7 }
0x10dc   :  { %7450 = vmatprep.mubr.f32.mxu1 %v9499_v13 }
0x10df   :  { %7451 = vmatmul.mubr.f32.gmra.mxu1 %v9502_v20 }
0x10e0   :  { %7453 = vmatprep.mubr.f32.mxu1 %v9505_v61 }
0x10e3   :  { %7454 = vmatmul.mubr.f32.gmra.mxu1 %v9508_v33 }
0x10e4   :  { %7456 = vmatprep.mubr.f32.mxu1 %v9511_v47 }
0x10e7   :  { %7457 = vmatmul.mubr.f32.gmra.mxu1 %v9514_v30 }
0x10e8   :  { %7459 = vmatprep.mubr.f32.mxu1 %v9517_v48 }
0x10eb   :  { %7460 = vmatmul.mubr.f32.gmra.mxu1 %v9520_v6 }
0x10ec   :  { %7462 = vmatprep.mubr.f32.mxu1 %v9523_v26 }
0x10ef   :  { %7463 = vmatmul.mubr.f32.gmra.mxu1 %v9526_v45 }
0x10f0   :  { %7465 = vmatprep.mubr.f32.mxu1 %v9529_v50 }
0x10f3   :  { %7466 = vmatmul.mubr.f32.gmra.mxu1 %v9532_v10 }
0x10f4   :  { %7556 = vmatprep.mubr.f32.mxu1 %v9487_v4 }
0x1197   :  { %v7446_v22 = vpop.f32.mrf.mxu1 }
0x1199   :  { %v4632_v21 = vpop.f32.mrf.mxu1 }
0x119a   :  { %7500 = vmatprep.mubr.f32.mxu0 %v4632_v21 }
0x119b   :  { %v7449_v42 = vpop.f32.mrf.mxu1  ;;  %7501 = vmatmul.mubr.f32.vlgmr.msra.gmra.mxu0 %v7446_v22 }
0x119d   :  { %v4642_v25 = vpop.f32.mrf.mxu1 }
0x119e   :  { %7503 = vmatprep.mubr.f32.mxu0 %v4642_v25 }
0x119f   :  { %v7452_v37 = vpop.f32.mrf.mxu1  ;;  %7504 = vmatmul.mubr.f32.gmra.mxu0 %v7449_v42 }
0x11a1   :  { %v4652_v1 = vpop.f32.mrf.mxu1 }
0x11a2   :  { %7506 = vmatprep.mubr.f32.mxu0 %v4652_v1 }
0x11a3   :  { %v7455_v57 = vpop.f32.mrf.mxu1  ;;  %7507 = vmatmul.mubr.f32.gmra.mxu0 %v7452_v37 }
0x11a5   :  { %v4662_v4 = vpop.f32.mrf.mxu1 }
0x11a6   :  { %7509 = vmatprep.mubr.f32.mxu0 %v4662_v4 }
0x11a7   :  { %v7458_v59 = vpop.f32.mrf.mxu1  ;;  %7510 = vmatmul.mubr.f32.gmra.mxu0 %v7455_v57 }
0x11a9   :  { %v4672_v8 = vpop.f32.mrf.mxu1 }
0x11aa   :  { %7512 = vmatprep.mubr.f32.mxu0 %v4672_v8 }
0x11ab   :  { %v7461_v35 = vpop.f32.mrf.mxu1  ;;  %7513 = vmatmul.mubr.f32.gmra.mxu0 %v7458_v59 }
0x11ad   :  { %v4682_v53 = vpop.f32.mrf.mxu1 }
0x11ae   :  { %7515 = vmatprep.mubr.f32.mxu0 %v4682_v53 }
0x11af   :  { %v7464_v5 = vpop.f32.mrf.mxu1  ;;  %7516 = vmatmul.mubr.f32.gmra.mxu0 %v7461_v35 }
0x11b1   :  { %v4692_v29 = vpop.f32.mrf.mxu1 }
0x11b2   :  { %7518 = vmatprep.mubr.f32.mxu0 %v4692_v29 }
0x11b3   :  { %v7467_v63 = vpop.f32.mrf.mxu1  ;;  %7519 = vmatmul.mubr.f32.gmra.mxu0 %v7464_v5 }
0x11b5   :  { %v4702_v41 = vpop.f32.mrf.mxu1 }
0x11b6   :  { %7521 = vmatprep.mubr.f32.mxu0 %v4702_v41 }
0x11b7   :  { %7522 = vmatmul.mubr.f32.gmra.mxu0 %v7467_v63 }
0x125b   :  { %v7502_v46 = vpop.f32.mrf.mxu0 }
0x125d   :  { %v4793_v62 = vpop.f32.mrf.mxu0 }
0x125f   :  { %v7505_v24 = vpop.f32.mrf.mxu0 }
0x1261   :  { %v4803_v49 = vpop.f32.mrf.mxu0 }
0x1263   :  { %v7508_v51 = vpop.f32.mrf.mxu0 }
0x1265   :  { %v4813_v3 = vpop.f32.mrf.mxu0 }
0x1267   :  { %v7511_v52 = vpop.f32.mrf.mxu0 }
0x1269   :  { %v4823_v56 = vpop.f32.mrf.mxu0 }
0x126b   :  { %v7514_v27 = vpop.f32.mrf.mxu0 }
0x126d   :  { %v4833_v31 = vpop.f32.mrf.mxu0 }
0x126f   :  { %v7517_v17 = vpop.f32.mrf.mxu0 }
0x1271   :  { %v4843_v23 = vpop.f32.mrf.mxu0 }
0x1273   :  { %v7520_v0 = vpop.f32.mrf.mxu0 }
0x1275   :  { %v4853_v34 = vpop.f32.mrf.mxu0 }
0x1277   :  { %v7523_v12 = vpop.f32.mrf.mxu0 }
0x1278   :  { %7944 = vtanh.f32 %v7523_v12 }
0x1279   :  { %v4863_v2 = vpop.f32.mrf.mxu0 }
0x127a   :  { %7946 = vtanh.f32 %v4863_v2 }
0x127b   :  { %7948 = vtanh.f32 %v7520_v0 }
0x127c   :  { %7950 = vtanh.f32 %v4853_v34 }
0x127d   :  { %7952 = vtanh.f32 %v7517_v17 }
0x127e   :  { %7954 = vtanh.f32 %v4843_v23 }
0x127f   :  { %7956 = vtanh.f32 %v7514_v27 }
0x1280   :  { %7958 = vtanh.f32 %v4833_v31 }
0x1281   :  { %7960 = vtanh.f32 %v7511_v52 }
0x1282   :  { %7962 = vtanh.f32 %v4823_v56 }
0x1283   :  { %7964 = vtanh.f32 %v7508_v51 }
0x1284   :  { %7966 = vtanh.f32 %v4813_v3 }
0x1285   :  { %v7945_v14 = vpop.eup %7944  ;;  %7968 = vtanh.f32 %v7505_v24 }
0x1286   :  { %7524 = vmatprep.subr.mxu1 %v7945_v14  ;;  %7970 = vtanh.f32 %v4803_v49 }
0x1287   :  { %v7947_v43 = vpop.eup %7946  ;;  %7525 = vmatpush3.msra.mxu1 %v7945_v14  ;;  %7972 = vtanh.f32 %v7502_v46 }
0x1288   :  { %7526 = vmatprep.subr.mxu1 %v7947_v43  ;;  %v7949_v28 = vpop.eup %7948  ;;  %7974 = vtanh.f32 %v4793_v62 }
0x1289   :  { %7527 = vmatpush3.msra.mxu1 %v7947_v43  ;;  %v7951_v38 = vpop.eup %7950 }
0x128a   :  { %7528 = vmatprep.subr.mxu1 %v7949_v28  ;;  %v7953_v44 = vpop.eup %7952 }
0x128b   :  { %7529 = vmatpush3.msra.mxu1 %v7949_v28  ;;  %v7955_v9 = vpop.eup %7954 }
0x128c   :  { %7530 = vmatprep.subr.mxu1 %v7951_v38  ;;  %v7957_v15 = vpop.eup %7956 }
0x128d   :  { %7531 = vmatpush3.msra.mxu1 %v7951_v38  ;;  %v7959_v54 = vpop.eup %7958 }
0x128e   :  { %7532 = vmatprep.subr.mxu1 %v7953_v44  ;;  %v7961_v40 = vpop.eup %7960 }
0x128f   :  { %7533 = vmatpush3.msra.mxu1 %v7953_v44  ;;  %v7963_v55 = vpop.eup %7962 }
0x1290   :  { %7534 = vmatprep.subr.mxu1 %v7955_v9  ;;  %v7965_v18 = vpop.eup %7964 }
0x1291   :  { %7535 = vmatpush3.msra.mxu1 %v7955_v9  ;;  %v7967_v58 = vpop.eup %7966 }
0x1292   :  { %7536 = vmatprep.subr.mxu1 %v7957_v15  ;;  %v7969_v60 = vpop.eup %7968 }
0x1293   :  { %7537 = vmatpush3.msra.mxu1 %v7957_v15  ;;  %v7971_v39 = vpop.eup %7970 }
0x1294   :  { %7538 = vmatprep.subr.mxu1 %v7959_v54  ;;  %v7973_v36 = vpop.eup %7972 }
0x1295   :  { %7539 = vmatpush3.msra.mxu1 %v7959_v54  ;;  %v7975_v11 = vpop.eup %7974 }
0x1296   :  { %7540 = vmatprep.subr.mxu1 %v7961_v40 }
0x1297   :  { %7541 = vmatpush3.msra.mxu1 %v7961_v40 }
0x1298   :  { %7542 = vmatprep.subr.mxu1 %v7963_v55 }
0x1299   :  { %7543 = vmatpush3.msra.mxu1 %v7963_v55 }
0x129a   :  { %7544 = vmatprep.subr.mxu1 %v7965_v18 }
0x129b   :  { %7545 = vmatpush3.msra.mxu1 %v7965_v18 }
0x129c   :  { %7546 = vmatprep.subr.mxu1 %v7967_v58 }
0x129d   :  { %7547 = vmatpush3.msra.mxu1 %v7967_v58 }
0x129e   :  { %7548 = vmatprep.subr.mxu1 %v7969_v60 }
0x129f   :  { %7549 = vmatpush3.msra.mxu1 %v7969_v60 }
0x12a0   :  { %7550 = vmatprep.subr.mxu1 %v7971_v39 }
0x12a1   :  { %7551 = vmatpush3.msra.mxu1 %v7971_v39 }
0x12a2   :  { %7552 = vmatprep.subr.mxu1 %v7973_v36 }
0x12a3   :  { %7553 = vmatpush3.msra.mxu1 %v7973_v36 }
0x12a4   :  { %7554 = vmatprep.subr.mxu1 %v7975_v11 }
0x12a5   :  { %7555 = vmatpush3.msra.mxu1 %v7975_v11 }
0x12a6   :  { %7557 = vmatmul.mubr.f32.vlgmr.msra.gmra.mxu1 %v9490_v19 }
0x12a7   :  { %7559 = vmatprep.mubr.f32.mxu1 %v9493_v16 }
0x12aa   :  { %7560 = vmatmul.mubr.f32.gmra.mxu1 %v9496_v7 }
0x12ab   :  { %7562 = vmatprep.mubr.f32.mxu1 %v9499_v13 }
0x12ae   :  { %7563 = vmatmul.mubr.f32.gmra.mxu1 %v9502_v20 }
0x12af   :  { %7565 = vmatprep.mubr.f32.mxu1 %v9505_v61 }
0x12b2   :  { %7566 = vmatmul.mubr.f32.gmra.mxu1 %v9508_v33 }
0x12b3   :  { %7568 = vmatprep.mubr.f32.mxu1 %v9511_v47 }
0x12b6   :  { %7569 = vmatmul.mubr.f32.gmra.mxu1 %v9514_v30 }
0x12b7   :  { %7571 = vmatprep.mubr.f32.mxu1 %v9517_v48 }
0x12ba   :  { %7572 = vmatmul.mubr.f32.gmra.mxu1 %v9520_v6 }
0x12bb   :  { %7574 = vmatprep.mubr.f32.mxu1 %v9523_v26 }
0x12be   :  { %7575 = vmatmul.mubr.f32.gmra.mxu1 %v9526_v45 }
0x12bf   :  { %7577 = vmatprep.mubr.f32.mxu1 %v9529_v50 }
0x12c2   :  { %7578 = vmatmul.mubr.f32.gmra.mxu1 %v9532_v10 }
0x1366   :  { %v9584_v19 = vpop.f32.mrf.mxu1 }
0x1367   :  { %5034 = vst [vmem:[%s8608_s11 + $0x8] sm:$0xff] %v9584_v19 }
0x1368   :  { %v4954_v16 = vpop.f32.mrf.mxu1 }
0x1369   :  { %5033 = vst [vmem:[%s8608_s11] sm:$0xff] %v4954_v16  ;;  %7612 = vmatprep.mubr.f32.mxu0 %v4954_v16 }
0x136a   :  { %v7561_v7 = vpop.f32.mrf.mxu1 }
0x136b   :  { %5036 = vst [vmem:[%s8608_s11 + $0x18] sm:$0xff] %v7561_v7 }
0x136c   :  { %v4964_v13 = vpop.f32.mrf.mxu1 }
0x136d   :  { %5035 = vst [vmem:[%s8608_s11 + $0x10] sm:$0xff] %v4964_v13 }
0x136e   :  { %v7564_v20 = vpop.f32.mrf.mxu1 }
0x136f   :  { %5038 = vst [vmem:[%s8608_s11 + $0x28] sm:$0xff] %v7564_v20 }
0x1370   :  { %v4974_v61 = vpop.f32.mrf.mxu1 }
0x1371   :  { %5037 = vst [vmem:[%s8608_s11 + $0x20] sm:$0xff] %v4974_v61 }
0x1372   :  { %v7567_v33 = vpop.f32.mrf.mxu1 }
0x1373   :  { %5040 = vst [vmem:[%s8608_s11 + $0x38] sm:$0xff] %v7567_v33 }
0x1374   :  { %v4984_v47 = vpop.f32.mrf.mxu1 }
0x1375   :  { %5039 = vst [vmem:[%s8608_s11 + $0x30] sm:$0xff] %v4984_v47 }
0x1376   :  { %v7570_v30 = vpop.f32.mrf.mxu1 }
0x1377   :  { %5042 = vst [vmem:[%s8608_s11 + $0x48] sm:$0xff] %v7570_v30 }
0x1378   :  { %v4994_v48 = vpop.f32.mrf.mxu1 }
0x1379   :  { %5041 = vst [vmem:[%s8608_s11 + $0x40] sm:$0xff] %v4994_v48 }
0x137a   :  { %v7573_v6 = vpop.f32.mrf.mxu1 }
0x137b   :  { %5044 = vst [vmem:[%s8608_s11 + $0x58] sm:$0xff] %v7573_v6 }
0x137c   :  { %v5004_v26 = vpop.f32.mrf.mxu1 }
0x137d   :  { %5043 = vst [vmem:[%s8608_s11 + $0x50] sm:$0xff] %v5004_v26 }
0x137e   :  { %v7576_v45 = vpop.f32.mrf.mxu1 }
0x137f   :  { %5046 = vst [vmem:[%s8608_s11 + $0x68] sm:$0xff] %v7576_v45 }
0x1380   :  { %v5014_v50 = vpop.f32.mrf.mxu1 }
0x1381   :  { %5045 = vst [vmem:[%s8608_s11 + $0x60] sm:$0xff] %v5014_v50 }
0x1382   :  { %v7579_v10 = vpop.f32.mrf.mxu1 }
0x1383   :  { %5048 = vst [vmem:[%s8608_s11 + $0x78] sm:$0xff] %v7579_v10  ;;  %7580 = vmatprep.subr.mxu0 %v7579_v10 }
0x1384   :  { %v5024_v32 = vpop.f32.mrf.mxu1  ;;  %7581 = vmatpush3.xpose.msra.mxu0 %v7579_v10 }
0x1385   :  { %5047 = vst [vmem:[%s8608_s11 + $0x70] sm:$0xff] %v5024_v32  ;;  %7582 = vmatprep.subr.mxu0 %v5024_v32 }
0x1388   :  { %7583 = vmatpush3.xpose.msra.mxu0 %v5024_v32 }
0x1389   :  { %7584 = vmatprep.subr.mxu0 %v7576_v45 }
0x138c   :  { %7585 = vmatpush3.xpose.msra.mxu0 %v7576_v45 }
0x138d   :  { %7586 = vmatprep.subr.mxu0 %v5014_v50 }
0x1390   :  { %7587 = vmatpush3.xpose.msra.mxu0 %v5014_v50 }
0x1391   :  { %7588 = vmatprep.subr.mxu0 %v7573_v6 }
0x1394   :  { %7589 = vmatpush3.xpose.msra.mxu0 %v7573_v6 }
0x1395   :  { %7590 = vmatprep.subr.mxu0 %v5004_v26 }
0x1398   :  { %7591 = vmatpush3.xpose.msra.mxu0 %v5004_v26 }
0x1399   :  { %7592 = vmatprep.subr.mxu0 %v7570_v30 }
0x139c   :  { %7593 = vmatpush3.xpose.msra.mxu0 %v7570_v30 }
0x139d   :  { %7594 = vmatprep.subr.mxu0 %v4994_v48 }
0x13a0   :  { %7595 = vmatpush3.xpose.msra.mxu0 %v4994_v48 }
0x13a1   :  { %7596 = vmatprep.subr.mxu0 %v7567_v33 }
0x13a4   :  { %7597 = vmatpush3.xpose.msra.mxu0 %v7567_v33 }
0x13a5   :  { %7598 = vmatprep.subr.mxu0 %v4984_v47 }
0x13a8   :  { %7599 = vmatpush3.xpose.msra.mxu0 %v4984_v47 }
0x13a9   :  { %7600 = vmatprep.subr.mxu0 %v7564_v20 }
0x13ac   :  { %7601 = vmatpush3.xpose.msra.mxu0 %v7564_v20 }
0x13ad   :  { %7602 = vmatprep.subr.mxu0 %v4974_v61 }
0x13b0   :  { %7603 = vmatpush3.xpose.msra.mxu0 %v4974_v61 }
0x13b1   :  { %7604 = vmatprep.subr.mxu0 %v7561_v7 }
0x13b4   :  { %7605 = vmatpush3.xpose.msra.mxu0 %v7561_v7 }
0x13b5   :  { %7606 = vmatprep.subr.mxu0 %v4964_v13 }
0x13b8   :  { %7607 = vmatpush3.xpose.msra.mxu0 %v4964_v13 }
0x13b9   :  { %7608 = vmatprep.subr.mxu0 %v9584_v19 }
0x13bc   :  { %7609 = vmatpush3.xpose.msra.mxu0 %v9584_v19 }
0x13bd   :  { %7610 = vmatprep.subr.mxu0 %v4954_v16 }
0x13c0   :  { %7611 = vmatpush3.xpose.msra.mxu0 %v4954_v16  ;;  %v5050_v16 = vld [vmem:[%s8603_s5 + $0x8] sm:$0xff] }
0x13c3   :  { %7613 = vmatmul.mubr.f32.vlgmr.msra.gmra.mxu0 %v9584_v19 }
0x13c4   :  { %7615 = vmatprep.mubr.f32.mxu0 %v4964_v13 }
0x13c7   :  { %7616 = vmatmul.mubr.f32.gmra.mxu0 %v7561_v7 }
0x13c8   :  { %7618 = vmatprep.mubr.f32.mxu0 %v4974_v61  ;;  %v5049_v61 = vld [vmem:[%s8603_s5] sm:$0xff] }
0x13cb   :  { %7619 = vmatmul.mubr.f32.gmra.mxu0 %v7564_v20 }
0x13cc   :  { %7621 = vmatprep.mubr.f32.mxu0 %v4984_v47 }
0x13cf   :  { %7622 = vmatmul.mubr.f32.gmra.mxu0 %v7567_v33 }
0x13d0   :  { %7624 = vmatprep.mubr.f32.mxu0 %v4994_v48 }
0x13d3   :  { %7625 = vmatmul.mubr.f32.gmra.mxu0 %v7570_v30 }
0x13d4   :  { %7627 = vmatprep.mubr.f32.mxu0 %v5004_v26 }
0x13d7   :  { %7628 = vmatmul.mubr.f32.gmra.mxu0 %v7573_v6  ;;  %v5052_v6 = vld [vmem:[%s8603_s5 + $0x18] sm:$0xff] }
0x13d8   :  { %7630 = vmatprep.mubr.f32.mxu0 %v5014_v50 }
0x13db   :  { %7631 = vmatmul.mubr.f32.gmra.mxu0 %v7576_v45 }
0x13dc   :  { %7633 = vmatprep.mubr.f32.mxu0 %v5024_v32  ;;  %v5051_v32 = vld [vmem:[%s8603_s5 + $0x10] sm:$0xff] }
0x13df   :  { %7634 = vmatmul.mubr.f32.gmra.mxu0 %v7579_v10 }
0x1483   :  { %v7614_v22 = vpop.f32.mrf.mxu0 }
0x1484   :  { %v5421_v21 = vmul.f32 -1.442695, %v7614_v22 }
0x1485   :  { %v5131_v42 = vpop.f32.mrf.mxu0 }
0x1486   :  { %7976 = vpow2.f32 %v5421_v21  ;;  %v5420_v25 = vmul.f32 -1.442695, %v5131_v42 }
0x1487   :  { %v7617_v37 = vpop.f32.mrf.mxu0 }
0x1488   :  { %7978 = vpow2.f32 %v5420_v25  ;;  %v5423_v1 = vmul.f32 -1.442695, %v7617_v37  ;;  %v5054_v37 = vld [vmem:[%s8603_s5 + $0x28] sm:$0xff] }
0x1489   :  { %v5141_v57 = vpop.f32.mrf.mxu0 }
0x148a   :  { %7980 = vpow2.f32 %v5423_v1  ;;  %v5422_v4 = vmul.f32 -1.442695, %v5141_v57 }
0x148b   :  { %v7620_v59 = vpop.f32.mrf.mxu0 }
0x148c   :  { %7982 = vpow2.f32 %v5422_v4  ;;  %v5425_v8 = vmul.f32 -1.442695, %v7620_v59 }
0x148d   :  { %v5151_v35 = vpop.f32.mrf.mxu0 }
0x148e   :  { %7984 = vpow2.f32 %v5425_v8  ;;  %v5424_v53 = vmul.f32 -1.442695, %v5151_v35  ;;  %v5053_v8 = vld [vmem:[%s8603_s5 + $0x20] sm:$0xff] }
0x148f   :  { %v7623_v5 = vpop.f32.mrf.mxu0 }
0x1490   :  { %7986 = vpow2.f32 %v5424_v53  ;;  %v5427_v29 = vmul.f32 -1.442695, %v7623_v5 }
0x1491   :  { %v5161_v63 = vpop.f32.mrf.mxu0 }
0x1492   :  { %7988 = vpow2.f32 %v5427_v29  ;;  %v5426_v41 = vmul.f32 -1.442695, %v5161_v63  ;;  %v5056_v63 = vld [vmem:[%s8603_s5 + $0x38] sm:$0xff] }
0x1493   :  { %v7977_v46 = vpop.eup %7976  ;;  %v7626_v62 = vpop.f32.mrf.mxu0 }
0x1494   :  { %v5259_v24 = vadd.f32 1.0, %v7977_v46  ;;  %7990 = vpow2.f32 %v5426_v41  ;;  %v5429_v49 = vmul.f32 -1.442695, %v7626_v62 }
0x1495   :  { %v7979_v51 = vpop.eup %7978  ;;  %v5171_v3 = vpop.f32.mrf.mxu0 }
0x1496   :  { %7992 = vrcp.f32 %v5259_v24  ;;  %v5258_v52 = vadd.f32 1.0, %v7979_v51  ;;  %v5428_v56 = vmul.f32 -1.442695, %v5171_v3 }
0x1497   :  { %v7981_v27 = vpop.eup %7980  ;;  %7994 = vpow2.f32 %v5429_v49  ;;  %v7629_v31 = vpop.f32.mrf.mxu0  ;;  %v5055_v49 = vld [vmem:[%s8603_s5 + $0x30] sm:$0xff] }
0x1498   :  { %7996 = vrcp.f32 %v5258_v52  ;;  %v5261_v17 = vadd.f32 1.0, %v7981_v27  ;;  %v5431_v23 = vmul.f32 -1.442695, %v7629_v31  ;;  %v5058_v31 = vld [vmem:[%s8603_s5 + $0x48] sm:$0xff] }
0x1499   :  { %v7983_v0 = vpop.eup %7982  ;;  %7998 = vpow2.f32 %v5428_v56  ;;  %v5181_v34 = vpop.f32.mrf.mxu0 }
0x149a   :  { %8000 = vrcp.f32 %v5261_v17  ;;  %v5260_v12 = vadd.f32 1.0, %v7983_v0  ;;  %v5430_v2 = vmul.f32 -1.442695, %v5181_v34  ;;  %v5057_v0 = vld [vmem:[%s8603_s5 + $0x40] sm:$0xff] }
0x149b   :  { %v7985_v14 = vpop.eup %7984  ;;  %8002 = vpow2.f32 %v5431_v23  ;;  %v7632_v43 = vpop.f32.mrf.mxu0 }
0x149c   :  { %8004 = vrcp.f32 %v5260_v12  ;;  %v5263_v28 = vadd.f32 1.0, %v7985_v14  ;;  %v5433_v38 = vmul.f32 -1.442695, %v7632_v43 }
0x149d   :  { %v7987_v44 = vpop.eup %7986  ;;  %8006 = vpow2.f32 %v5430_v2  ;;  %v5191_v9 = vpop.f32.mrf.mxu0  ;;  %v5060_v2 = vld [vmem:[%s8603_s5 + $0x58] sm:$0xff] }
0x149e   :  { %8008 = vrcp.f32 %v5263_v28  ;;  %v5262_v15 = vadd.f32 1.0, %v7987_v44  ;;  %v5432_v54 = vmul.f32 -1.442695, %v5191_v9  ;;  %v5059_v28 = vld [vmem:[%s8603_s5 + $0x50] sm:$0xff]  ;;  %v5062_v9 = vld [vmem:[%s8603_s5 + $0x68] sm:$0xff] }
0x149f   :  { %v7989_v40 = vpop.eup %7988  ;;  %8010 = vpow2.f32 %v5433_v38  ;;  %v7635_v55 = vpop.f32.mrf.mxu0 }
0x14a0   :  { %8012 = vrcp.f32 %v5262_v15  ;;  %v5265_v18 = vadd.f32 1.0, %v7989_v40  ;;  %v5435_v58 = vmul.f32 -1.442695, %v7635_v55  ;;  %v5061_v40 = vld [vmem:[%s8603_s5 + $0x60] sm:$0xff] }
0x14a1   :  { %v7991_v60 = vpop.eup %7990  ;;  %8014 = vpow2.f32 %v5432_v54  ;;  %v5201_v39 = vpop.f32.mrf.mxu0 }
0x14a2   :  { %8016 = vrcp.f32 %v5265_v18  ;;  %v5264_v36 = vadd.f32 1.0, %v7991_v60  ;;  %v5434_v11 = vmul.f32 -1.442695, %v5201_v39 }
0x14a3   :  { %v7993_v19 = vpop.eup %7992  ;;  %8018 = vpow2.f32 %v5435_v58  ;;  %v5064_v58 = vld [vmem:[%s8603_s5 + $0x78] sm:$0xff] }
0x14a4   :  { %v7995_v7 = vpop.eup %7994  ;;  %v5307_v13 = vadd.f32 %v7993_v19, %v5050_v16  ;;  %8020 = vrcp.f32 %v5264_v36  ;;  %v5063_v36 = vld [vmem:[%s8603_s5 + $0x70] sm:$0xff] }
0x14a5   :  { %v7997_v20 = vpop.eup %7996  ;;  %v5267_v33 = vadd.f32 1.0, %v7995_v7  ;;  %8022 = vpow2.f32 %v5434_v11 }
0x14a6   :  { %v7999_v47 = vpop.eup %7998  ;;  %5323 = vst [vmem:[%s8603_s5 + $0x8] sm:$0xff] %v5307_v13  ;;  %v5306_v30 = vadd.f32 %v7997_v20, %v5049_v61 }
0x14a7   :  { %v8001_v48 = vpop.eup %8000  ;;  %8024 = vrcp.f32 %v5267_v33  ;;  %v5266_v26 = vadd.f32 1.0, %v7999_v47 }
0x14a8   :  { %v8003_v45 = vpop.eup %8002  ;;  %5322 = vst [vmem:[%s8603_s5] sm:$0xff] %v5306_v30  ;;  %v5309_v50 = vadd.f32 %v8001_v48, %v5052_v6 }
0x14a9   :  { %v8005_v10 = vpop.eup %8004  ;;  %8026 = vrcp.f32 %v5266_v26  ;;  %v5269_v22 = vadd.f32 1.0, %v8003_v45 }
0x14aa   :  { %v8007_v21 = vpop.eup %8006  ;;  %5325 = vst [vmem:[%s8603_s5 + $0x18] sm:$0xff] %v5309_v50  ;;  %v5308_v42 = vadd.f32 %v8005_v10, %v5051_v32 }
0x14ab   :  { %v8009_v25 = vpop.eup %8008  ;;  %8028 = vrcp.f32 %v5269_v22  ;;  %v5268_v1 = vadd.f32 1.0, %v8007_v21 }
0x14ac   :  { %v8011_v57 = vpop.eup %8010  ;;  %5324 = vst [vmem:[%s8603_s5 + $0x10] sm:$0xff] %v5308_v42  ;;  %v5311_v4 = vadd.f32 %v8009_v25, %v5054_v37 }
0x14ad   :  { %v8013_v59 = vpop.eup %8012  ;;  %8030 = vrcp.f32 %v5268_v1  ;;  %v5271_v35 = vadd.f32 1.0, %v8011_v57 }
0x14ae   :  { %v8015_v53 = vpop.eup %8014  ;;  %5327 = vst [vmem:[%s8603_s5 + $0x28] sm:$0xff] %v5311_v4  ;;  %v5310_v5 = vadd.f32 %v8013_v59, %v5053_v8 }
0x14af   :  { %v8017_v29 = vpop.eup %8016  ;;  %8032 = vrcp.f32 %v5271_v35  ;;  %v5270_v41 = vadd.f32 1.0, %v8015_v53 }
0x14b0   :  { %v8019_v46 = vpop.eup %8018  ;;  %5326 = vst [vmem:[%s8603_s5 + $0x20] sm:$0xff] %v5310_v5  ;;  %v5313_v62 = vadd.f32 %v8017_v29, %v5056_v63 }
0x14b1   :  { %v8021_v24 = vpop.eup %8020  ;;  %8034 = vrcp.f32 %v5270_v41  ;;  %v5273_v51 = vadd.f32 1.0, %v8019_v46 }
0x14b2   :  { %v8023_v3 = vpop.eup %8022  ;;  %5329 = vst [vmem:[%s8603_s5 + $0x38] sm:$0xff] %v5313_v62  ;;  %v5312_v52 = vadd.f32 %v8021_v24, %v5055_v49 }
0x14b3   :  { %8036 = vrcp.f32 %v5273_v51  ;;  %v5272_v56 = vadd.f32 1.0, %v8023_v3 }
0x14b4   :  { %v8025_v27 = vpop.eup %8024  ;;  %5328 = vst [vmem:[%s8603_s5 + $0x30] sm:$0xff] %v5312_v52 }
0x14b5   :  { %v5315_v17 = vadd.f32 %v8025_v27, %v5058_v31  ;;  %8038 = vrcp.f32 %v5272_v56 }
0x14b6   :  { %v8027_v23 = vpop.eup %8026 }
0x14b7   :  { %5331 = vst [vmem:[%s8603_s5 + $0x48] sm:$0xff] %v5315_v17  ;;  %v5314_v34 = vadd.f32 %v8027_v23, %v5057_v0 }
0x14b8   :  { %v8029_v12 = vpop.eup %8028 }
0x14b9   :  { %5330 = vst [vmem:[%s8603_s5 + $0x40] sm:$0xff] %v5314_v34  ;;  %v5317_v14 = vadd.f32 %v8029_v12, %v5060_v2 }
0x14ba   :  { %v8031_v43 = vpop.eup %8030 }
0x14bb   :  { %5333 = vst [vmem:[%s8603_s5 + $0x58] sm:$0xff] %v5317_v14  ;;  %v5316_v38 = vadd.f32 %v8031_v43, %v5059_v28 }
0x14bc   :  { %v8033_v44 = vpop.eup %8032 }
0x14bd   :  { %5332 = vst [vmem:[%s8603_s5 + $0x50] sm:$0xff] %v5316_v38  ;;  %v5319_v15 = vadd.f32 %v8033_v44, %v5062_v9 }
0x14be   :  { %v8035_v54 = vpop.eup %8034 }
0x14bf   :  { %5335 = vst [vmem:[%s8603_s5 + $0x68] sm:$0xff] %v5319_v15  ;;  %v5318_v55 = vadd.f32 %v8035_v54, %v5061_v40 }
0x14c0   :  { %v8037_v18 = vpop.eup %8036 }
0x14c1   :  { %5334 = vst [vmem:[%s8603_s5 + $0x60] sm:$0xff] %v5318_v55  ;;  %v5321_v60 = vadd.f32 %v8037_v18, %v5064_v58 }
0x14c2   :  { %v8039_v39 = vpop.eup %8038 }
0x14c3   :  { %5337 = vst [vmem:[%s8603_s5 + $0x78] sm:$0xff] %v5321_v60  ;;  %v5320_v11 = vadd.f32 %v8039_v39, %v5063_v36 }
0x14c5   :  { %5336 = vst [vmem:[%s8603_s5 + $0x70] sm:$0xff] %v5320_v11 }
0x14c6   :  { %5354 = vsyncpa [#allocation4], 1 }
0x14c7   :  { %5355 = vsyncpa [#allocation6], 1 }
0x14c8   :  { %5356 = vsyncpa [#allocation9], 1 }
0x14c9   :  { %5357 = vsyncpa [#allocation12], 1 }
0x14ca   :  { %5358 = vsyncpa [#allocation15], 1 }
0x14cb   :  { %5359 = vsyncpa [#allocation18], 1 }
0x14cc   :  { %5360 = vsyncpa [#allocation21], 1 }
0x14cd   :  { %5361 = vsyncpa [#allocation24], 1 }
0x14ce   :  { %5362 = vsyncpa [#allocation27], 1 }

</bundles_post_ra>
